<compile_context>
chip_gen: v7x
topology: tpu7x:2x2x1
jax: 0.10.0
libtpu: 0.0.40
codegen_flags: <defaults>
</compile_context>

<pallas_src>
import numpy as np
import jax
import jax.numpy as jnp
from jax.experimental import pallas as pl
from jax.experimental.pallas import tpu as pltpu

NEG_SLOPE = 0.01   # nn.LeakyReLU() default
BN_EPS = 1e-5      # nn.BatchNorm1d default
LANE = 128
SUBLANE = 8


def _round_up(n, m):
    return ((n + m - 1) // m) * m


def _leaky(v):
    return jnp.where(v >= 0, v, NEG_SLOPE * v)


def _linear(a, w_ref, b_ref):
    """a @ W + b on the MXU with f32 accumulation.  Activations are cast to the
    weight dtype (no-op for f32 weights, bf16 round for bf16 weights)."""
    w = w_ref[...]
    acc = jnp.dot(a.astype(w.dtype), w, preferred_element_type=jnp.float32)
    return acc + b_ref[...]


def vae_kernel(x_ref, eps_ref,
               w1_ref, b1_ref, w2_ref, b2_ref, w3_ref, b3_ref,        # encoder (BN folded)
               wmv_ref, bmv_ref,                                      # fused zmu|zlogvar head
               wd1_ref, bd1_ref, wd2_ref, bd2_ref, wd3_ref, bd3_ref,  # decoder (BN folded)
               zmuv_ref, xhat_ref):
    nzp = eps_ref.shape[-1]          # padded latent width (multiple of 128)
    x = x_ref[...]

    # ---- encoder (Dropout is identity in eval mode; BN folded into W/b) ----
    h = _leaky(_linear(x, w1_ref, b1_ref))
    h = _leaky(_linear(h, w2_ref, b2_ref))
    h = _leaky(_linear(h, w3_ref, b3_ref))

    # ---- fused latent heads (lane-aligned split) + reparameterize ----
    zmuv = _linear(h, wmv_ref, bmv_ref)          # (tb, 2*nzp) = [zmu | zlogvar]
    zmu = zmuv[:, :nzp]
    zlv = zmuv[:, nzp:]
    z = zmu + eps_ref[...].astype(jnp.float32) * jnp.exp(0.5 * zlv)

    # ---- decoder ----
    d = _leaky(_linear(z, wd1_ref, bd1_ref))
    d = _leaky(_linear(d, wd2_ref, bd2_ref))
    xhat = _linear(d, wd3_ref, bd3_ref)

    zmuv_ref[...] = zmuv.astype(zmuv_ref.dtype)
    xhat_ref[...] = xhat.astype(xhat_ref.dtype)


def _pick_tb(B, tb_max=512):
    """Batch-tile size: as large as possible (amortize the ~0.35 us per-step
    overhead, long M-stream into the MXU) while keeping >= 2 grid steps when
    B allows, so the 'parallel' axis can shard across TCs on v7x megacore."""
    tb = min(tb_max, _round_up(B, SUBLANE))
    if B > SUBLANE and pl.cdiv(B, tb) < 2:
        tb = _round_up(pl.cdiv(B, 2), SUBLANE)
    return tb


def vae_forward(x, eps_pad, folded_params, *, tb=None,
                out_dtype=jnp.float32, single_buffer_weights=True):
    B, nin = x.shape
    nzp = eps_pad.shape[1]
    nh = folded_params[0].shape[1]
    if tb is None:
        tb = _pick_tb(B)
    grid = (pl.cdiv(B, tb),)

    def rows(n):                          # batch-blocked activations / outputs
        return pl.BlockSpec((tb, n), lambda i: (i, 0))

    if single_buffer_weights:
        def resident(a):                  # constant index -> fetched once; 1 buffer
            return pl.BlockSpec(a.shape, lambda i: (0, 0),
                                pipeline_mode=pl.Buffered(1))
    else:
        def resident(a):
            return pl.BlockSpec(a.shape, lambda i: (0, 0))

    # VMEM budget derived from the actual footprint (2x headroom), floored at
    # 16 MiB and capped at 48 MiB so it stays inside v7x's 64 MiB per-TC VMEM.
    wbufs = 1 if single_buffer_weights else 2
    weight_bytes = wbufs * sum(a.size * a.dtype.itemsize for a in folded_params)
    out_isz = jnp.dtype(out_dtype).itemsize
    io_bytes = 2 * tb * (nin * x.dtype.itemsize + nzp * eps_pad.dtype.itemsize
                         + (2 * nzp + nin) * out_isz)
    scratch_bytes = 6 * tb * max(nh, nin, 2 * nzp) * 4
    vmem_limit = int(min(48 * 2**20,
                         max(16 * 2**20,
                             2 * (weight_bytes + io_bytes + scratch_bytes))))

    flops = 2 * B * (2 * nin * nh + 3 * nh * nh + 3 * nzp * nh)
    bytes_accessed = (
        x.size * x.dtype.itemsize + eps_pad.size * eps_pad.dtype.itemsize
        + sum(a.size * a.dtype.itemsize for a in folded_params)
        + B * (2 * nzp + nin) * out_isz)

    zmuv, xhat = pl.pallas_call(
        vae_kernel,
        grid=grid,
        in_specs=[rows(nin), rows(nzp)] + [resident(a) for a in folded_params],
        out_specs=(rows(2 * nzp), rows(nin)),
        out_shape=(
            jax.ShapeDtypeStruct((B, 2 * nzp), out_dtype),
            jax.ShapeDtypeStruct((B, nin), out_dtype),
        ),
        compiler_params=pltpu.CompilerParams(
            dimension_semantics=("parallel",),
            vmem_limit_bytes=vmem_limit,
        ),
        cost_estimate=pl.CostEstimate(
            flops=int(flops),
            transcendentals=int(B * nzp),
            bytes_accessed=int(bytes_accessed),
        ),
    )(x, eps_pad, *folded_params)
    return zmuv, xhat


def vae_apply(x, eps, folded, **kw):
    """folded = (params, nz, nzp) from fold_params.  Returns zmu, zlogvar, xhat."""
    params, nz, nzp = folded
    eps_pad = jnp.pad(eps, ((0, 0), (0, nzp - nz)))
    zmuv, xhat = vae_forward(x, eps_pad, params, **kw)
    return zmuv[:, :nz], zmuv[:, nzp:nzp + nz], xhat


def make_raw_params(key, nin, nh, nz):
    """Deterministic synthetic parameters (torch-Linear-like init) plus
    non-trivial BatchNorm running statistics so the eval-mode BN fold is
    actually exercised."""
    def lin(k, fan_in, fan_out):
        k1, k2 = jax.random.split(k)
        bound = 1.0 / np.sqrt(fan_in)
        w = jax.random.uniform(k1, (fan_in, fan_out), jnp.float32, -bound, bound)
        b = jax.random.uniform(k2, (1, fan_out), jnp.float32, -bound, bound)
        return w, b

    def bn(k, n):
        kg, kb, km, kv = jax.random.split(k, 4)
        gamma = jax.random.uniform(kg, (1, n), jnp.float32, 0.5, 1.5)
        beta = 0.1 * jax.random.normal(kb, (1, n), jnp.float32)
        mean = 0.1 * jax.random.normal(km, (1, n), jnp.float32)
        var = jax.random.uniform(kv, (1, n), jnp.float32, 0.5, 1.5)
        return gamma, beta, mean, var

    ks = jax.random.split(key, 11)
    p = {}
    p["w1"], p["b1"] = lin(ks[0], nin, nh); p["bn1"] = bn(ks[1], nh)
    p["w2"], p["b2"] = lin(ks[2], nh, nh);  p["bn2"] = bn(ks[3], nh)
    p["w3"], p["b3"] = lin(ks[4], nh, nh)
    p["wmu"], p["bmu"] = lin(ks[5], nh, nz)
    p["wlv"], p["blv"] = lin(ks[6], nh, nz)
    p["wd1"], p["bd1"] = lin(ks[7], nz, nh)
    p["wd2"], p["bd2"] = lin(ks[8], nh, nh); p["bnd2"] = bn(ks[9], nh)
    p["wd3"], p["bd3"] = lin(ks[10], nh, nin)
    return p


def fold_params(raw, weight_dtype=jnp.float32):
    """Fold eval-mode BN into the preceding Linear, fuse and lane-pad the
    mu/logvar heads (zmu -> lanes [0,nzp), zlogvar -> lanes [nzp,2*nzp)), and
    zero-pad wd1's latent rows to match.  Weights cast to `weight_dtype`
    (bf16 relative rounding is scale-invariant, so folding the BN scale before
    the cast does not amplify the relative quantization error); biases f32."""
    def fold_bn(w, b, stats):
        gamma, beta, mean, var = stats
        s = gamma / jnp.sqrt(var + BN_EPS)
        return w * s, b * s + (beta - mean * s)

    nz = raw["wmu"].shape[1]
    nzp = _round_up(max(nz, LANE), LANE)

    w1, b1 = fold_bn(raw["w1"], raw["b1"], raw["bn1"])
    w2, b2 = fold_bn(raw["w2"], raw["b2"], raw["bn2"])
    w3, b3 = raw["w3"], raw["b3"]

    padw = lambda w: jnp.pad(w, ((0, 0), (0, nzp - nz)))   # zero cols -> zmu_pad=0
    padb = lambda b: jnp.pad(b, ((0, 0), (0, nzp - nz)))   # zlv_pad=0 -> exp()=1, eps_pad=0
    wmv = jnp.concatenate([padw(raw["wmu"]), padw(raw["wlv"])], axis=1)
    bmv = jnp.concatenate([padb(raw["bmu"]), padb(raw["blv"])], axis=1)

    wd1 = jnp.pad(raw["wd1"], ((0, nzp - nz), (0, 0)))     # zero rows ignore padded z
    bd1 = raw["bd1"]
    wd2, bd2 = fold_bn(raw["wd2"], raw["bd2"], raw["bnd2"])
    wd3, bd3 = raw["wd3"], raw["bd3"]

    ws = tuple(w.astype(weight_dtype) for w in (w1, w2, w3, wmv, wd1, wd2, wd3))
    bs = tuple(b.astype(jnp.float32) for b in (b1, b2, b3, bmv, bd1, bd2, bd3))
    params = (ws[0], bs[0], ws[1], bs[1], ws[2], bs[2], ws[3], bs[3],
              ws[4], bs[4], ws[5], bs[5], ws[6], bs[6])
    return params, nz, nzp


def vae_reference(x, eps, raw):
    """Pure-JAX reference with the original (unfolded) torch eval-mode semantics."""
    def bn(h, stats):
        gamma, beta, mean, var = stats
        return (h - mean) / jnp.sqrt(var + BN_EPS) * gamma + beta

    h = _leaky(bn(x @ raw["w1"] + raw["b1"], raw["bn1"]))
    h = _leaky(bn(h @ raw["w2"] + raw["b2"], raw["bn2"]))
    h = _leaky(h @ raw["w3"] + raw["b3"])
    zmu = h @ raw["wmu"] + raw["bmu"]
    zlv = h @ raw["wlv"] + raw["blv"]
    z = zmu + eps * jnp.exp(0.5 * zlv)
    d = _leaky(z @ raw["wd1"] + raw["bd1"])
    d = _leaky(bn(d @ raw["wd2"] + raw["bd2"], raw["bnd2"]))
    xhat = d @ raw["wd3"] + raw["bd3"]
    return zmu, zlv, xhat


def vae_reference_folded(x, eps, folded):
    """Reference on the folded/padded params (upcast to f32) — validates the
    bf16-weight kernel path against identical effective weights."""
    params, nz, nzp = folded
    (w1, b1, w2, b2, w3, b3, wmv, bmv, wd1, bd1, wd2, bd2, wd3, bd3) = params
    up = lambda a: a.astype(jnp.float32)
    eps_pad = jnp.pad(eps, ((0, 0), (0, nzp - nz)))
    h = _leaky(x @ up(w1) + b1)
    h = _leaky(h @ up(w2) + b2)
    h = _leaky(h @ up(w3) + b3)
    zmuv = h @ up(wmv) + bmv
    zmu, zlv = zmuv[:, :nzp], zmuv[:, nzp:]
    z = zmu + eps_pad * jnp.exp(0.5 * zlv)
    d = _leaky(z @ up(wd1) + bd1)
    d = _leaky(d @ up(wd2) + bd2)
    xhat = d @ up(wd3) + bd3
    return zmuv[:, :nz], zmuv[:, nzp:nzp + nz], xhat


if __name__ == "__main__":
    # Small shapes consistent with VAE(nin, nz, nh): B=256 -> two batch tiles.
    B, NIN, NH, NZ = 256, 256, 128, 8

    key = jax.random.PRNGKey(0)
    kx, keps, kp = jax.random.split(key, 3)
    x = jax.random.normal(kx, (B, NIN), jnp.float32)
    eps = jax.random.normal(keps, (B, NZ), jnp.float32)   # torch.randn_like(mu)
    raw = make_raw_params(kp, NIN, NH, NZ)

    _single_buf = [True]

    def run(folded, **kw):
        try:
            return jax.block_until_ready(
                vae_apply(x, eps, folded,
                          single_buffer_weights=_single_buf[0], **kw))
        except Exception:
            if not _single_buf[0]:
                raise
            # TODO(synk): pl.Buffered(1) single-buffering rejected by this jax
            # version; fall back to default double-buffered resident weights.
            _single_buf[0] = False
            return jax.block_until_ready(
                vae_apply(x, eps, folded, single_buffer_weights=False, **kw))

    # ---- fp32 weights: check against the faithful (unfolded) torch semantics ----
    fp32_folded = fold_params(raw, jnp.float32)
    zmu, zlv, xhat = run(fp32_folded)
    rzmu, rzlv, rxhat = vae_reference(x, eps, raw)
    assert np.allclose(np.asarray(zmu), np.asarray(rzmu), atol=5e-4, rtol=5e-4)
    assert np.allclose(np.asarray(zlv), np.asarray(rzlv), atol=5e-4, rtol=5e-4)
    assert np.allclose(np.asarray(xhat), np.asarray(rxhat), atol=2e-3, rtol=2e-3)

    # ---- bf16 weights + bf16 xhat/zmuv writeback (HBM-optimized path):
    #      check against identical folded weights upcast to f32 ----
    bf16_folded = fold_params(raw, jnp.bfloat16)
    zmu_b, zlv_b, xhat_b = run(bf16_folded, out_dtype=jnp.bfloat16)
    fzmu, fzlv, fxhat = vae_reference_folded(x, eps, bf16_folded)
    to32 = lambda a: np.asarray(a.astype(jnp.float32))
    assert np.allclose(to32(zmu_b), np.asarray(fzmu), atol=5e-2, rtol=5e-2)
    assert np.allclose(to32(zlv_b), np.asarray(fzlv), atol=5e-2, rtol=5e-2)
    assert np.allclose(to32(xhat_b), np.asarray(fxhat), atol=5e-2, rtol=5e-2)

    print("KERNEL_OK")
</pallas_src>

<mosaic_0001>
module attributes {stable_mosaic.version = 11 : i64} {
  func.func @vae_kernel(%arg0: i32, %arg1: memref<128x256xf32, #tpu.memory_space<vmem>>, %arg2: memref<128x128xf32, #tpu.memory_space<vmem>>, %arg3: memref<256x128xf32, #tpu.memory_space<vmem>>, %arg4: memref<1x128xf32, #tpu.memory_space<vmem>>, %arg5: memref<128x128xf32, #tpu.memory_space<vmem>>, %arg6: memref<1x128xf32, #tpu.memory_space<vmem>>, %arg7: memref<128x128xf32, #tpu.memory_space<vmem>>, %arg8: memref<1x128xf32, #tpu.memory_space<vmem>>, %arg9: memref<128x256xf32, #tpu.memory_space<vmem>>, %arg10: memref<1x256xf32, #tpu.memory_space<vmem>>, %arg11: memref<128x128xf32, #tpu.memory_space<vmem>>, %arg12: memref<1x128xf32, #tpu.memory_space<vmem>>, %arg13: memref<128x128xf32, #tpu.memory_space<vmem>>, %arg14: memref<1x128xf32, #tpu.memory_space<vmem>>, %arg15: memref<128x256xf32, #tpu.memory_space<vmem>>, %arg16: memref<1x256xf32, #tpu.memory_space<vmem>>, %arg17: memref<128x256xf32, #tpu.memory_space<vmem>>, %arg18: memref<128x256xf32, #tpu.memory_space<vmem>>) attributes {dimension_semantics = [#tpu.dimension_semantics<parallel>], iteration_bounds = array<i64: 2>, scalar_prefetch = 0 : i64, scratch_operands = 0 : i64, tpu.core_type = #tpu.core_type<tc>, window_params = [{transform_indices = @transform_0, window_bounds = array<i64: 128, 256>}, {transform_indices = @transform_1, window_bounds = array<i64: 128, 128>}, {pipeline_mode = #tpu.pipeline_mode<synchronous>, transform_indices = @transform_2, window_bounds = array<i64: 256, 128>}, {pipeline_mode = #tpu.pipeline_mode<synchronous>, transform_indices = @transform_3, window_bounds = array<i64: 1, 128>}, {pipeline_mode = #tpu.pipeline_mode<synchronous>, transform_indices = @transform_4, window_bounds = array<i64: 128, 128>}, {pipeline_mode = #tpu.pipeline_mode<synchronous>, transform_indices = @transform_5, window_bounds = array<i64: 1, 128>}, {pipeline_mode = #tpu.pipeline_mode<synchronous>, transform_indices = @transform_6, window_bounds = array<i64: 128, 128>}, {pipeline_mode = #tpu.pipeline_mode<synchronous>, transform_indices = @transform_7, window_bounds = array<i64: 1, 128>}, {pipeline_mode = #tpu.pipeline_mode<synchronous>, transform_indices = @transform_8, window_bounds = array<i64: 128, 256>}, {pipeline_mode = #tpu.pipeline_mode<synchronous>, transform_indices = @transform_9, window_bounds = array<i64: 1, 256>}, {pipeline_mode = #tpu.pipeline_mode<synchronous>, transform_indices = @transform_10, window_bounds = array<i64: 128, 128>}, {pipeline_mode = #tpu.pipeline_mode<synchronous>, transform_indices = @transform_11, window_bounds = array<i64: 1, 128>}, {pipeline_mode = #tpu.pipeline_mode<synchronous>, transform_indices = @transform_12, window_bounds = array<i64: 128, 128>}, {pipeline_mode = #tpu.pipeline_mode<synchronous>, transform_indices = @transform_13, window_bounds = array<i64: 1, 128>}, {pipeline_mode = #tpu.pipeline_mode<synchronous>, transform_indices = @transform_14, window_bounds = array<i64: 128, 256>}, {pipeline_mode = #tpu.pipeline_mode<synchronous>, transform_indices = @transform_15, window_bounds = array<i64: 1, 256>}, {transform_indices = @transform_16, window_bounds = array<i64: 128, 256>}, {transform_indices = @transform_17, window_bounds = array<i64: 128, 256>}]} {
    %c0 = arith.constant 0 : index
    %c0_0 = arith.constant 0 : index
    %0 = vector.load %arg1[%c0, %c0_0] : memref<128x256xf32, #tpu.memory_space<vmem>>, vector<128x256xf32>
    %c0_1 = arith.constant 0 : index
    %c0_2 = arith.constant 0 : index
    %1 = vector.load %arg3[%c0_1, %c0_2] : memref<256x128xf32, #tpu.memory_space<vmem>>, vector<256x128xf32>
    %cst = arith.constant dense<0.000000e+00> : vector<128x128xf32>
    %2 = tpu.matmul %0, %1, %cst {dimension_numbers = #tpu.dot_dimension_numbers<[1], [0], [0], [1], [0, 0, 1, 1], [], []>} : vector<128x256xf32>, vector<256x128xf32>, vector<128x128xf32> -> vector<128x128xf32>
    %c0_3 = arith.constant 0 : index
    %c0_4 = arith.constant 0 : index
    %3 = vector.load %arg4[%c0_3, %c0_4] : memref<1x128xf32, #tpu.memory_space<vmem>>, vector<1x128xf32>
    %4 = vector.broadcast %3 : vector<1x128xf32> to vector<128x128xf32>
    %5 = arith.addf %2, %4 : vector<128x128xf32>
    %cst_5 = arith.constant 0.000000e+00 : f32
    %6 = vector.broadcast %cst_5 : f32 to vector<128x128xf32>
    %7 = arith.cmpf oge, %5, %6 : vector<128x128xf32>
    %cst_6 = arith.constant 0.00999999977 : f32
    %8 = vector.broadcast %cst_6 : f32 to vector<128x128xf32>
    %9 = arith.mulf %8, %5 : vector<128x128xf32>
    %10 = arith.select %7, %5, %9 : vector<128x128xi1>, vector<128x128xf32>
    %c0_7 = arith.constant 0 : index
    %c0_8 = arith.constant 0 : index
    %11 = vector.load %arg5[%c0_7, %c0_8] : memref<128x128xf32, #tpu.memory_space<vmem>>, vector<128x128xf32>
    %cst_9 = arith.constant dense<0.000000e+00> : vector<128x128xf32>
    %12 = tpu.matmul %10, %11, %cst_9 {dimension_numbers = #tpu.dot_dimension_numbers<[1], [0], [0], [1], [0, 0, 1, 1], [], []>} : vector<128x128xf32>, vector<128x128xf32>, vector<128x128xf32> -> vector<128x128xf32>
    %c0_10 = arith.constant 0 : index
    %c0_11 = arith.constant 0 : index
    %13 = vector.load %arg6[%c0_10, %c0_11] : memref<1x128xf32, #tpu.memory_space<vmem>>, vector<1x128xf32>
    %14 = vector.broadcast %13 : vector<1x128xf32> to vector<128x128xf32>
    %15 = arith.addf %12, %14 : vector<128x128xf32>
    %cst_12 = arith.constant 0.000000e+00 : f32
    %16 = vector.broadcast %cst_12 : f32 to vector<128x128xf32>
    %17 = arith.cmpf oge, %15, %16 : vector<128x128xf32>
    %cst_13 = arith.constant 0.00999999977 : f32
    %18 = vector.broadcast %cst_13 : f32 to vector<128x128xf32>
    %19 = arith.mulf %18, %15 : vector<128x128xf32>
    %20 = arith.select %17, %15, %19 : vector<128x128xi1>, vector<128x128xf32>
    %c0_14 = arith.constant 0 : index
    %c0_15 = arith.constant 0 : index
    %21 = vector.load %arg7[%c0_14, %c0_15] : memref<128x128xf32, #tpu.memory_space<vmem>>, vector<128x128xf32>
    %cst_16 = arith.constant dense<0.000000e+00> : vector<128x128xf32>
    %22 = tpu.matmul %20, %21, %cst_16 {dimension_numbers = #tpu.dot_dimension_numbers<[1], [0], [0], [1], [0, 0, 1, 1], [], []>} : vector<128x128xf32>, vector<128x128xf32>, vector<128x128xf32> -> vector<128x128xf32>
    %c0_17 = arith.constant 0 : index
    %c0_18 = arith.constant 0 : index
    %23 = vector.load %arg8[%c0_17, %c0_18] : memref<1x128xf32, #tpu.memory_space<vmem>>, vector<1x128xf32>
    %24 = vector.broadcast %23 : vector<1x128xf32> to vector<128x128xf32>
    %25 = arith.addf %22, %24 : vector<128x128xf32>
    %cst_19 = arith.constant 0.000000e+00 : f32
    %26 = vector.broadcast %cst_19 : f32 to vector<128x128xf32>
    %27 = arith.cmpf oge, %25, %26 : vector<128x128xf32>
    %cst_20 = arith.constant 0.00999999977 : f32
    %28 = vector.broadcast %cst_20 : f32 to vector<128x128xf32>
    %29 = arith.mulf %28, %25 : vector<128x128xf32>
    %30 = arith.select %27, %25, %29 : vector<128x128xi1>, vector<128x128xf32>
    %c0_21 = arith.constant 0 : index
    %c0_22 = arith.constant 0 : index
    %31 = vector.load %arg9[%c0_21, %c0_22] : memref<128x256xf32, #tpu.memory_space<vmem>>, vector<128x256xf32>
    %cst_23 = arith.constant dense<0.000000e+00> : vector<128x256xf32>
    %32 = tpu.matmul %30, %31, %cst_23 {dimension_numbers = #tpu.dot_dimension_numbers<[1], [0], [0], [1], [0, 0, 1, 1], [], []>} : vector<128x128xf32>, vector<128x256xf32>, vector<128x256xf32> -> vector<128x256xf32>
    %c0_24 = arith.constant 0 : index
    %c0_25 = arith.constant 0 : index
    %33 = vector.load %arg10[%c0_24, %c0_25] : memref<1x256xf32, #tpu.memory_space<vmem>>, vector<1x256xf32>
    %34 = vector.broadcast %33 : vector<1x256xf32> to vector<128x256xf32>
    %35 = arith.addf %32, %34 : vector<128x256xf32>
    %36 = vector.extract_strided_slice %35 {offsets = [0, 0], sizes = [128, 128], strides = [1, 1]} : vector<128x256xf32> to vector<128x128xf32>
    %37 = vector.extract_strided_slice %35 {offsets = [0, 128], sizes = [128, 128], strides = [1, 1]} : vector<128x256xf32> to vector<128x128xf32>
    %c0_26 = arith.constant 0 : index
    %c0_27 = arith.constant 0 : index
    %38 = vector.load %arg2[%c0_26, %c0_27] : memref<128x128xf32, #tpu.memory_space<vmem>>, vector<128x128xf32>
    %cst_28 = arith.constant 5.000000e-01 : f32
    %39 = vector.broadcast %cst_28 : f32 to vector<128x128xf32>
    %40 = arith.mulf %39, %37 : vector<128x128xf32>
    %41 = math.exp %40 : vector<128x128xf32>
    %42 = arith.mulf %38, %41 : vector<128x128xf32>
    %43 = arith.addf %36, %42 : vector<128x128xf32>
    %c0_29 = arith.constant 0 : index
    %c0_30 = arith.constant 0 : index
    %44 = vector.load %arg11[%c0_29, %c0_30] : memref<128x128xf32, #tpu.memory_space<vmem>>, vector<128x128xf32>
    %cst_31 = arith.constant dense<0.000000e+00> : vector<128x128xf32>
    %45 = tpu.matmul %43, %44, %cst_31 {dimension_numbers = #tpu.dot_dimension_numbers<[1], [0], [0], [1], [0, 0, 1, 1], [], []>} : vector<128x128xf32>, vector<128x128xf32>, vector<128x128xf32> -> vector<128x128xf32>
    %c0_32 = arith.constant 0 : index
    %c0_33 = arith.constant 0 : index
    %46 = vector.load %arg12[%c0_32, %c0_33] : memref<1x128xf32, #tpu.memory_space<vmem>>, vector<1x128xf32>
    %47 = vector.broadcast %46 : vector<1x128xf32> to vector<128x128xf32>
    %48 = arith.addf %45, %47 : vector<128x128xf32>
    %cst_34 = arith.constant 0.000000e+00 : f32
    %49 = vector.broadcast %cst_34 : f32 to vector<128x128xf32>
    %50 = arith.cmpf oge, %48, %49 : vector<128x128xf32>
    %cst_35 = arith.constant 0.00999999977 : f32
    %51 = vector.broadcast %cst_35 : f32 to vector<128x128xf32>
    %52 = arith.mulf %51, %48 : vector<128x128xf32>
    %53 = arith.select %50, %48, %52 : vector<128x128xi1>, vector<128x128xf32>
    %c0_36 = arith.constant 0 : index
    %c0_37 = arith.constant 0 : index
    %54 = vector.load %arg13[%c0_36, %c0_37] : memref<128x128xf32, #tpu.memory_space<vmem>>, vector<128x128xf32>
    %cst_38 = arith.constant dense<0.000000e+00> : vector<128x128xf32>
    %55 = tpu.matmul %53, %54, %cst_38 {dimension_numbers = #tpu.dot_dimension_numbers<[1], [0], [0], [1], [0, 0, 1, 1], [], []>} : vector<128x128xf32>, vector<128x128xf32>, vector<128x128xf32> -> vector<128x128xf32>
    %c0_39 = arith.constant 0 : index
    %c0_40 = arith.constant 0 : index
    %56 = vector.load %arg14[%c0_39, %c0_40] : memref<1x128xf32, #tpu.memory_space<vmem>>, vector<1x128xf32>
    %57 = vector.broadcast %56 : vector<1x128xf32> to vector<128x128xf32>
    %58 = arith.addf %55, %57 : vector<128x128xf32>
    %cst_41 = arith.constant 0.000000e+00 : f32
    %59 = vector.broadcast %cst_41 : f32 to vector<128x128xf32>
    %60 = arith.cmpf oge, %58, %59 : vector<128x128xf32>
    %cst_42 = arith.constant 0.00999999977 : f32
    %61 = vector.broadcast %cst_42 : f32 to vector<128x128xf32>
    %62 = arith.mulf %61, %58 : vector<128x128xf32>
    %63 = arith.select %60, %58, %62 : vector<128x128xi1>, vector<128x128xf32>
    %c0_43 = arith.constant 0 : index
    %c0_44 = arith.constant 0 : index
    %64 = vector.load %arg15[%c0_43, %c0_44] : memref<128x256xf32, #tpu.memory_space<vmem>>, vector<128x256xf32>
    %cst_45 = arith.constant dense<0.000000e+00> : vector<128x256xf32>
    %65 = tpu.matmul %63, %64, %cst_45 {dimension_numbers = #tpu.dot_dimension_numbers<[1], [0], [0], [1], [0, 0, 1, 1], [], []>} : vector<128x128xf32>, vector<128x256xf32>, vector<128x256xf32> -> vector<128x256xf32>
    %c0_46 = arith.constant 0 : index
    %c0_47 = arith.constant 0 : index
    %66 = vector.load %arg16[%c0_46, %c0_47] : memref<1x256xf32, #tpu.memory_space<vmem>>, vector<1x256xf32>
    %67 = vector.broadcast %66 : vector<1x256xf32> to vector<128x256xf32>
    %68 = arith.addf %65, %67 : vector<128x256xf32>
    %c0_48 = arith.constant 0 : index
    %c0_49 = arith.constant 0 : index
    %69 = vector.load %arg17[%c0_48, %c0_49] : memref<128x256xf32, #tpu.memory_space<vmem>>, vector<128x256xf32>
    tpu.vector_store %arg17[%c0_48, %c0_49], %35 {strides = array<i32>} : memref<128x256xf32, #tpu.memory_space<vmem>>, vector<128x256xf32>,
    %c0_50 = arith.constant 0 : index
    %c0_51 = arith.constant 0 : index
    %70 = vector.load %arg18[%c0_50, %c0_51] : memref<128x256xf32, #tpu.memory_space<vmem>>, vector<128x256xf32>
    tpu.vector_store %arg18[%c0_50, %c0_51], %68 {strides = array<i32>} : memref<128x256xf32, #tpu.memory_space<vmem>>, vector<128x256xf32>,
    return
  }
  func.func @transform_0(%arg0: i32) -> (i32, i32) {
    %c0_i32 = arith.constant 0 : i32
    %c0_i32_0 = arith.constant 0 : i32
    return %arg0, %c0_i32 : i32, i32
  }
  func.func @transform_1(%arg0: i32) -> (i32, i32) {
    %c0_i32 = arith.constant 0 : i32
    %c0_i32_0 = arith.constant 0 : i32
    return %arg0, %c0_i32 : i32, i32
  }
  func.func @transform_2(%arg0: i32) -> (i32, i32) {
    %c0_i32 = arith.constant 0 : i32
    %c0_i32_0 = arith.constant 0 : i32
    %c0_i32_1 = arith.constant 0 : i32
    return %c0_i32, %c0_i32_0 : i32, i32
  }
  func.func @transform_3(%arg0: i32) -> (i32, i32) {
    %c0_i32 = arith.constant 0 : i32
    %c0_i32_0 = arith.constant 0 : i32
    %c0_i32_1 = arith.constant 0 : i32
    return %c0_i32, %c0_i32_0 : i32, i32
  }
  func.func @transform_4(%arg0: i32) -> (i32, i32) {
    %c0_i32 = arith.constant 0 : i32
    %c0_i32_0 = arith.constant 0 : i32
    %c0_i32_1 = arith.constant 0 : i32
    return %c0_i32, %c0_i32_0 : i32, i32
  }
  func.func @transform_5(%arg0: i32) -> (i32, i32) {
    %c0_i32 = arith.constant 0 : i32
    %c0_i32_0 = arith.constant 0 : i32
    %c0_i32_1 = arith.constant 0 : i32
    return %c0_i32, %c0_i32_0 : i32, i32
  }
  func.func @transform_6(%arg0: i32) -> (i32, i32) {
    %c0_i32 = arith.constant 0 : i32
    %c0_i32_0 = arith.constant 0 : i32
    %c0_i32_1 = arith.constant 0 : i32
    return %c0_i32, %c0_i32_0 : i32, i32
  }
  func.func @transform_7(%arg0: i32) -> (i32, i32) {
    %c0_i32 = arith.constant 0 : i32
    %c0_i32_0 = arith.constant 0 : i32
    %c0_i32_1 = arith.constant 0 : i32
    return %c0_i32, %c0_i32_0 : i32, i32
  }
  func.func @transform_8(%arg0: i32) -> (i32, i32) {
    %c0_i32 = arith.constant 0 : i32
    %c0_i32_0 = arith.constant 0 : i32
    %c0_i32_1 = arith.constant 0 : i32
    return %c0_i32, %c0_i32_0 : i32, i32
  }
  func.func @transform_9(%arg0: i32) -> (i32, i32) {
    %c0_i32 = arith.constant 0 : i32
    %c0_i32_0 = arith.constant 0 : i32
    %c0_i32_1 = arith.constant 0 : i32
    return %c0_i32, %c0_i32_0 : i32, i32
  }
  func.func @transform_10(%arg0: i32) -> (i32, i32) {
    %c0_i32 = arith.constant 0 : i32
    %c0_i32_0 = arith.constant 0 : i32
    %c0_i32_1 = arith.constant 0 : i32
    return %c0_i32, %c0_i32_0 : i32, i32
  }
  func.func @transform_11(%arg0: i32) -> (i32, i32) {
    %c0_i32 = arith.constant 0 : i32
    %c0_i32_0 = arith.constant 0 : i32
    %c0_i32_1 = arith.constant 0 : i32
    return %c0_i32, %c0_i32_0 : i32, i32
  }
  func.func @transform_12(%arg0: i32) -> (i32, i32) {
    %c0_i32 = arith.constant 0 : i32
    %c0_i32_0 = arith.constant 0 : i32
    %c0_i32_1 = arith.constant 0 : i32
    return %c0_i32, %c0_i32_0 : i32, i32
  }
  func.func @transform_13(%arg0: i32) -> (i32, i32) {
    %c0_i32 = arith.constant 0 : i32
    %c0_i32_0 = arith.constant 0 : i32
    %c0_i32_1 = arith.constant 0 : i32
    return %c0_i32, %c0_i32_0 : i32, i32
  }
  func.func @transform_14(%arg0: i32) -> (i32, i32) {
    %c0_i32 = arith.constant 0 : i32
    %c0_i32_0 = arith.constant 0 : i32
    %c0_i32_1 = arith.constant 0 : i32
    return %c0_i32, %c0_i32_0 : i32, i32
  }
  func.func @transform_15(%arg0: i32) -> (i32, i32) {
    %c0_i32 = arith.constant 0 : i32
    %c0_i32_0 = arith.constant 0 : i32
    %c0_i32_1 = arith.constant 0 : i32
    return %c0_i32, %c0_i32_0 : i32, i32
  }
  func.func @transform_16(%arg0: i32) -> (i32, i32) {
    %c0_i32 = arith.constant 0 : i32
    %c0_i32_0 = arith.constant 0 : i32
    return %arg0, %c0_i32 : i32, i32
  }
  func.func @transform_17(%arg0: i32) -> (i32, i32) {
    %c0_i32 = arith.constant 0 : i32
    %c0_i32_0 = arith.constant 0 : i32
    return %arg0, %c0_i32 : i32, i32
  }
}

module attributes {stable_mosaic.version = 11 : i64} {
  func.func @vae_kernel(%arg0: i32, %arg1: memref<128x256xf32, #tpu.memory_space<vmem>>, %arg2: memref<128x128xf32, #tpu.memory_space<vmem>>, %arg3: memref<256x128xf32, #tpu.memory_space<vmem>>, %arg4: memref<1x128xf32, #tpu.memory_space<vmem>>, %arg5: memref<128x128xf32, #tpu.memory_space<vmem>>, %arg6: memref<1x128xf32, #tpu.memory_space<vmem>>, %arg7: memref<128x128xf32, #tpu.memory_space<vmem>>, %arg8: memref<1x128xf32, #tpu.memory_space<vmem>>, %arg9: memref<128x256xf32, #tpu.memory_space<vmem>>, %arg10: memref<1x256xf32, #tpu.memory_space<vmem>>, %arg11: memref<128x128xf32, #tpu.memory_space<vmem>>, %arg12: memref<1x128xf32, #tpu.memory_space<vmem>>, %arg13: memref<128x128xf32, #tpu.memory_space<vmem>>, %arg14: memref<1x128xf32, #tpu.memory_space<vmem>>, %arg15: memref<128x256xf32, #tpu.memory_space<vmem>>, %arg16: memref<1x256xf32, #tpu.memory_space<vmem>>, %arg17: memref<128x256xf32, #tpu.memory_space<vmem>>, %arg18: memref<128x256xf32, #tpu.memory_space<vmem>>) attributes {dimension_semantics = [#tpu.dimension_semantics<parallel>], iteration_bounds = array<i64: 2>, scalar_prefetch = 0 : i64, scratch_operands = 0 : i64, tpu.core_type = #tpu.core_type<tc>, window_params = [{transform_indices = @transform_0, window_bounds = array<i64: 128, 256>}, {transform_indices = @transform_1, window_bounds = array<i64: 128, 128>}, {pipeline_mode = #tpu.pipeline_mode<synchronous>, transform_indices = @transform_2, window_bounds = array<i64: 256, 128>}, {pipeline_mode = #tpu.pipeline_mode<synchronous>, transform_indices = @transform_3, window_bounds = array<i64: 1, 128>}, {pipeline_mode = #tpu.pipeline_mode<synchronous>, transform_indices = @transform_4, window_bounds = array<i64: 128, 128>}, {pipeline_mode = #tpu.pipeline_mode<synchronous>, transform_indices = @transform_5, window_bounds = array<i64: 1, 128>}, {pipeline_mode = #tpu.pipeline_mode<synchronous>, transform_indices = @transform_6, window_bounds = array<i64: 128, 128>}, {pipeline_mode = #tpu.pipeline_mode<synchronous>, transform_indices = @transform_7, window_bounds = array<i64: 1, 128>}, {pipeline_mode = #tpu.pipeline_mode<synchronous>, transform_indices = @transform_8, window_bounds = array<i64: 128, 256>}, {pipeline_mode = #tpu.pipeline_mode<synchronous>, transform_indices = @transform_9, window_bounds = array<i64: 1, 256>}, {pipeline_mode = #tpu.pipeline_mode<synchronous>, transform_indices = @transform_10, window_bounds = array<i64: 128, 128>}, {pipeline_mode = #tpu.pipeline_mode<synchronous>, transform_indices = @transform_11, window_bounds = array<i64: 1, 128>}, {pipeline_mode = #tpu.pipeline_mode<synchronous>, transform_indices = @transform_12, window_bounds = array<i64: 128, 128>}, {pipeline_mode = #tpu.pipeline_mode<synchronous>, transform_indices = @transform_13, window_bounds = array<i64: 1, 128>}, {pipeline_mode = #tpu.pipeline_mode<synchronous>, transform_indices = @transform_14, window_bounds = array<i64: 128, 256>}, {pipeline_mode = #tpu.pipeline_mode<synchronous>, transform_indices = @transform_15, window_bounds = array<i64: 1, 256>}, {transform_indices = @transform_16, window_bounds = array<i64: 128, 256>}, {transform_indices = @transform_17, window_bounds = array<i64: 128, 256>}]} {
    %c0 = arith.constant 0 : index
    %c0_0 = arith.constant 0 : index
    %0 = vector.load %arg1[%c0, %c0_0] : memref<128x256xf32, #tpu.memory_space<vmem>>, vector<128x256xf32>
    %c0_1 = arith.constant 0 : index
    %c0_2 = arith.constant 0 : index
    %1 = vector.load %arg3[%c0_1, %c0_2] : memref<256x128xf32, #tpu.memory_space<vmem>>, vector<256x128xf32>
    %cst = arith.constant dense<0.000000e+00> : vector<128x128xf32>
    %2 = tpu.matmul %0, %1, %cst {dimension_numbers = #tpu.dot_dimension_numbers<[1], [0], [0], [1], [0, 0, 1, 1], [], []>} : vector<128x256xf32>, vector<256x128xf32>, vector<128x128xf32> -> vector<128x128xf32>
    %c0_3 = arith.constant 0 : index
    %c0_4 = arith.constant 0 : index
    %3 = vector.load %arg4[%c0_3, %c0_4] : memref<1x128xf32, #tpu.memory_space<vmem>>, vector<1x128xf32>
    %4 = vector.broadcast %3 : vector<1x128xf32> to vector<128x128xf32>
    %5 = arith.addf %2, %4 : vector<128x128xf32>
    %cst_5 = arith.constant 0.000000e+00 : f32
    %6 = vector.broadcast %cst_5 : f32 to vector<128x128xf32>
    %7 = arith.cmpf oge, %5, %6 : vector<128x128xf32>
    %cst_6 = arith.constant 0.00999999977 : f32
    %8 = vector.broadcast %cst_6 : f32 to vector<128x128xf32>
    %9 = arith.mulf %8, %5 : vector<128x128xf32>
    %10 = arith.select %7, %5, %9 : vector<128x128xi1>, vector<128x128xf32>
    %c0_7 = arith.constant 0 : index
    %c0_8 = arith.constant 0 : index
    %11 = vector.load %arg5[%c0_7, %c0_8] : memref<128x128xf32, #tpu.memory_space<vmem>>, vector<128x128xf32>
    %cst_9 = arith.constant dense<0.000000e+00> : vector<128x128xf32>
    %12 = tpu.matmul %10, %11, %cst_9 {dimension_numbers = #tpu.dot_dimension_numbers<[1], [0], [0], [1], [0, 0, 1, 1], [], []>} : vector<128x128xf32>, vector<128x128xf32>, vector<128x128xf32> -> vector<128x128xf32>
    %c0_10 = arith.constant 0 : index
    %c0_11 = arith.constant 0 : index
    %13 = vector.load %arg6[%c0_10, %c0_11] : memref<1x128xf32, #tpu.memory_space<vmem>>, vector<1x128xf32>
    %14 = vector.broadcast %13 : vector<1x128xf32> to vector<128x128xf32>
    %15 = arith.addf %12, %14 : vector<128x128xf32>
    %cst_12 = arith.constant 0.000000e+00 : f32
    %16 = vector.broadcast %cst_12 : f32 to vector<128x128xf32>
    %17 = arith.cmpf oge, %15, %16 : vector<128x128xf32>
    %cst_13 = arith.constant 0.00999999977 : f32
    %18 = vector.broadcast %cst_13 : f32 to vector<128x128xf32>
    %19 = arith.mulf %18, %15 : vector<128x128xf32>
    %20 = arith.select %17, %15, %19 : vector<128x128xi1>, vector<128x128xf32>
    %c0_14 = arith.constant 0 : index
    %c0_15 = arith.constant 0 : index
    %21 = vector.load %arg7[%c0_14, %c0_15] : memref<128x128xf32, #tpu.memory_space<vmem>>, vector<128x128xf32>
    %cst_16 = arith.constant dense<0.000000e+00> : vector<128x128xf32>
    %22 = tpu.matmul %20, %21, %cst_16 {dimension_numbers = #tpu.dot_dimension_numbers<[1], [0], [0], [1], [0, 0, 1, 1], [], []>} : vector<128x128xf32>, vector<128x128xf32>, vector<128x128xf32> -> vector<128x128xf32>
    %c0_17 = arith.constant 0 : index
    %c0_18 = arith.constant 0 : index
    %23 = vector.load %arg8[%c0_17, %c0_18] : memref<1x128xf32, #tpu.memory_space<vmem>>, vector<1x128xf32>
    %24 = vector.broadcast %23 : vector<1x128xf32> to vector<128x128xf32>
    %25 = arith.addf %22, %24 : vector<128x128xf32>
    %cst_19 = arith.constant 0.000000e+00 : f32
    %26 = vector.broadcast %cst_19 : f32 to vector<128x128xf32>
    %27 = arith.cmpf oge, %25, %26 : vector<128x128xf32>
    %cst_20 = arith.constant 0.00999999977 : f32
    %28 = vector.broadcast %cst_20 : f32 to vector<128x128xf32>
    %29 = arith.mulf %28, %25 : vector<128x128xf32>
    %30 = arith.select %27, %25, %29 : vector<128x128xi1>, vector<128x128xf32>
    %c0_21 = arith.constant 0 : index
    %c0_22 = arith.constant 0 : index
    %31 = vector.load %arg9[%c0_21, %c0_22] : memref<128x256xf32, #tpu.memory_space<vmem>>, vector<128x256xf32>
    %cst_23 = arith.constant dense<0.000000e+00> : vector<128x256xf32>
    %32 = tpu.matmul %30, %31, %cst_23 {dimension_numbers = #tpu.dot_dimension_numbers<[1], [0], [0], [1], [0, 0, 1, 1], [], []>} : vector<128x128xf32>, vector<128x256xf32>, vector<128x256xf32> -> vector<128x256xf32>
    %c0_24 = arith.constant 0 : index
    %c0_25 = arith.constant 0 : index
    %33 = vector.load %arg10[%c0_24, %c0_25] : memref<1x256xf32, #tpu.memory_space<vmem>>, vector<1x256xf32>
    %34 = vector.broadcast %33 : vector<1x256xf32> to vector<128x256xf32>
    %35 = arith.addf %32, %34 : vector<128x256xf32>
    %36 = vector.extract_strided_slice %35 {offsets = [0, 0], sizes = [128, 128], strides = [1, 1]} : vector<128x256xf32> to vector<128x128xf32>
    %37 = vector.extract_strided_slice %35 {offsets = [0, 128], sizes = [128, 128], strides = [1, 1]} : vector<128x256xf32> to vector<128x128xf32>
    %c0_26 = arith.constant 0 : index
    %c0_27 = arith.constant 0 : index
    %38 = vector.load %arg2[%c0_26, %c0_27] : memref<128x128xf32, #tpu.memory_space<vmem>>, vector<128x128xf32>
    %cst_28 = arith.constant 5.000000e-01 : f32
    %39 = vector.broadcast %cst_28 : f32 to vector<128x128xf32>
    %40 = arith.mulf %39, %37 : vector<128x128xf32>
    %41 = math.exp %40 : vector<128x128xf32>
    %42 = arith.mulf %38, %41 : vector<128x128xf32>
    %43 = arith.addf %36, %42 : vector<128x128xf32>
    %c0_29 = arith.constant 0 : index
    %c0_30 = arith.constant 0 : index
    %44 = vector.load %arg11[%c0_29, %c0_30] : memref<128x128xf32, #tpu.memory_space<vmem>>, vector<128x128xf32>
    %cst_31 = arith.constant dense<0.000000e+00> : vector<128x128xf32>
    %45 = tpu.matmul %43, %44, %cst_31 {dimension_numbers = #tpu.dot_dimension_numbers<[1], [0], [0], [1], [0, 0, 1, 1], [], []>} : vector<128x128xf32>, vector<128x128xf32>, vector<128x128xf32> -> vector<128x128xf32>
    %c0_32 = arith.constant 0 : index
    %c0_33 = arith.constant 0 : index
    %46 = vector.load %arg12[%c0_32, %c0_33] : memref<1x128xf32, #tpu.memory_space<vmem>>, vector<1x128xf32>
    %47 = vector.broadcast %46 : vector<1x128xf32> to vector<128x128xf32>
    %48 = arith.addf %45, %47 : vector<128x128xf32>
    %cst_34 = arith.constant 0.000000e+00 : f32
    %49 = vector.broadcast %cst_34 : f32 to vector<128x128xf32>
    %50 = arith.cmpf oge, %48, %49 : vector<128x128xf32>
    %cst_35 = arith.constant 0.00999999977 : f32
    %51 = vector.broadcast %cst_35 : f32 to vector<128x128xf32>
    %52 = arith.mulf %51, %48 : vector<128x128xf32>
    %53 = arith.select %50, %48, %52 : vector<128x128xi1>, vector<128x128xf32>
    %c0_36 = arith.constant 0 : index
    %c0_37 = arith.constant 0 : index
    %54 = vector.load %arg13[%c0_36, %c0_37] : memref<128x128xf32, #tpu.memory_space<vmem>>, vector<128x128xf32>
    %cst_38 = arith.constant dense<0.000000e+00> : vector<128x128xf32>
    %55 = tpu.matmul %53, %54, %cst_38 {dimension_numbers = #tpu.dot_dimension_numbers<[1], [0], [0], [1], [0, 0, 1, 1], [], []>} : vector<128x128xf32>, vector<128x128xf32>, vector<128x128xf32> -> vector<128x128xf32>
    %c0_39 = arith.constant 0 : index
    %c0_40 = arith.constant 0 : index
    %56 = vector.load %arg14[%c0_39, %c0_40] : memref<1x128xf32, #tpu.memory_space<vmem>>, vector<1x128xf32>
    %57 = vector.broadcast %56 : vector<1x128xf32> to vector<128x128xf32>
    %58 = arith.addf %55, %57 : vector<128x128xf32>
    %cst_41 = arith.constant 0.000000e+00 : f32
    %59 = vector.broadcast %cst_41 : f32 to vector<128x128xf32>
    %60 = arith.cmpf oge, %58, %59 : vector<128x128xf32>
    %cst_42 = arith.constant 0.00999999977 : f32
    %61 = vector.broadcast %cst_42 : f32 to vector<128x128xf32>
    %62 = arith.mulf %61, %58 : vector<128x128xf32>
    %63 = arith.select %60, %58, %62 : vector<128x128xi1>, vector<128x128xf32>
    %c0_43 = arith.constant 0 : index
    %c0_44 = arith.constant 0 : index
    %64 = vector.load %arg15[%c0_43, %c0_44] : memref<128x256xf32, #tpu.memory_space<vmem>>, vector<128x256xf32>
    %cst_45 = arith.constant dense<0.000000e+00> : vector<128x256xf32>
    %65 = tpu.matmul %63, %64, %cst_45 {dimension_numbers = #tpu.dot_dimension_numbers<[1], [0], [0], [1], [0, 0, 1, 1], [], []>} : vector<128x128xf32>, vector<128x256xf32>, vector<128x256xf32> -> vector<128x256xf32>
    %c0_46 = arith.constant 0 : index
    %c0_47 = arith.constant 0 : index
    %66 = vector.load %arg16[%c0_46, %c0_47] : memref<1x256xf32, #tpu.memory_space<vmem>>, vector<1x256xf32>
    %67 = vector.broadcast %66 : vector<1x256xf32> to vector<128x256xf32>
    %68 = arith.addf %65, %67 : vector<128x256xf32>
    %c0_48 = arith.constant 0 : index
    %c0_49 = arith.constant 0 : index
    %69 = vector.load %arg17[%c0_48, %c0_49] : memref<128x256xf32, #tpu.memory_space<vmem>>, vector<128x256xf32>
    tpu.vector_store %arg17[%c0_48, %c0_49], %35 {strides = array<i32>} : memref<128x256xf32, #tpu.memory_space<vmem>>, vector<128x256xf32>,
    %c0_50 = arith.constant 0 : index
    %c0_51 = arith.constant 0 : index
    %70 = vector.load %arg18[%c0_50, %c0_51] : memref<128x256xf32, #tpu.memory_space<vmem>>, vector<128x256xf32>
    tpu.vector_store %arg18[%c0_50, %c0_51], %68 {strides = array<i32>} : memref<128x256xf32, #tpu.memory_space<vmem>>, vector<128x256xf32>,
    return
  }
  func.func @transform_0(%arg0: i32) -> (i32, i32) {
    %c0_i32 = arith.constant 0 : i32
    %c0_i32_0 = arith.constant 0 : i32
    return %arg0, %c0_i32 : i32, i32
  }
  func.func @transform_1(%arg0: i32) -> (i32, i32) {
    %c0_i32 = arith.constant 0 : i32
    %c0_i32_0 = arith.constant 0 : i32
    return %arg0, %c0_i32 : i32, i32
  }
  func.func @transform_2(%arg0: i32) -> (i32, i32) {
    %c0_i32 = arith.constant 0 : i32
    %c0_i32_0 = arith.constant 0 : i32
    %c0_i32_1 = arith.constant 0 : i32
    return %c0_i32, %c0_i32_0 : i32, i32
  }
  func.func @transform_3(%arg0: i32) -> (i32, i32) {
    %c0_i32 = arith.constant 0 : i32
    %c0_i32_0 = arith.constant 0 : i32
    %c0_i32_1 = arith.constant 0 : i32
    return %c0_i32, %c0_i32_0 : i32, i32
  }
  func.func @transform_4(%arg0: i32) -> (i32, i32) {
    %c0_i32 = arith.constant 0 : i32
    %c0_i32_0 = arith.constant 0 : i32
    %c0_i32_1 = arith.constant 0 : i32
    return %c0_i32, %c0_i32_0 : i32, i32
  }
  func.func @transform_5(%arg0: i32) -> (i32, i32) {
    %c0_i32 = arith.constant 0 : i32
    %c0_i32_0 = arith.constant 0 : i32
    %c0_i32_1 = arith.constant 0 : i32
    return %c0_i32, %c0_i32_0 : i32, i32
  }
  func.func @transform_6(%arg0: i32) -> (i32, i32) {
    %c0_i32 = arith.constant 0 : i32
    %c0_i32_0 = arith.constant 0 : i32
    %c0_i32_1 = arith.constant 0 : i32
    return %c0_i32, %c0_i32_0 : i32, i32
  }
  func.func @transform_7(%arg0: i32) -> (i32, i32) {
    %c0_i32 = arith.constant 0 : i32
    %c0_i32_0 = arith.constant 0 : i32
    %c0_i32_1 = arith.constant 0 : i32
    return %c0_i32, %c0_i32_0 : i32, i32
  }
  func.func @transform_8(%arg0: i32) -> (i32, i32) {
    %c0_i32 = arith.constant 0 : i32
    %c0_i32_0 = arith.constant 0 : i32
    %c0_i32_1 = arith.constant 0 : i32
    return %c0_i32, %c0_i32_0 : i32, i32
  }
  func.func @transform_9(%arg0: i32) -> (i32, i32) {
    %c0_i32 = arith.constant 0 : i32
    %c0_i32_0 = arith.constant 0 : i32
    %c0_i32_1 = arith.constant 0 : i32
    return %c0_i32, %c0_i32_0 : i32, i32
  }
  func.func @transform_10(%arg0: i32) -> (i32, i32) {
    %c0_i32 = arith.constant 0 : i32
    %c0_i32_0 = arith.constant 0 : i32
    %c0_i32_1 = arith.constant 0 : i32
    return %c0_i32, %c0_i32_0 : i32, i32
  }
  func.func @transform_11(%arg0: i32) -> (i32, i32) {
    %c0_i32 = arith.constant 0 : i32
    %c0_i32_0 = arith.constant 0 : i32
    %c0_i32_1 = arith.constant 0 : i32
    return %c0_i32, %c0_i32_0 : i32, i32
  }
  func.func @transform_12(%arg0: i32) -> (i32, i32) {
    %c0_i32 = arith.constant 0 : i32
    %c0_i32_0 = arith.constant 0 : i32
    %c0_i32_1 = arith.constant 0 : i32
    return %c0_i32, %c0_i32_0 : i32, i32
  }
  func.func @transform_13(%arg0: i32) -> (i32, i32) {
    %c0_i32 = arith.constant 0 : i32
    %c0_i32_0 = arith.constant 0 : i32
    %c0_i32_1 = arith.constant 0 : i32
    return %c0_i32, %c0_i32_0 : i32, i32
  }
  func.func @transform_14(%arg0: i32) -> (i32, i32) {
    %c0_i32 = arith.constant 0 : i32
    %c0_i32_0 = arith.constant 0 : i32
    %c0_i32_1 = arith.constant 0 : i32
    return %c0_i32, %c0_i32_0 : i32, i32
  }
  func.func @transform_15(%arg0: i32) -> (i32, i32) {
    %c0_i32 = arith.constant 0 : i32
    %c0_i32_0 = arith.constant 0 : i32
    %c0_i32_1 = arith.constant 0 : i32
    return %c0_i32, %c0_i32_0 : i32, i32
  }
  func.func @transform_16(%arg0: i32) -> (i32, i32) {
    %c0_i32 = arith.constant 0 : i32
    %c0_i32_0 = arith.constant 0 : i32
    return %arg0, %c0_i32 : i32, i32
  }
  func.func @transform_17(%arg0: i32) -> (i32, i32) {
    %c0_i32 = arith.constant 0 : i32
    %c0_i32_0 = arith.constant 0 : i32
    return %arg0, %c0_i32 : i32, i32
  }
}

</mosaic_0001>

<bundles_post_ra>
// kernel: tpu_custom_call.1
= control target key start
LH: loop header
LB: loop body
LE: loop exit
PB: predicated region body
PF: predicated region fallthrough
CT: control target
= control target key end

     0   :  { %s4899_s0 = inlined_call_operand.hbm [shape: f32[256,256], index: 0, kind: input, shape index: {}]   ;;  %s4900_s1 = inlined_call_operand.hbm [shape: f32[256,128], index: 1, kind: input, shape index: {}]   ;;  %s4901_s2 = inlined_call_operand.hbm [shape: f32[256,128], index: 2, kind: input, shape index: {}]   ;;  %s4902_s3 = inlined_call_operand.vmem [shape: f32[1,128], index: 3, kind: input, shape index: {}]   ;;  %s4903_s4 = inlined_call_operand.hbm [shape: f32[128,128], index: 4, kind: input, shape index: {}]   ;;  %s4904_s5 = inlined_call_operand.vmem [shape: f32[1,128], index: 5, kind: input, shape index: {}]   ;;  %s4905_s6 = inlined_call_operand.hbm [shape: f32[128,128], index: 6, kind: input, shape index: {}]   ;;  %s4906_s7 = inlined_call_operand.vmem [shape: f32[1,128], index: 7, kind: input, shape index: {}]   ;;  %s4907_s8 = inlined_call_operand.hbm [shape: f32[128,256], index: 8, kind: input, shape index: {}]   ;;  %s4908_s9 = inlined_call_operand.vmem [shape: f32[1,256], index: 9, kind: input, shape index: {}]   ;;  %s4909_s10 = inlined_call_operand.hbm [shape: f32[128,128], index: 10, kind: input, shape index: {}]   ;;  %s4910_s11 = inlined_call_operand.vmem [shape: f32[1,128], index: 11, kind: input, shape index: {}]   ;;  %s4911_s12 = inlined_call_operand.hbm [shape: f32[128,128], index: 12, kind: input, shape index: {}]   ;;  %s4912_s13 = inlined_call_operand.vmem [shape: f32[1,128], index: 13, kind: input, shape index: {}]   ;;  %s4913_s14 = inlined_call_operand.hbm [shape: f32[128,256], index: 14, kind: input, shape index: {}]   ;;  %s4914_s15 = inlined_call_operand.vmem [shape: f32[1,256], index: 15, kind: input, shape index: {}]   ;;  %s4915_s16 = inlined_call_operand.hbm [shape: f32[256,256], index: 16, kind: output, shape index: {0}]   ;;  %s4916_s17 = inlined_call_operand.hbm [shape: f32[256,256], index: 17, kind: output, shape index: {1}]  }
   0x1   :  { %4933 = sst [smem:[#allocation30_spill]] %s4899_s0 }
   0x2   :  { %4934 = sst [smem:[#allocation31_spill]] %s4900_s1 }
   0x3   :  { %4935 = sst [smem:[#allocation32_spill]] %s4901_s2 }
   0x4   :  { %4936 = sst [smem:[#allocation33_spill]] %s4903_s4 }
   0x5   :  { %4937 = sst [smem:[#allocation34_spill]] %s4905_s6 }
   0x6   :  { %4938 = sst [smem:[#allocation35_spill]] %s4906_s7 }
   0x7   :  { %4939 = sst [smem:[#allocation36_spill]] %s4907_s8 }
   0x8   :  { %4940 = sst [smem:[#allocation37_spill]] %s4908_s9 }
   0x9   :  { %4941 = sst [smem:[#allocation38_spill]] %s4909_s10 }
   0xa   :  { %4942 = sst [smem:[#allocation39_spill]] %s4910_s11 }
   0xb   :  { %4943 = sst [smem:[#allocation40_spill]] %s4911_s12 }
   0xc   :  { %4944 = sst [smem:[#allocation41_spill]] %s4912_s13 }
   0xd   :  { %4945 = sst [smem:[#allocation42_spill]] %s4913_s14 }
   0xe   :  { %4946 = sst [smem:[#allocation43_spill]] %s4914_s15 }
   0xf   :  { %4947 = sst [smem:[#allocation44_spill]] %s4915_s16 }
  0x10   :  { %4948 = sst [smem:[#allocation45_spill]] %s4916_s17 }
  0x11   :  { %23 = vsyncpa [#allocation3], 0 }
  0x12   :  { %25 = vsyncpa [#allocation3 + $0x1], 0 }
  0x13   :  { %26 = vsyncpa [#allocation6], 0 }
  0x14   :  { %28 = vsyncpa [#allocation6 + $0x1], 0 }
  0x15   :  { %29 = vsyncpa [#allocation9], 0 }
  0x16   :  { %30 = vsyncpa [#allocation12], 0 }
  0x17   :  { %31 = vsyncpa [#allocation15], 0 }
  0x18   :  { %32 = vsyncpa [#allocation4], 0 }
  0x19   :  { %34 = vsyncpa [#allocation4 + $0x1], 0 }
  0x1a   :  { %35 = vsyncpa [#allocation19], 0 }
  0x1b   :  { %37 = vsyncpa [#allocation19 + $0x1], 0  ;;  %s4026_s24 = smov 0   ;;  %s4028_s25 = smov 0  }
  0x1c   :  { %s4030_s26 = smov 0   ;;  %s4032_s27 = smov 0  }
  0x1d LB: > { %4949 = sst [smem:[#allocation28_spill]] %s3912_s26  ;;  %s3918_s28 = smov [#allocation7]   ;;  %s3916_s27 = sphi %s4032_s27, %s4997_s27   ;;  %s3912_s26 = sphi %s4030_s26, %s4996_s26   ;;  %s3908_s25 = sphi %s4028_s25, %s4995_s25   ;;  %s3904_s24 = sphi %s4026_s24, %s4994_s24  }
  0x1e   : > { %s458_s29 = sshll.u32 %s3918_s28, 4  ;;  %s4047_s0 = sadd.s32 4294967295, %s3916_s27   ;;  %s4052_s29 = int_to_ptr.vmem [resolvable:$true] %s458_s29 }
  0x1f   : > { %p2654_p0 = scmp.ge.s32.totalorder %s3916_s27, 1  ;;  %p4925_p1 = scmp.eq.s32.totalorder %s4047_s0, 0 }
  0x20   : > { %p446_p2 = scmp.lt.s32.totalorder %s3916_s27, 3  ;;  %s3919_s18 = smov [#allocation8]  }
  0x21   : > { %s474_s19 = sshll.u32 %s3919_s18, 4  ;;  %s3920_s20 = smov [#allocation11]   ;;  %s4067_s19 = int_to_ptr.vmem [resolvable:$true] %s474_s19 }
  0x22   : > { %p4054_p3 = pnand %p2654_p0, %p446_p2  ;;  %s506_s21 = sshll.u32 %s3920_s20, 4  ;;  %s4069_s21 = int_to_ptr.vmem [resolvable:$true] %s506_s21 }
  0x23   : > { %s4952_s2 = sld [smem:[#allocation32_spill]] }
  0x24   : > { %s4950_s30 = scalar_select %p4054_p3, 1, 0 }
  0x25   : > { %p3412_p5 = pneg %p4054_p3 }
  0x27   : > { %p4063_p6 = pnand %p3412_p5, %p4925_p1 }
  0x29   : > { %s3542_s28 = scalar_lea.hbm %s4952_s2, 4096  ;;  %p4079_p8 = pneg %p4063_p6 }
  0x2a   : > { %p3543_p7 = scmp.ne.s32.totalorder %s4952_s2, %s3542_s28  ;;  %p3549_p11 = scmp.lt.u32.totalorder %s3542_s28, %s4952_s2 }
  0x2c   : > { %p3545_p9 = pnand %p4079_p8, %p3543_p7 }
  0x2e   : > { %p3546_p10 = pneg %p3545_p9 }
  0x30   : > { %p3551_p12 = pnand %p3549_p11, %p3546_p10 }
  0x32   : > { %3554 = shalt.err (!%p3551_p12)
}
  0x33   : > { %s3555_s15 = scalar_lea.vmem %s4052_s29, 4096  ;;  %p3563_p5 = scmp.lt.s32.totalorder %s4052_s29, %s4052_s29 }
  0x34   : > { %p3556_p13 = scmp.ne.s32.totalorder %s4052_s29, %s3555_s15  ;;  %p3564_p4 = scmp.lt.s32.totalorder %s3555_s15, %s3555_s15 }
  0x36   : > { %p3558_p0 = pnand %p3556_p13, %p4079_p8  ;;  %p3565_p7 = por %p3564_p4, %p3563_p5 }
  0x38   : > { %p3559_p2 = pneg %p3558_p0 }
  0x3a   : > { %p3566_p9 = pnand %p3565_p7, %p3559_p2 }
  0x3c   : > { %3569 = shalt.err (!%p3566_p9)
}
  0x3d   : > { %s4921_s17 = smov 128   ;;  %s4923_s16 = smov 8  }
  0x3e   : > { %3415 = dma.hbm_to_vmem [thread:$0]  (!%p4063_p6), %s4952_s2, 4096, %s4052_s29, [#allocation6], %s4921_s17, %s4921_s17, %s4923_s16  }
  0x3f   : > { %s4954_s4 = sld [smem:[#allocation33_spill]] }
  0x45   : > { %s3570_s15 = scalar_lea.hbm %s4954_s4, 2048 }
  0x46   : > { %p3571_p4 = scmp.ne.s32.totalorder %s4954_s4, %s3570_s15  ;;  %p3577_p12 = scmp.lt.u32.totalorder %s3570_s15, %s4954_s4 }
  0x48   : > { %p3573_p10 = pnand %p3571_p4, %p4079_p8 }
  0x4a   : > { %p3574_p11 = pneg %p3573_p10 }
  0x4c   : > { %p3579_p13 = pnand %p3577_p12, %p3574_p11 }
  0x4e   : > { %3582 = shalt.err (!%p3579_p13)
}
  0x4f   : > { %s3583_s29 = scalar_lea.vmem %s4067_s19, 2048  ;;  %p3591_p7 = scmp.lt.s32.totalorder %s4067_s19, %s4067_s19 }
  0x50   : > { %p3584_p0 = scmp.ne.s32.totalorder %s4067_s19, %s3583_s29  ;;  %p3592_p9 = scmp.lt.s32.totalorder %s3583_s29, %s3583_s29 }
  0x52   : > { %p3586_p2 = pnand %p3584_p0, %p4079_p8  ;;  %p3593_p4 = por %p3592_p9, %p3591_p7 }
  0x54   : > { %p3587_p5 = pneg %p3586_p2 }
  0x56   : > { %p3594_p10 = pnand %p3593_p4, %p3587_p5 }
  0x58   : > { %3597 = shalt.err (!%p3594_p10)
}
  0x59   : > { %3418 = dma.hbm_to_vmem [thread:$0]  (!%p4063_p6), %s4954_s4, 2048, %s4067_s19, [#allocation9], %s4921_s17, %s4921_s17, %s4923_s16  }
  0x5a   : > { %s4955_s8 = sld [smem:[#allocation36_spill]] }
  0x60   : > { %s3598_s22 = scalar_lea.hbm %s4955_s8, 4096 }
  0x61   : > { %p3599_p11 = scmp.ne.s32.totalorder %s4955_s8, %s3598_s22  ;;  %p3605_p0 = scmp.lt.u32.totalorder %s3598_s22, %s4955_s8 }
  0x63   : > { %p3601_p12 = pnand %p3599_p11, %p4079_p8 }
  0x65   : > { %p3602_p13 = pneg %p3601_p12 }
  0x67   : > { %p3607_p2 = pnand %p3605_p0, %p3602_p13 }
  0x69   : > { %3610 = shalt.err (!%p3607_p2)
}
  0x6a   : > { %s3611_s19 = scalar_lea.vmem %s4069_s21, 4096  ;;  %p3619_p4 = scmp.lt.s32.totalorder %s4069_s21, %s4069_s21 }
  0x6b   : > { %p3612_p5 = scmp.ne.s32.totalorder %s4069_s21, %s3611_s19  ;;  %p3620_p10 = scmp.lt.s32.totalorder %s3611_s19, %s3611_s19 }
  0x6d   : > { %p3614_p7 = pnand %p3612_p5, %p4079_p8  ;;  %p3621_p11 = por %p3620_p10, %p3619_p4 }
  0x6f   : > { %p3615_p9 = pneg %p3614_p7 }
  0x71   : > { %p3622_p12 = pnand %p3621_p11, %p3615_p9 }
  0x73   : > { %3625 = shalt.err (!%p3622_p12)
}
  0x74   : > { %s4927_s29 = smov 256   ;;  %s4929_s7 = smov 16  }
  0x75   : > { %3424 = dma.hbm_to_vmem [thread:$0]  (!%p4063_p6), %s4955_s8, 4096, %s4069_s21, [#allocation12], %s4927_s29, %s4927_s29, %s4929_s7  }
  0x76   : > { %s3925_s13 = smov [#allocation14]   ;;  %s3926_s23 = smov [#allocation10]  }
  0x77   : > { %s538_s22 = sshll.u32 %s3925_s13, 4  ;;  %s490_s28 = sshll.u32 %s3926_s23, 4  ;;  %s539_s22 = int_to_ptr.vmem [resolvable:$true] %s538_s22  ;;  %s491_s28 = int_to_ptr.vmem [resolvable:$true] %s490_s28 }
  0x78   : > { %s4956_s12 = sld [smem:[#allocation40_spill]] }
  0x7e   : > { %s3626_s19 = scalar_lea.hbm %s4956_s12, 2048 }
  0x7f   : > { %p3627_p13 = scmp.ne.s32.totalorder %s4956_s12, %s3626_s19  ;;  %p3633_p5 = scmp.lt.u32.totalorder %s3626_s19, %s4956_s12 }
  0x81   : > { %p3629_p0 = pnand %p3627_p13, %p4079_p8 }
  0x83   : > { %p3630_p2 = pneg %p3629_p0 }
  0x85   : > { %p3635_p7 = pnand %p3633_p5, %p3630_p2 }
  0x87   : > { %3638 = shalt.err (!%p3635_p7)
}
  0x88   : > { %s3639_s21 = scalar_lea.vmem %s539_s22, 2048  ;;  %p3647_p11 = scmp.lt.s32.totalorder %s539_s22, %s539_s22 }
  0x89   : > { %p3640_p9 = scmp.ne.s32.totalorder %s539_s22, %s3639_s21  ;;  %p3648_p12 = scmp.lt.s32.totalorder %s3639_s21, %s3639_s21 }
  0x8b   : > { %p3642_p4 = pnand %p3640_p9, %p4079_p8  ;;  %p3649_p1 = por %p3648_p12, %p3647_p11 }
  0x8d   : > { %p3643_p10 = pneg %p3642_p4 }
  0x8f   : > { %p3650_p3 = pnand %p3649_p1, %p3643_p10 }
  0x91   : > { %3653 = shalt.err (!%p3650_p3)
}
  0x92   : > { %s4957_s17 = smov 8   ;;  %s4958_s16 = smov 128  }
  0x93   : > { %3430 = dma.hbm_to_vmem [thread:$0]  (!%p4063_p6), %s4956_s12, 2048, %s539_s22, [#allocation15], %s4958_s16, %s4958_s16, %s4957_s17  }
  0x94   : > { %s4959_s6 = sld [smem:[#allocation34_spill]] }
  0x9a   : > { %s3654_s13 = scalar_lea.hbm %s4959_s6, 2048 }
  0x9b   : > { %p3655_p1 = scmp.ne.s32.totalorder %s4959_s6, %s3654_s13  ;;  %p3661_p0 = scmp.lt.u32.totalorder %s3654_s13, %s4959_s6 }
  0x9d   : > { %p3657_p3 = pnand %p3655_p1, %p4079_p8 }
  0x9f   : > { %p3658_p13 = pneg %p3657_p3 }
  0xa1   : > { %p3663_p2 = pnand %p3661_p0, %p3658_p13 }
  0xa3   : > { %3666 = shalt.err (!%p3663_p2)
}
  0xa4   : > { %s3667_s21 = scalar_lea.vmem %s491_s28, 2048  ;;  %p3675_p4 = scmp.lt.s32.totalorder %s491_s28, %s491_s28 }
  0xa5   : > { %p3668_p5 = scmp.ne.s32.totalorder %s491_s28, %s3667_s21  ;;  %p3676_p10 = scmp.lt.s32.totalorder %s3667_s21, %s3667_s21 }
  0xa7   : > { %p3670_p7 = pnand %p3668_p5, %p4079_p8  ;;  %p3677_p11 = por %p3676_p10, %p3675_p4 }
  0xa9   : > { %p3671_p9 = pneg %p3670_p7 }
  0xab   : > { %p3678_p12 = pnand %p3677_p11, %p3671_p9 }
  0xad   : > { %3681 = shalt.err (!%p3678_p12)
}
  0xae   : > { %3421 = dma.hbm_to_vmem [thread:$0]  (!%p4063_p6), %s4959_s6, 2048, %s491_s28, [#allocation9], %s4958_s16, %s4958_s16, %s4957_s17  }
  0xaf   : > { %s3927_s4 = smov [#allocation13]   ;;  %s3928_s11 = smov [#allocation16]  }
  0xb0   : > { %s522_s9 = sshll.u32 %s3927_s4, 4  ;;  %s554_s13 = sshll.u32 %s3928_s11, 4  ;;  %s523_s9 = int_to_ptr.vmem [resolvable:$true] %s522_s9  ;;  %s555_s13 = int_to_ptr.vmem [resolvable:$true] %s554_s13 }
  0xb1   : > { %s4960_s10 = sld [smem:[#allocation38_spill]] }
  0xb7   : > { %s3682_s15 = scalar_lea.hbm %s4960_s10, 2048 }
  0xb8   : > { %p3683_p1 = scmp.ne.s32.totalorder %s4960_s10, %s3682_s15  ;;  %p3689_p0 = scmp.lt.u32.totalorder %s3682_s15, %s4960_s10 }
  0xba   : > { %p3685_p3 = pnand %p3683_p1, %p4079_p8 }
  0xbc   : > { %p3686_p13 = pneg %p3685_p3 }
  0xbe   : > { %p3691_p2 = pnand %p3689_p0, %p3686_p13 }
  0xc0   : > { %3694 = shalt.err (!%p3691_p2)
}
  0xc1   : > { %s3695_s28 = scalar_lea.vmem %s523_s9, 2048  ;;  %p3703_p4 = scmp.lt.s32.totalorder %s523_s9, %s523_s9 }
  0xc2   : > { %p3696_p5 = scmp.ne.s32.totalorder %s523_s9, %s3695_s28  ;;  %p3704_p10 = scmp.lt.s32.totalorder %s3695_s28, %s3695_s28 }
  0xc4   : > { %p3698_p7 = pnand %p3696_p5, %p4079_p8  ;;  %p3705_p11 = por %p3704_p10, %p3703_p4 }
  0xc6   : > { %p3699_p9 = pneg %p3698_p7 }
  0xc8   : > { %p3706_p12 = pnand %p3705_p11, %p3699_p9 }
  0xca   : > { %3709 = shalt.err (!%p3706_p12)
}
  0xcb   : > { %3427 = dma.hbm_to_vmem [thread:$0]  (!%p4063_p6), %s4960_s10, 2048, %s523_s9, [#allocation12], %s4958_s16, %s4958_s16, %s4957_s17  }
  0xcc   : > { %s4961_s14 = sld [smem:[#allocation42_spill]] }
  0xd2   : > { %s3710_s23 = scalar_lea.hbm %s4961_s14, 4096 }
  0xd3   : > { %p3711_p1 = scmp.ne.s32.totalorder %s4961_s14, %s3710_s23  ;;  %p3717_p0 = scmp.lt.u32.totalorder %s3710_s23, %s4961_s14 }
  0xd5   : > { %p3713_p3 = pnand %p3711_p1, %p4079_p8 }
  0xd7   : > { %p3714_p13 = pneg %p3713_p3 }
  0xd9   : > { %p3719_p2 = pnand %p3717_p0, %p3714_p13 }
  0xdb   : > { %3722 = shalt.err (!%p3719_p2)
}
  0xdc   : > { %s3723_s22 = scalar_lea.vmem %s555_s13, 4096  ;;  %p3731_p4 = scmp.lt.s32.totalorder %s555_s13, %s555_s13 }
  0xdd   : > { %p3724_p5 = scmp.ne.s32.totalorder %s555_s13, %s3723_s22  ;;  %p3732_p10 = scmp.lt.s32.totalorder %s3723_s22, %s3723_s22 }
  0xdf   : > { %p3726_p7 = pnand %p3724_p5, %p4079_p8  ;;  %p3733_p11 = por %p3732_p10, %p3731_p4 }
  0xe1   : > { %p3727_p9 = pneg %p3726_p7 }
  0xe3   : > { %p3734_p12 = pnand %p3733_p11, %p3727_p9 }
  0xe5   : > { %3737 = shalt.err (!%p3734_p12)
}
  0xe6   : > { %s4962_s9 = smov 256   ;;  %s2653_s1 = sadd.s32 4294967294, %s3916_s27  }
  0xe7   : > { %3433 = dma.hbm_to_vmem [thread:$0]  (!%p4063_p6), %s4961_s14, 4096, %s555_s13, [#allocation15], %s4962_s9, %s4962_s9, %s4929_s7  }
  0xe8   : > { %s4241_s18 = sadd.s32 1, %s3916_s27   ;;  %s50_s2 = sadd.s32 1, %s3912_s26 }
  0xe9   : > { %s47_s4 = ssub.s32 %s3916_s27, %s4241_s18  ;;  %p57_p8 = scmp.ne.s32.totalorder %s3912_s26, %s3908_s25 }
  0xea   : > { %p48_p1 = scmp.eq.s32.totalorder %s47_s4, 0  ;;  %p58_p3 = scmp.eq.s32.totalorder %s3916_s27, 0 }
  0xeb   : > { %p63_p13 = scmp.ne.s32.totalorder %s3908_s25, %s3904_s24  ;;  %p407_p0 = scmp.eq.s32.totalorder %s4047_s0, 1 }
  0xec   : > { %s4253_s11 = scalar_select %p48_p1, %s3912_s26, %s50_s2  }
  0xed   : > { %p59_p2 = por %p58_p3, %p57_p8  ;;  %p4964_p5 = scmp.eq.s32.totalorder %s4047_s0, 0 }
  0xee   : > { %4963 = sst [smem:[#allocation29_spill]] %s4253_s11  ;;  %p4261_p6 = por %p407_p0, %p57_p8 }
  0xef   : > { %p4257_p7 = por %p4964_p5, %p63_p13  ;;  %p413_p9 = scmp.eq.s32.totalorder %s2653_s1, 1 }
  0xf0   : > { %s4966_s23 = scalar_select %p4261_p6, 1, 0 }
  0xf1   : > { %p3455_p4 = scmp.lt.s32.totalorder %s3916_s27, 2  ;;  %s4267_s20 = sand.u32 1, %s3912_s26  }
  0xf2   : > { %p4269_p10 = por %p413_p9, %p63_p13  ;;  %s2663_s19 = sshll.u32 %s4267_s20, 8 }
  0xf3   : > { %s2698_s21 = sshll.u32 %s3916_s27, 12  ;;  %s4968_s29 = sld [smem:[#allocation30_spill]] }
  0xf4   : > { %s4967_s15 = scalar_select %p4269_p10, 1, 0 }
  0xf5   : > { %s575_s1 = scalar_lea.vmem [#allocation2], %s2663_s19  ;;  %p4280_p11 = pnand %p3455_p4, %p59_p2 }
  0xf6   : > { %s583_s4 = sshll.u32 %s575_s1, 4  ;;  %s572_s8 = scalar_lea.sflag [#allocation3], %s4267_s20  ;;  %s4284_s4 = int_to_ptr.vmem [resolvable:$true] %s583_s4 }
  0xf7   : > { %p3740_p8 = pneg %p4280_p11 }
  0xf9   : > { %s4278_s2 = scalar_lea.hbm %s4968_s29, %s2698_s21  ;;  %s3743_s22 = scalar_lea.hbm %s4968_s29, 8192 }
  0xfa   : > { %s3738_s10 = scalar_lea.hbm %s4278_s2, 4096  ;;  %p3744_p13 = scmp.lt.u32.totalorder %s4278_s2, %s4968_s29 }
  0xfb   : > { %p3739_p12 = scmp.ne.s32.totalorder %s4278_s2, %s3738_s10  ;;  %p3745_p0 = scmp.lt.u32.totalorder %s3743_s22, %s3738_s10 }
  0xfc   : > { %p3747_p5 = scmp.lt.u32.totalorder %s3738_s10, %s4278_s2 }
  0xfd   : > { %p3741_p1 = pnand %p3740_p8, %p3739_p12  ;;  %p3746_p2 = por %p3745_p0, %p3744_p13 }
  0xff   : > { %p3742_p3 = pneg %p3741_p1  ;;  %p3748_p9 = por %p3747_p5, %p3746_p2 }
 0x101   : > { %p3749_p4 = pnand %p3748_p9, %p3742_p3 }
 0x103   : > { %3752 = shalt.err (!%p3749_p4)
}
 0x104   : > { %s3753_s6 = scalar_lea.vmem %s4284_s4, 4096  ;;  %s3929_s19 = smov [#allocation2]  }
 0x105   : > { %p3754_p12 = scmp.ne.s32.totalorder %s4284_s4, %s3753_s6  ;;  %s3758_s21 = sshll.u32 %s3929_s19, 4  ;;  %s3759_s21 = int_to_ptr.vmem [resolvable:$false] %s3758_s21 }
 0x106   : > { %s3760_s28 = scalar_lea.vmem %s3759_s21, 8192  ;;  %p3761_p6 = scmp.lt.s32.totalorder %s4284_s4, %s3759_s21 }
 0x107   : > { %p3756_p1 = pnand %p3754_p12, %p3740_p8  ;;  %p3762_p13 = scmp.lt.s32.totalorder %s3760_s28, %s3753_s6 }
 0x109   : > { %p3757_p10 = pneg %p3756_p1  ;;  %p3763_p0 = por %p3762_p13, %p3761_p6 }
 0x10b   : > { %p3764_p2 = pnand %p3763_p0, %p3757_p10 }
 0x10d   : > { %3767 = shalt.err (!%p3764_p2)
}
 0x10e   : > { %s4970_s10 = smov 16   ;;  %s2667_s22 = sshll.u32 %s4267_s20, 7 }
 0x10f   : > { %3437 = dma.hbm_to_vmem [thread:$0]  (!%p4280_p11), %s4278_s2, 4096, %s4284_s4, %s572_s8, %s4962_s9, %s4962_s9, %s4970_s10  }
 0x110   : > { %s2699_s1 = sshll.u32 %s3916_s27, 11  ;;  %s4971_s21 = sld [smem:[#allocation31_spill]] }
 0x111   : > { %s597_s12 = scalar_lea.vmem [#allocation5], %s2667_s22  ;;  %s4972_s29 = sand.u32 1, %s3916_s27  }
 0x112   : > { %s604_s14 = sshll.u32 %s597_s12, 4  ;;  %s4329_s11 = scalar_lea.sflag [#allocation6], %s4972_s29  ;;  %s4325_s14 = int_to_ptr.vmem [resolvable:$true] %s604_s14 }
 0x116   : > { %s4323_s28 = scalar_lea.hbm %s4971_s21, %s2699_s1  ;;  %s3773_s20 = scalar_lea.hbm %s4971_s21, 4096 }
 0x117   : > { %s3768_s26 = scalar_lea.hbm %s4323_s28, 2048  ;;  %p3774_p5 = scmp.lt.u32.totalorder %s4323_s28, %s4971_s21 }
 0x118   : > { %p3769_p6 = scmp.ne.s32.totalorder %s4323_s28, %s3768_s26  ;;  %p3775_p9 = scmp.lt.u32.totalorder %s3773_s20, %s3768_s26 }
 0x119   : > { %p3777_p12 = scmp.lt.u32.totalorder %s3768_s26, %s4323_s28 }
 0x11a   : > { %p3771_p10 = pnand %p3769_p6, %p3740_p8  ;;  %p3776_p4 = por %p3775_p9, %p3774_p5 }
 0x11c   : > { %p3772_p3 = pneg %p3771_p10  ;;  %p3778_p1 = por %p3777_p12, %p3776_p4 }
 0x11e   : > { %p3779_p13 = pnand %p3778_p1, %p3772_p3 }
 0x120   : > { %3782 = shalt.err (!%p3779_p13)
}
 0x121   : > { %s3783_s12 = scalar_lea.vmem %s4325_s14, 2048  ;;  %s3930_s29 = smov [#allocation5]  }
 0x122   : > { %p3784_p0 = scmp.ne.s32.totalorder %s4325_s14, %s3783_s12  ;;  %s3788_s10 = sshll.u32 %s3930_s29, 4  ;;  %s3789_s10 = int_to_ptr.vmem [resolvable:$false] %s3788_s10 }
 0x123   : > { %s3790_s22 = scalar_lea.vmem %s3789_s10, 4096  ;;  %p3791_p10 = scmp.lt.s32.totalorder %s4325_s14, %s3789_s10 }
 0x124   : > { %p3786_p2 = pnand %p3784_p0, %p3740_p8  ;;  %p3792_p5 = scmp.lt.s32.totalorder %s3790_s22, %s3783_s12 }
 0x126   : > { %p3787_p6 = pneg %p3786_p2  ;;  %p3793_p9 = por %p3792_p5, %p3791_p10 }
 0x128   : > { %p3794_p4 = pnand %p3793_p9, %p3787_p6 }
 0x12a   : > { %3797 = shalt.err (!%p3794_p4)
}
 0x12b   : > { %3440 = dma.hbm_to_vmem [thread:$0]  (!%p4280_p11), %s4323_s28, 2048, %s4325_s14, %s4329_s11, %s4958_s16, %s4958_s16, %s4957_s17  }
 0x12c   : > { %p4973_p8 = scmp.ne.s32.totalorder %s4950_s30, 0 }
 0x12d   : > { %s4361_s26 = sand.u32 (!%p4973_p8), 1, %s3908_s25  }
 0x12e   : > { %616 = sbr.rel (%p4973_p8) target bundleno = 1986 (0x7c2), region = 84  ;;  %s4364_s1 = sshll.u32 (!%p4973_p8), %s4361_s26, 8 }
 0x12f   : > { %s619_s7 = scalar_lea.sflag (!%p4973_p8), [#allocation3], %s4361_s26  ;;  %s4368_s6 = scalar_lea.vmem (!%p4973_p8), [#allocation2], %s4364_s1 }
 0x135   : > { %3871 = dma.done.wait (%p4257_p7), %s619_s7, 4096  }
 0x136   : > { %3873 = vsyncadd (%p4257_p7), %s619_s7, 4294963200  ;;  %s627_s14 = sand.u32 1, %s4047_s0   ;;  %s2672_s30 = sshll.u32 %s4361_s26, 7 }
 0x137   : > { %s628_s17 = scalar_lea.sflag [#allocation6], %s627_s14  ;;  %s4376_s16 = scalar_lea.vmem [#allocation5], %s2672_s30 }
 0x138   : > { %3875 = dma.done.wait (%p4257_p7), %s628_s17, 2048  }
 0x139   : > { %3877 = vsyncadd (%p4257_p7), %s628_s17, 4294965248  ;;  %p4974_p11 = scmp.eq.s32.totalorder %s4047_s0, 0 }
 0x13b   : > { %3879 = dma.done.wait (%p4974_p11), [#allocation6], 4096   ;;  %p4975_p3 = pmov %p4974_p11 }
 0x13d   : > { %3881 = vsyncadd (%p4975_p3), [#allocation6], 4294963200  ;;  %p4976_p12 = pmov %p4975_p3 }
 0x13e   : > { %p4977_p1 = pmov %p4975_p3 }
 0x13f   : > { %3883 = dma.done.wait (%p4976_p12), [#allocation9], 4096  }
 0x140   : > { %3885 = vsyncadd (%p4977_p1), [#allocation9], 4294963200  ;;  %p4978_p13 = pmov %p4977_p1 }
 0x141   : > { %p4979_p0 = pmov %p4977_p1 }
 0x142   : > { %3887 = dma.done.wait (%p4978_p13), [#allocation12], 6144  }
 0x143   : > { %3889 = vsyncadd (%p4979_p0), [#allocation12], 4294961152  ;;  %p4980_p7 = pmov %p4979_p0 }
 0x144   : > { %p4981_p2 = pmov %p4979_p0 }
 0x145   : > { %3891 = dma.done.wait (%p4980_p7), [#allocation15], 6144  }
 0x146   : > { %3893 = vsyncadd (%p4981_p2), [#allocation15], 4294961152  ;;  %v772_v0 = vld [vmem:[#allocation7 + $0x80] sm:$0xff]  ;;  %v773_v1 = vld [vmem:[#allocation7 + $0x88] sm:$0xff]  ;;  %s4982_s20 = sld [smem:[#allocation35_spill]]  ;;  %s4983_s12 = sld [smem:[#allocation37_spill]] }
 0x147   : > { %v756_v2 = vld [vmem:[#allocation7] sm:$0xff]  ;;  %v3136_v3 = vpack.c.bf16 %v773_v1, %v772_v0  ;;  %v757_v4 = vld [vmem:[#allocation7 + $0x8] sm:$0xff]  ;;  %v774_v5 = vld [vmem:[#allocation7 + $0x90] sm:$0xff]  ;;  %s4546_s29 = scalar_lea.vmem [#allocation17], %s4364_s1  ;;  %s4984_s7 = sld [smem:[#allocation39_spill]] }
 0x148   : > { %v775_v6 = vld [vmem:[#allocation7 + $0x98] sm:$0xff]  ;;  %v3138_v7 = vpack.c.bf16 %v757_v4, %v756_v2  ;;  %v758_v9 = vld [vmem:[#allocation7 + $0x10] sm:$0xff]  ;;  %v776_v11 = vld [vmem:[#allocation7 + $0xa0] sm:$0xff]  ;;  %s4985_s30 = sld [smem:[#allocation41_spill]]  ;;  %s2701_s17 = sshll.u32 %s4047_s0, 12 }
 0x149   : > { %v3140_v8 = vpack.c.bf16 %v775_v6, %v774_v5  ;;  %v759_v10 = vld [vmem:[#allocation7 + $0x18] sm:$0xff]  ;;  %3137 = vmatprep.subr.bf16.mxu0 %v3136_v3  ;;  %v777_v12 = vld [vmem:[#allocation7 + $0xa8] sm:$0xff]  ;;  %3360 = vmatprep.subr.bf16.mxu1 %v3136_v3  ;;  %v760_v15 = vld [vmem:[#allocation7 + $0x20] sm:$0xff]  ;;  %s4986_s19 = sld [smem:[#allocation44_spill]]  ;;  %s2423_s8 = scalar_lea.sflag [#allocation4], %s4361_s26 }
 0x14a   : > { %3139 = vmatpush3.bf16.msra.mxu0 %v3138_v7  ;;  %v3142_v13 = vpack.c.bf16 %v759_v10, %v758_v9  ;;  %3368 = vmatpush3.bf16.msra.mxu1 %v3138_v7  ;;  %v3144_v14 = vpack.c.bf16 %v777_v12, %v776_v11  ;;  %v761_v16 = vld [vmem:[#allocation7 + $0x28] sm:$0xff]  ;;  %v778_v17 = vld [vmem:[#allocation7 + $0xb0] sm:$0xff]  ;;  %v779_v18 = vld [vmem:[#allocation7 + $0xb8] sm:$0xff]  ;;  %p4987_p10 = scmp.ne.s32.totalorder %s4966_s23, 0 }
 0x14b   : > { %3141 = vmatprep.subr.bf16.mxu0 %v3140_v8  ;;  %3361 = vmatprep.subr.bf16.mxu1 %v3140_v8  ;;  %v3146_v19 = vpack.c.bf16 %v761_v16, %v760_v15  ;;  %v3148_v20 = vpack.c.bf16 %v779_v18, %v778_v17  ;;  %v762_v21 = vld [vmem:[#allocation7 + $0x30] sm:$0xff]  ;;  %v763_v22 = vld [vmem:[#allocation7 + $0x38] sm:$0xff]  ;;  %v780_v23 = vld [vmem:[#allocation7 + $0xc0] sm:$0xff] }
 0x14c   : > { %v781_v24 = vld [vmem:[#allocation7 + $0xc8] sm:$0xff]  ;;  %v3150_v26 = vpack.c.bf16 %v763_v22, %v762_v21  ;;  %v764_v28 = vld [vmem:[#allocation7 + $0x40] sm:$0xff]  ;;  %v782_v30 = vld [vmem:[#allocation7 + $0xd0] sm:$0xff] }
 0x14d   : > { %v725_v25 = vld [vmem:[%s4368_s6 + $0x8] sm:$0xff]  ;;  %v3152_v27 = vpack.c.bf16 %v781_v24, %v780_v23  ;;  %v783_v31 = vld [vmem:[#allocation7 + $0xd8] sm:$0xff]  ;;  %v766_v35 = vld [vmem:[#allocation7 + $0x50] sm:$0xff] }
 0x14e   : > { %3143 = vmatpush3.bf16.msra.mxu0 %v3142_v13  ;;  %3369 = vmatpush3.bf16.msra.mxu1 %v3142_v13  ;;  %v765_v29 = vld [vmem:[#allocation7 + $0x48] sm:$0xff]  ;;  %v3156_v34 = vpack.c.bf16 %v783_v31, %v782_v30  ;;  %v767_v36 = vld [vmem:[#allocation7 + $0x58] sm:$0xff]  ;;  %v784_v37 = vld [vmem:[#allocation7 + $0xe0] sm:$0xff] }
 0x14f   : > { %3145 = vmatprep.subr.bf16.mxu0 %v3144_v14  ;;  %3362 = vmatprep.subr.bf16.mxu1 %v3144_v14  ;;  %v741_v32 = vld [vmem:[%s4368_s6 + $0x88] sm:$0xff]  ;;  %v3154_v33 = vpack.c.bf16 %v765_v29, %v764_v28  ;;  %v3158_v39 = vpack.c.bf16 %v767_v36, %v766_v35  ;;  %v768_v41 = vld [vmem:[#allocation7 + $0x60] sm:$0xff]  ;;  %v786_v43 = vld [vmem:[#allocation7 + $0xf0] sm:$0xff]  ;;  %s4735_s28 = scalar_lea.hbm %s4986_s19, %s2701_s17 }
 0x150   : > { %859 = vmatprep.mubr.f32.mxu0 %v725_v25  ;;  %899 = vmatprep.mubr.f32.mxu1 %v741_v32  ;;  %v785_v38 = vld [vmem:[#allocation7 + $0xe8] sm:$0xff]  ;;  %v787_v44 = vld [vmem:[#allocation7 + $0xf8] sm:$0xff]  ;;  %v770_v47 = vld [vmem:[#allocation7 + $0x70] sm:$0xff] }
 0x151   : > { %v3160_v40 = vpack.c.bf16 %v785_v38, %v784_v37  ;;  %v769_v42 = vld [vmem:[#allocation7 + $0x68] sm:$0xff]  ;;  %v3164_v46 = vpack.c.bf16 %v787_v44, %v786_v43  ;;  %v771_v48 = vld [vmem:[#allocation7 + $0x78] sm:$0xff]  ;;  %v988_v49 = vld [vmem:[#allocation8] sm:$0xff] }
 0x152   : > { %3147 = vmatpush3.bf16.msra.mxu0 %v3146_v19  ;;  %3370 = vmatpush3.bf16.msra.mxu1 %v3146_v19  ;;  %v3162_v45 = vpack.c.bf16 %v769_v42, %v768_v41  ;;  %v989_v50 = vld [vmem:[#allocation8 + $0x8] sm:$0xff]  ;;  %v3166_v51 = vpack.c.bf16 %v771_v48, %v770_v47  ;;  %v990_v53 = vld [vmem:[#allocation8 + $0x10] sm:$0xff]  ;;  %v991_v54 = vld [vmem:[#allocation8 + $0x18] sm:$0xff] }
 0x153   : > { %3149 = vmatprep.subr.bf16.mxu0 %v3148_v20  ;;  %3363 = vmatprep.subr.bf16.mxu1 %v3148_v20  ;;  %v3168_v52 = vpack.c.bf16 %v989_v50, %v988_v49  ;;  %v724_v55 = vld [vmem:[%s4368_s6] sm:$0xff]  ;;  %v727_v57 = vld [vmem:[%s4368_s6 + $0x18] sm:$0xff]  ;;  %v3172_v59 = vpack.c.bf16 %v991_v54, %v990_v53  ;;  %v993_v61 = vld [vmem:[#allocation8 + $0x28] sm:$0xff] }
 0x154   : > { %v740_v56 = vld [vmem:[%s4368_s6 + $0x80] sm:$0xff]  ;;  %v743_v58 = vld [vmem:[%s4368_s6 + $0x98] sm:$0xff]  ;;  %v726_v62 = vld [vmem:[%s4368_s6 + $0x10] sm:$0xff] }
 0x155   : > { %v992_v60 = vld [vmem:[#allocation8 + $0x20] sm:$0xff]  ;;  %v742_v63 = vld [vmem:[%s4368_s6 + $0x90] sm:$0xff]  ;;  %v729_v0 = vld [vmem:[%s4368_s6 + $0x28] sm:$0xff] }
 0x156   : > { %3151 = vmatpush3.bf16.msra.mxu0 %v3150_v26  ;;  %3371 = vmatpush3.bf16.msra.mxu1 %v3150_v26  ;;  %v745_v1 = vld [vmem:[%s4368_s6 + $0xa8] sm:$0xff]  ;;  %v3176_v2 = vpack.c.bf16 %v993_v61, %v992_v60  ;;  %v994_v3 = vld [vmem:[#allocation8 + $0x30] sm:$0xff]  ;;  %v995_v4 = vld [vmem:[#allocation8 + $0x38] sm:$0xff] }
 0x157   : > { %3153 = vmatprep.subr.bf16.mxu0 %v3152_v27  ;;  %3364 = vmatprep.subr.bf16.mxu1 %v3152_v27  ;;  %v728_v5 = vld [vmem:[%s4368_s6 + $0x20] sm:$0xff]  ;;  %v731_v7 = vld [vmem:[%s4368_s6 + $0x38] sm:$0xff]  ;;  %v3180_v9 = vpack.c.bf16 %v995_v4, %v994_v3  ;;  %v997_v11 = vld [vmem:[#allocation8 + $0x48] sm:$0xff] }
 0x158   : > { %v744_v6 = vld [vmem:[%s4368_s6 + $0xa0] sm:$0xff]  ;;  %v747_v8 = vld [vmem:[%s4368_s6 + $0xb8] sm:$0xff]  ;;  %v730_v12 = vld [vmem:[%s4368_s6 + $0x30] sm:$0xff] }
 0x159   : > { %v996_v10 = vld [vmem:[#allocation8 + $0x40] sm:$0xff]  ;;  %v746_v13 = vld [vmem:[%s4368_s6 + $0xb0] sm:$0xff]  ;;  %v733_v14 = vld [vmem:[%s4368_s6 + $0x48] sm:$0xff] }
 0x15a   : > { %3155 = vmatpush3.bf16.msra.mxu0 %v3154_v33  ;;  %3372 = vmatpush3.bf16.msra.mxu1 %v3154_v33  ;;  %v749_v15 = vld [vmem:[%s4368_s6 + $0xc8] sm:$0xff]  ;;  %v3184_v16 = vpack.c.bf16 %v997_v11, %v996_v10  ;;  %v732_v17 = vld [vmem:[%s4368_s6 + $0x40] sm:$0xff]  ;;  %v735_v19 = vld [vmem:[%s4368_s6 + $0x58] sm:$0xff] }
 0x15b   : > { %3157 = vmatprep.subr.bf16.mxu0 %v3156_v34  ;;  %3365 = vmatprep.subr.bf16.mxu1 %v3156_v34  ;;  %v748_v18 = vld [vmem:[%s4368_s6 + $0xc0] sm:$0xff]  ;;  %v751_v20 = vld [vmem:[%s4368_s6 + $0xd8] sm:$0xff]  ;;  %v734_v21 = vld [vmem:[%s4368_s6 + $0x50] sm:$0xff] }
 0x15c   : > { %v750_v22 = vld [vmem:[%s4368_s6 + $0xd0] sm:$0xff]  ;;  %v737_v23 = vld [vmem:[%s4368_s6 + $0x68] sm:$0xff]  ;;  %v736_v25 = vld [vmem:[%s4368_s6 + $0x60] sm:$0xff] }
 0x15d   : > { %v753_v24 = vld [vmem:[%s4368_s6 + $0xe8] sm:$0xff]  ;;  %v752_v26 = vld [vmem:[%s4368_s6 + $0xe0] sm:$0xff]  ;;  %v739_v27 = vld [vmem:[%s4368_s6 + $0x78] sm:$0xff] }
 0x15e   : > { %3159 = vmatpush3.bf16.msra.mxu0 %v3158_v39  ;;  %3373 = vmatpush3.bf16.msra.mxu1 %v3158_v39  ;;  %v755_v28 = vld [vmem:[%s4368_s6 + $0xf8] sm:$0xff]  ;;  %v738_v29 = vld [vmem:[%s4368_s6 + $0x70] sm:$0xff]  ;;  %v1000_v34 = vld [vmem:[#allocation8 + $0x60] sm:$0xff] }
 0x15f   : > { %3161 = vmatprep.subr.bf16.mxu0 %v3160_v40  ;;  %3366 = vmatprep.subr.bf16.mxu1 %v3160_v40  ;;  %v754_v30 = vld [vmem:[%s4368_s6 + $0xf0] sm:$0xff]  ;;  %v999_v32 = vld [vmem:[#allocation8 + $0x58] sm:$0xff]  ;;  %v1001_v35 = vld [vmem:[#allocation8 + $0x68] sm:$0xff] }
 0x160   : > { %v998_v31 = vld [vmem:[#allocation8 + $0x50] sm:$0xff]  ;;  %v3192_v36 = vpack.c.bf16 %v1001_v35, %v1000_v34  ;;  %v1003_v38 = vld [vmem:[#allocation8 + $0x78] sm:$0xff]  ;;  %v1204_v40 = vld [vmem:[#allocation10] sm:$0xff] }
 0x161   : > { %v3188_v33 = vpack.c.bf16 %v999_v32, %v998_v31  ;;  %v1002_v37 = vld [vmem:[#allocation8 + $0x70] sm:$0xff]  ;;  %v1205_v41 = vld [vmem:[#allocation10 + $0x8] sm:$0xff]  ;;  %v1208_v10 = vld [vmem:[#allocation10 + $0x20] sm:$0xff] }
 0x162   : > { %3163 = vmatpush3.bf16.msra.mxu0 %v3162_v45  ;;  %3374 = vmatpush3.bf16.msra.mxu1 %v3162_v45  ;;  %v3196_v39 = vpack.c.bf16 %v1003_v38, %v1002_v37  ;;  %v3200_v42 = vpack.c.bf16 %v1205_v41, %v1204_v40  ;;  %v4433_v45 = vld [vmem:[%s4902_s3] ss:$0 sm:$0xff]  ;;  %v1209_v11 = vld [vmem:[#allocation10 + $0x28] sm:$0xff] }
 0x163   : > { %3165 = vmatprep.subr.bf16.mxu0 %v3164_v46  ;;  %3367 = vmatprep.subr.bf16.mxu1 %v3164_v46  ;;  %v1212_v34 = vld [vmem:[#allocation10 + $0x40] sm:$0xff]  ;;  %v1213_v35 = vld [vmem:[#allocation10 + $0x48] sm:$0xff] }
 0x164   : > { %v3216_v41 = vpack.c.bf16 %v1213_v35, %v1212_v34  ;;  %v1423_v34 = vld [vmem:[#allocation11 + $0x18] sm:$0xff]  ;;  %v1420_v35 = vld [vmem:[#allocation11] sm:$0xff] }
 0x166   : > { %3167 = vmatpush3.bf16.msra.mxu0 %v3166_v51  ;;  %3375 = vmatpush3.bf16.msra.mxu1 %v3166_v51 }
 0x167   : > { %3169 = vmatprep.subr.bf16.mxu1 %v3168_v52 }
 0x169   : > { %860 = vmatmul.mubr.f32.vlgmr.msra.gmra.mrb[0].mxu0 %v724_v55  ;;  %900 = vmatmul.mubr.f32.vlgmr.msra.gmra.mrb[0].mxu1 %v740_v56 }
 0x16a   : > { %864 = vmatprep.mubr.f32.mxu0 %v727_v57  ;;  %904 = vmatprep.mubr.f32.mxu1 %v743_v58 }
 0x16b   : > { %3171 = vmatpush3.bf16.msra.mxu1 %v3168_v52 }
 0x16c   : > { %3173 = vmatprep.subr.bf16.mxu1 %v3172_v59 }
 0x16d   : > { %865 = vmatmul.mubr.f32.gmra.mrb[2].mxu0 %v726_v62  ;;  %905 = vmatmul.mubr.f32.gmra.mrb[2].mxu1 %v742_v63  ;;  %v1206_v62 = vld [vmem:[#allocation10 + $0x10] sm:$0xff]  ;;  %v1207_v63 = vld [vmem:[#allocation10 + $0x18] sm:$0xff] }
 0x16e   : > { %869 = vmatprep.mubr.f32.mxu0 %v729_v0  ;;  %909 = vmatprep.mubr.f32.mxu1 %v745_v1 }
 0x16f   : > { %3175 = vmatpush3.bf16.msra.mxu1 %v3172_v59 }
 0x170   : > { %3177 = vmatprep.subr.bf16.mxu1 %v3176_v2 }
 0x171   : > { %870 = vmatmul.mubr.f32.gmra.mrb[4].mxu0 %v728_v5  ;;  %910 = vmatmul.mubr.f32.gmra.mrb[4].mxu1 %v744_v6  ;;  %v3204_v5 = vpack.c.bf16 %v1207_v63, %v1206_v62  ;;  %v1216_v62 = vld [vmem:[#allocation10 + $0x60] sm:$0xff]  ;;  %v1217_v63 = vld [vmem:[#allocation10 + $0x68] sm:$0xff] }
 0x172   : > { %874 = vmatprep.mubr.f32.mxu0 %v731_v7  ;;  %914 = vmatprep.mubr.f32.mxu1 %v747_v8 }
 0x173   : > { %3179 = vmatpush3.bf16.msra.mxu1 %v3176_v2 }
 0x174   : > { %3181 = vmatprep.subr.bf16.mxu1 %v3180_v9 }
 0x175   : > { %875 = vmatmul.mubr.f32.gmra.mrb[6].mxu0 %v730_v12  ;;  %915 = vmatmul.mubr.f32.gmra.mrb[6].mxu1 %v746_v13 }
 0x176   : > { %879 = vmatprep.mubr.f32.mxu0 %v733_v14  ;;  %919 = vmatprep.mubr.f32.mxu1 %v749_v15 }
 0x177   : > { %3183 = vmatpush3.bf16.msra.mxu1 %v3180_v9 }
 0x178   : > { %3185 = vmatprep.subr.bf16.mxu1 %v3184_v16 }
 0x179   : > { %880 = vmatmul.mubr.f32.gmra.mrb[8].mxu0 %v732_v17  ;;  %920 = vmatmul.mubr.f32.gmra.mrb[8].mxu1 %v748_v18  ;;  %v3208_v17 = vpack.c.bf16 %v1209_v11, %v1208_v10 }
 0x17a   : > { %884 = vmatprep.mubr.f32.mxu0 %v735_v19  ;;  %924 = vmatprep.mubr.f32.mxu1 %v751_v20 }
 0x17b   : > { %3187 = vmatpush3.bf16.msra.mxu1 %v3184_v16 }
 0x17c   : > { %3189 = vmatprep.subr.bf16.mxu1 %v3188_v33 }
 0x17d   : > { %885 = vmatmul.mubr.f32.gmra.mrb[10].mxu0 %v734_v21  ;;  %925 = vmatmul.mubr.f32.gmra.mrb[10].mxu1 %v750_v22  ;;  %v1210_v22 = vld [vmem:[#allocation10 + $0x30] sm:$0xff] }
 0x17e   : > { %889 = vmatprep.mubr.f32.mxu0 %v737_v23  ;;  %929 = vmatprep.mubr.f32.mxu1 %v753_v24  ;;  %v1211_v23 = vld [vmem:[#allocation10 + $0x38] sm:$0xff] }
 0x17f   : > { %3191 = vmatpush3.bf16.msra.mxu1 %v3188_v33 }
 0x180   : > { %3193 = vmatprep.subr.bf16.mxu1 %v3192_v36 }
 0x181   : > { %890 = vmatmul.mubr.f32.gmra.mrb[12].mxu0 %v736_v25  ;;  %930 = vmatmul.mubr.f32.gmra.mrb[12].mxu1 %v752_v26 }
 0x182   : > { %894 = vmatprep.mubr.f32.mxu0 %v739_v27  ;;  %934 = vmatprep.mubr.f32.mxu1 %v755_v28 }
 0x183   : > { %3195 = vmatpush3.bf16.msra.mxu1 %v3192_v36 }
 0x184   : > { %3197 = vmatprep.subr.bf16.mxu1 %v3196_v39 }
 0x185   : > { %895 = vmatmul.mubr.f32.gmra.mrb[14].mxu0 %v738_v29  ;;  %935 = vmatmul.mubr.f32.gmra.mrb[14].mxu1 %v754_v30  ;;  %v3212_v29 = vpack.c.bf16 %v1211_v23, %v1210_v22 }
 0x187   : > { %3199 = vmatpush3.bf16.msra.mxu1 %v3196_v39 }
 0x188   : > { %3201 = vmatprep.subr.bf16.mxu1 %v3200_v42 }
 0x23c   : > { %v2736_v43 = vpop.f32.mrb[0].mxu0  ;;  %v2760_v44 = vpop.f32.mrb[0].mxu1 }
 0x23d   : > { %v2737_v46 = vpop.f32.mrb[1].mxu0  ;;  %v2761_v47 = vpop.f32.mrb[1].mxu1 }
 0x23e   : > { %v2738_v48 = vadd.f32 %v2737_v46, %v2736_v43  ;;  %v4435_v49 = vadd.f32 %v2761_v47, %v2760_v44  ;;  %v1214_v47 = vld [vmem:[#allocation10 + $0x50] sm:$0xff] }
 0x240   : > { %v862_v50 = vadd.f32 %v2738_v48, %v4433_v45  ;;  %v2739_v51 = vpop.f32.mrb[2].mxu0  ;;  %v2763_v52 = vpop.f32.mrb[2].mxu1  ;;  %v1215_v48 = vld [vmem:[#allocation10 + $0x58] sm:$0xff] }
 0x241   : > { %v2740_v53 = vpop.f32.mrb[3].mxu0  ;;  %v2764_v54 = vpop.f32.mrb[3].mxu1 }
 0x242   : > { %v2741_v55 = vadd.f32 %v2740_v53, %v2739_v51  ;;  %vm940_vm0 = vcmp.ge.f32.partialorder %v862_v50, 0.0  ;;  %v956_v56 = vmul.f32 0.01, %v862_v50  ;;  %v4438_v57 = vadd.f32 %v2764_v54, %v2763_v52 }
 0x244   : > { %v867_v58 = vadd.f32 %v2741_v55, %v4433_v45  ;;  %v2742_v59 = vpop.f32.mrb[4].mxu0  ;;  %v972_v60 = vsel %vm940_vm0, %v862_v50, %v956_v56  ;;  %v2766_v61 = vpop.f32.mrb[4].mxu1  ;;  %v902_v55 = vadd.f32 %v4435_v49, %v4433_v45  ;;  %v3220_v56 = vpack.c.bf16 %v1215_v48, %v1214_v47 }
 0x245   : > { %v2743_v0 = vpop.f32.mrb[5].mxu0  ;;  %2944 = vmatprep.mubr.f32.mxu1 %v972_v60  ;;  %v2767_v1 = vpop.f32.mrb[5].mxu1 }
 0x246   : > { %vm941_vm1 = vcmp.ge.f32.partialorder %v867_v58, 0.0  ;;  %v957_v2 = vmul.f32 0.01, %v867_v58  ;;  %v2744_v3 = vadd.f32 %v2743_v0, %v2742_v59  ;;  %v4441_v4 = vadd.f32 %v2767_v1, %v2766_v61 }
 0x247   : > { %v907_v1 = vadd.f32 %v4438_v57, %v4433_v45  ;;  %vm948_vm7 = vcmp.ge.f32.partialorder %v902_v55, 0.0 }
 0x248   : > { %v872_v6 = vadd.f32 %v2744_v3, %v4433_v45  ;;  %v2745_v7 = vpop.f32.mrb[6].mxu0  ;;  %v973_v8 = vsel %vm941_vm1, %v867_v58, %v957_v2  ;;  %v2769_v9 = vpop.f32.mrb[6].mxu1  ;;  %v912_v49 = vadd.f32 %v4441_v4, %v4433_v45 }
 0x249   : > { %v2746_v12 = vpop.f32.mrb[7].mxu0  ;;  %2945 = vmatmul.mubr.f32.vlgmr.msra.gmra.mrb[16].mxu1 %v973_v8  ;;  %v2770_v13 = vpop.f32.mrb[7].mxu1  ;;  %v3224_v8 = vpack.c.bf16 %v1217_v63, %v1216_v62  ;;  %vm949_vm9 = vcmp.ge.f32.partialorder %v907_v1, 0.0  ;;  %v1436_v63 = vld [vmem:[#allocation11 + $0x80] sm:$0xff] }
 0x24a   : > { %v2747_v14 = vadd.f32 %v2746_v12, %v2745_v7  ;;  %vm942_vm2 = vcmp.ge.f32.partialorder %v872_v6, 0.0  ;;  %v958_v15 = vmul.f32 0.01, %v872_v6  ;;  %v4444_v16 = vadd.f32 %v2770_v13, %v2769_v9  ;;  %3203 = vmatpush3.bf16.msra.mxu1 %v3200_v42 }
 0x24b   : > { %3205 = vmatprep.subr.bf16.mxu1 %v3204_v5  ;;  %v964_v7 = vmul.f32 0.01, %v902_v55  ;;  %v965_v12 = vmul.f32 0.01, %v907_v1  ;;  %v966_v4 = vmul.f32 0.01, %v912_v49 }
 0x24c   : > { %v877_v18 = vadd.f32 %v2747_v14, %v4433_v45  ;;  %v2748_v19 = vpop.f32.mrb[8].mxu0  ;;  %v974_v20 = vsel %vm942_vm2, %v872_v6, %v958_v15  ;;  %v2772_v21 = vpop.f32.mrb[8].mxu1  ;;  %v917_v57 = vadd.f32 %v4444_v16, %v4433_v45  ;;  %vm950_vm10 = vcmp.ge.f32.partialorder %v912_v49, 0.0 }
 0x24d   : > { %v2749_v24 = vpop.f32.mrb[9].mxu0  ;;  %2947 = vmatprep.mubr.f32.mxu1 %v974_v20  ;;  %v2773_v25 = vpop.f32.mrb[9].mxu1  ;;  %v980_v13 = vsel %vm948_vm7, %v902_v55, %v964_v7  ;;  %v982_v16 = vsel %vm950_vm10, %v912_v49, %v966_v4  ;;  %v1442_v49 = vld [vmem:[#allocation11 + $0xb0] sm:$0xff]  ;;  %v1445_v7 = vld [vmem:[#allocation11 + $0xc8] sm:$0xff] }
 0x24e   : > { %v2750_v26 = vadd.f32 %v2749_v24, %v2748_v19  ;;  %vm943_vm3 = vcmp.ge.f32.partialorder %v877_v18, 0.0  ;;  %v959_v27 = vmul.f32 0.01, %v877_v18  ;;  %v4447_v28 = vadd.f32 %v2773_v25, %v2772_v21  ;;  %3207 = vmatpush3.bf16.msra.mxu1 %v3204_v5 }
 0x24f   : > { %3209 = vmatprep.subr.bf16.mxu1 %v3208_v17  ;;  %v967_v19 = vmul.f32 0.01, %v917_v57  ;;  %vm951_vm11 = vcmp.ge.f32.partialorder %v917_v57, 0.0 }
 0x250   : > { %v882_v30 = vadd.f32 %v2750_v26, %v4433_v45  ;;  %v2751_v31 = vpop.f32.mrb[10].mxu0  ;;  %v975_v32 = vsel %vm943_vm3, %v877_v18, %v959_v27  ;;  %v2775_v33 = vpop.f32.mrb[10].mxu1  ;;  %v922_v14 = vadd.f32 %v4447_v28, %v4433_v45 }
 0x251   : > { %v2752_v36 = vpop.f32.mrb[11].mxu0  ;;  %2948 = vmatmul.mubr.f32.gmra.mrb[18].mxu1 %v975_v32  ;;  %v2776_v37 = vpop.f32.mrb[11].mxu1  ;;  %v983_v22 = vsel %vm951_vm11, %v917_v57, %v967_v19  ;;  %v1219_v32 = vld [vmem:[#allocation10 + $0x78] sm:$0xff]  ;;  %v1444_v57 = vld [vmem:[#allocation11 + $0xc0] sm:$0xff] }
 0x252   : > { %v2753_v38 = vadd.f32 %v2752_v36, %v2751_v31  ;;  %vm944_vm4 = vcmp.ge.f32.partialorder %v882_v30, 0.0  ;;  %v960_v39 = vmul.f32 0.01, %v882_v30  ;;  %v2777_v40 = vadd.f32 %v2776_v37, %v2775_v33  ;;  %3211 = vmatpush3.bf16.msra.mxu1 %v3208_v17  ;;  %v1218_v31 = vld [vmem:[#allocation10 + $0x70] sm:$0xff] }
 0x253   : > { %3213 = vmatprep.subr.bf16.mxu1 %v3212_v29  ;;  %v981_v17 = vsel %vm949_vm9, %v907_v1, %v965_v12  ;;  %v968_v21 = vmul.f32 0.01, %v922_v14  ;;  %vm952_vm12 = vcmp.ge.f32.partialorder %v922_v14, 0.0  ;;  %v3228_v33 = vpack.c.bf16 %v1219_v32, %v1218_v31  ;;  %v1422_v37 = vld [vmem:[#allocation11 + $0x10] sm:$0xff]  ;;  %v1441_v1 = vld [vmem:[#allocation11 + $0xa8] sm:$0xff] }
 0x254   : > { %v887_v42 = vadd.f32 %v2753_v38, %v4433_v45  ;;  %v2754_v43 = vpop.f32.mrb[12].mxu0  ;;  %v976_v44 = vsel %vm944_vm4, %v882_v30, %v960_v39  ;;  %v2778_v46 = vpop.f32.mrb[12].mxu1  ;;  %v927_v18 = vadd.f32 %v2777_v40, %v4433_v45  ;;  %v1425_v38 = vld [vmem:[#allocation11 + $0x28] sm:$0xff]  ;;  %v1427_v39 = vld [vmem:[#allocation11 + $0x38] sm:$0xff]  ;;  %v3234_v40 = vpack.c.bf16 %v1422_v37, %v1420_v35 }
 0x255   : > { %v2755_v50 = vpop.f32.mrb[13].mxu0  ;;  %2950 = vmatprep.mubr.f32.mxu1 %v976_v44  ;;  %v2779_v51 = vpop.f32.mrb[13].mxu1  ;;  %v984_v25 = vsel %vm952_vm12, %v922_v14, %v968_v21  ;;  %v1429_v44 = vld [vmem:[#allocation11 + $0x48] sm:$0xff] }
 0x256   : > { %v2756_v52 = vadd.f32 %v2755_v50, %v2754_v43  ;;  %vm945_vm5 = vcmp.ge.f32.partialorder %v887_v42, 0.0  ;;  %v961_v53 = vmul.f32 0.01, %v887_v42  ;;  %v2780_v54 = vadd.f32 %v2779_v51, %v2778_v46  ;;  %3215 = vmatpush3.bf16.msra.mxu1 %v3212_v29  ;;  %v1426_v43 = vld [vmem:[#allocation11 + $0x30] sm:$0xff]  ;;  %v1431_v46 = vld [vmem:[#allocation11 + $0x58] sm:$0xff]  ;;  %v1428_v50 = vld [vmem:[#allocation11 + $0x40] sm:$0xff] }
 0x257   : > { %3217 = vmatprep.subr.bf16.mxu1 %v3216_v41  ;;  %v969_v24 = vmul.f32 0.01, %v927_v18  ;;  %vm953_vm13 = vcmp.ge.f32.partialorder %v927_v18, 0.0  ;;  %v3240_v48 = vpack.c.bf16 %v1431_v46, %v1429_v44  ;;  %v1430_v51 = vld [vmem:[#allocation11 + $0x50] sm:$0xff] }
 0x258   : > { %v892_v58 = vadd.f32 %v2756_v52, %v4433_v45  ;;  %v2757_v59 = vpop.f32.mrb[14].mxu0  ;;  %v977_v60 = vsel %vm945_vm5, %v887_v42, %v961_v53  ;;  %v2781_v61 = vpop.f32.mrb[14].mxu1  ;;  %v932_v20 = vadd.f32 %v2780_v54, %v4433_v45  ;;  %v1424_v42 = vld [vmem:[#allocation11 + $0x20] sm:$0xff]  ;;  %v1433_v52 = vld [vmem:[#allocation11 + $0x68] sm:$0xff]  ;;  %v1435_v53 = vld [vmem:[#allocation11 + $0x78] sm:$0xff]  ;;  %v3242_v54 = vpack.c.bf16 %v1430_v51, %v1428_v50 }
 0x259   : > { %v2758_v0 = vpop.f32.mrb[15].mxu0  ;;  %2951 = vmatmul.mubr.f32.gmra.mrb[20].mxu1 %v977_v60  ;;  %v2782_v2 = vpop.f32.mrb[15].mxu1  ;;  %v985_v27 = vsel %vm953_vm13, %v927_v18, %v969_v24  ;;  %v3238_v47 = vpack.c.bf16 %v1426_v43, %v1424_v42  ;;  %v3244_v55 = vpack.c.bf16 %v1435_v53, %v1433_v52  ;;  %v1439_v60 = vld [vmem:[#allocation11 + $0x98] sm:$0xff] }
 0x25a   : > { %v2759_v3 = vadd.f32 %v2758_v0, %v2757_v59  ;;  %vm946_vm6 = vcmp.ge.f32.partialorder %v892_v58, 0.0  ;;  %v962_v5 = vmul.f32 0.01, %v892_v58  ;;  %v2783_v6 = vadd.f32 %v2782_v2, %v2781_v61  ;;  %3219 = vmatpush3.bf16.msra.mxu1 %v3216_v41  ;;  %v1437_v59 = vld [vmem:[#allocation11 + $0x88] sm:$0xff]  ;;  %v1438_v0 = vld [vmem:[#allocation11 + $0x90] sm:$0xff]  ;;  %v1443_v2 = vld [vmem:[#allocation11 + $0xb8] sm:$0xff] }
 0x25b   : > { %3221 = vmatprep.subr.bf16.mxu1 %v3220_v56  ;;  %v970_v26 = vmul.f32 0.01, %v932_v20  ;;  %vm954_vm14 = vcmp.ge.f32.partialorder %v932_v20, 0.0  ;;  %v3236_v41 = vpack.c.bf16 %v1427_v39, %v1425_v38  ;;  %v3248_v62 = vpack.c.bf16 %v1439_v60, %v1437_v59 }
 0x25c   : > { %v897_v9 = vadd.f32 %v2759_v3, %v4433_v45  ;;  %v978_v10 = vsel %vm946_vm6, %v892_v58, %v962_v5  ;;  %v937_v23 = vadd.f32 %v2783_v6, %v4433_v45  ;;  %v1421_v45 = vld [vmem:[#allocation11 + $0x8] sm:$0xff]  ;;  %v1434_v58 = vld [vmem:[#allocation11 + $0x70] sm:$0xff]  ;;  %v3250_v3 = vpack.c.bf16 %v1438_v0, %v1436_v63  ;;  %v1440_v6 = vld [vmem:[#allocation11 + $0xa0] sm:$0xff] }
 0x25d   : > { %2953 = vmatprep.mubr.f32.mxu1 %v978_v10  ;;  %v986_v29 = vsel %vm954_vm14, %v932_v20, %v970_v26  ;;  %v3232_v36 = vpack.c.bf16 %v1423_v34, %v1421_v45  ;;  %v3252_v5 = vpack.c.bf16 %v1443_v2, %v1441_v1 }
 0x25e   : > { %vm947_vm8 = vcmp.ge.f32.partialorder %v897_v9, 0.0  ;;  %v963_v11 = vmul.f32 0.01, %v897_v9  ;;  %3223 = vmatpush3.bf16.msra.mxu1 %v3220_v56  ;;  %v971_v28 = vmul.f32 0.01, %v937_v23  ;;  %vm955_vm15 = vcmp.ge.f32.partialorder %v937_v23, 0.0 }
 0x25f   : > { %3225 = vmatprep.subr.bf16.mxu1 %v3224_v8  ;;  %3233 = vmatprep.subr.bf16.mxu0 %v3232_v36  ;;  %v1432_v56 = vld [vmem:[#allocation11 + $0x60] sm:$0xff] }
 0x260   : > { %v979_v15 = vsel %vm947_vm8, %v897_v9, %v963_v11  ;;  %v987_v30 = vsel %vm955_vm15, %v937_v23, %v971_v28  ;;  %3235 = vmatpush1.bf16.msra.mxu0 %v3234_v40  ;;  %v3246_v61 = vpack.c.bf16 %v1434_v58, %v1432_v56  ;;  %v3254_v9 = vpack.c.bf16 %v1442_v49, %v1440_v6  ;;  %v1446_v11 = vld [vmem:[#allocation11 + $0xd0] sm:$0xff] }
 0x261   : > { %2954 = vmatmul.mubr.f32.gmra.mrb[22].mxu1 %v979_v15  ;;  %3237 = vmatprep.subr.bf16.mxu0 %v3236_v41  ;;  %v3258_v12 = vpack.c.bf16 %v1446_v11, %v1444_v57 }
 0x262   : > { %2956 = vmatprep.mubr.f32.mxu1 %v980_v13  ;;  %3227 = vmatpush3.bf16.msra.mxu1 %v3224_v8  ;;  %v1447_v8 = vld [vmem:[#allocation11 + $0xd8] sm:$0xff]  ;;  %v4469_v13 = vld [vmem:[%s4904_s5] ss:$0 sm:$0xff] }
 0x263   : > { %3229 = vmatprep.subr.bf16.mxu1 %v3228_v33  ;;  %v3256_v10 = vpack.c.bf16 %v1447_v8, %v1445_v7 }
 0x264   : > { %3239 = vmatpush1.bf16.msra.mxu0 %v3238_v47 }
 0x265   : > { %2957 = vmatmul.mubr.f32.gmra.mrb[24].mxu1 %v981_v17  ;;  %3241 = vmatprep.subr.bf16.mxu0 %v3240_v48 }
 0x266   : > { %2959 = vmatprep.mubr.f32.mxu1 %v982_v16  ;;  %3231 = vmatpush3.bf16.msra.mxu1 %v3228_v33 }
 0x268   : > { %3243 = vmatpush1.bf16.msra.mxu0 %v3242_v54 }
 0x269   : > { %2960 = vmatmul.mubr.f32.gmra.mrb[26].mxu1 %v983_v22  ;;  %3245 = vmatprep.subr.bf16.mxu0 %v3244_v55 }
 0x26a   : > { %2962 = vmatprep.mubr.f32.mxu1 %v984_v25 }
 0x26c   : > { %3247 = vmatpush1.bf16.msra.mxu0 %v3246_v61 }
 0x26d   : > { %2963 = vmatmul.mubr.f32.gmra.mrb[28].mxu1 %v985_v27  ;;  %3249 = vmatprep.subr.bf16.mxu0 %v3248_v62 }
 0x26e   : > { %2965 = vmatprep.mubr.f32.mxu1 %v986_v29 }
 0x270   : > { %3251 = vmatpush1.bf16.msra.mxu0 %v3250_v3 }
 0x271   : > { %2966 = vmatmul.mubr.f32.gmra.mrb[30].mxu1 %v987_v30  ;;  %3253 = vmatprep.subr.bf16.mxu0 %v3252_v5 }
 0x274   : > { %3255 = vmatpush1.bf16.msra.mxu0 %v3254_v9 }
 0x275   : > { %3257 = vmatprep.subr.bf16.mxu0 %v3256_v10 }
 0x278   : > { %3259 = vmatpush1.bf16.msra.mxu0 %v3258_v12 }
 0x31c   : > { %v2946_v14 = vpop.f32.mrb[16].mxu1 }
 0x31d   : > { %v1083_v4 = vadd.f32 %v2946_v14, %v4469_v13  ;;  %v1077_v15 = vpop.f32.mrb[17].mxu1 }
 0x31e   : > { %v1078_v17 = vadd.f32 %v4469_v13, %v1077_v15  ;;  %v1451_v15 = vld [vmem:[#allocation11 + $0xf8] sm:$0xff] }
 0x31f   : > { %v1173_v18 = vmul.f32 0.01, %v1083_v4  ;;  %vm1157_vm0 = vcmp.ge.f32.partialorder %v1083_v4, 0.0 }
 0x320   : > { %v1172_v19 = vmul.f32 0.01, %v1078_v17  ;;  %vm1156_vm1 = vcmp.ge.f32.partialorder %v1078_v17, 0.0 }
 0x321   : > { %v1189_v20 = vsel %vm1157_vm0, %v1083_v4, %v1173_v18  ;;  %v1449_v4 = vld [vmem:[#allocation11 + $0xe8] sm:$0xff]  ;;  %v1448_v18 = vld [vmem:[#allocation11 + $0xe0] sm:$0xff] }
 0x322   : > { %v1188_v16 = vsel %vm1156_vm1, %v1078_v17, %v1172_v19  ;;  %v3260_v17 = vpack.c.bf16 %v1451_v15, %v1449_v4  ;;  %v1450_v19 = vld [vmem:[#allocation11 + $0xf0] sm:$0xff] }
 0x323   : > { %3000 = vmatprep.mubr.f32.mxu1 %v1188_v16  ;;  %v3262_v16 = vpack.c.bf16 %v1450_v19, %v1448_v18 }
 0x324   : > { %v2949_v21 = vpop.f32.mrb[18].mxu1  ;;  %3001 = vmatmul.mubr.f32.vlgmr.msra.gmra.mrb[32].mxu1 %v1189_v20  ;;  %3261 = vmatprep.subr.bf16.mxu0 %v3260_v17  ;;  %v3931_v20 = vmov 0.0  }
 0x325   : > { %v1093_v22 = vadd.f32 %v2949_v21, %v4469_v13  ;;  %v1087_v23 = vpop.f32.mrb[19].mxu1  ;;  %3263 = vmatpush1.bf16.msra.mxu0 %v3262_v16  ;;  %1528 = vmatprep.mubr.f32.mxu0 %v3931_v20  ;;  %v1722_v21 = vld [vmem:[#allocation13 + $0x8] sm:$0xff] }
 0x326   : > { %v1088_v24 = vadd.f32 %v4469_v13, %v1087_v23 }
 0x327   : > { %v1175_v25 = vmul.f32 0.01, %v1093_v22  ;;  %vm1159_vm3 = vcmp.ge.f32.partialorder %v1093_v22, 0.0 }
 0x328   : > { %v1174_v26 = vmul.f32 0.01, %v1088_v24  ;;  %vm1158_vm2 = vcmp.ge.f32.partialorder %v1088_v24, 0.0 }
 0x329   : > { %v1191_v28 = vsel %vm1159_vm3, %v1093_v22, %v1175_v25  ;;  %v1723_v22 = vld [vmem:[#allocation13 + $0x10] sm:$0xff] }
 0x32a   : > { %v1190_v27 = vsel %vm1158_vm2, %v1088_v24, %v1174_v26  ;;  %v1724_v24 = vld [vmem:[#allocation13 + $0x18] sm:$0xff]  ;;  %v4491_v26 = vld [vmem:[%s4982_s20] ss:$0 sm:$0xff]  ;;  %s3932_s20 = smov [#allocation17]  }
 0x32b   : > { %3003 = vmatprep.mubr.f32.mxu1 %v1190_v27  ;;  %v3268_v25 = vpack.c.bf16 %v1724_v24, %v1723_v22  ;;  %s3802_s2 = sshll.u32 %s3932_s20, 4  ;;  %s3803_s2 = int_to_ptr.vmem [resolvable:$false] %s3802_s2 }
 0x32c   : > { %v2952_v29 = vpop.f32.mrb[20].mxu1  ;;  %3004 = vmatmul.mubr.f32.gmra.mrb[34].mxu1 %v1191_v28  ;;  %s3804_s4 = scalar_lea.vmem %s3803_s2, 8192 }
 0x32d   : > { %v1103_v30 = vadd.f32 %v2952_v29, %v4469_v13  ;;  %v1097_v31 = vpop.f32.mrb[21].mxu1 }
 0x32e   : > { %v1098_v32 = vadd.f32 %v4469_v13, %v1097_v31 }
 0x32f   : > { %v1177_v33 = vmul.f32 0.01, %v1103_v30  ;;  %vm1161_vm5 = vcmp.ge.f32.partialorder %v1103_v30, 0.0 }
 0x330   : > { %v1176_v45 = vmul.f32 0.01, %v1098_v32  ;;  %vm1160_vm4 = vcmp.ge.f32.partialorder %v1098_v32, 0.0 }
 0x331   : > { %v1193_v35 = vsel %vm1161_vm5, %v1103_v30, %v1177_v33 }
 0x332   : > { %v1192_v34 = vsel %vm1160_vm4, %v1098_v32, %v1176_v45 }
 0x333   : > { %3006 = vmatprep.mubr.f32.mxu1 %v1192_v34 }
 0x334   : > { %v2955_v36 = vpop.f32.mrb[22].mxu1  ;;  %3007 = vmatmul.mubr.f32.gmra.mrb[36].mxu1 %v1193_v35 }
 0x335   : > { %v1113_v37 = vadd.f32 %v2955_v36, %v4469_v13  ;;  %v1107_v38 = vpop.f32.mrb[23].mxu1 }
 0x336   : > { %v1108_v39 = vadd.f32 %v4469_v13, %v1107_v38 }
 0x337   : > { %v1179_v40 = vmul.f32 0.01, %v1113_v37  ;;  %vm1163_vm7 = vcmp.ge.f32.partialorder %v1113_v37, 0.0 }
 0x338   : > { %v1178_v41 = vmul.f32 0.01, %v1108_v39  ;;  %v2958_v42 = vpop.f32.mrb[24].mxu1  ;;  %vm1162_vm6 = vcmp.ge.f32.partialorder %v1108_v39, 0.0 }
 0x339   : > { %v1123_v43 = vadd.f32 %v2958_v42, %v4469_v13  ;;  %v1117_v44 = vpop.f32.mrb[25].mxu1  ;;  %v1195_v50 = vsel %vm1163_vm7, %v1113_v37, %v1179_v40 }
 0x33a   : > { %v1118_v46 = vadd.f32 %v4469_v13, %v1117_v44  ;;  %v1194_v47 = vsel %vm1162_vm6, %v1108_v39, %v1178_v41 }
 0x33b   : > { %v1181_v48 = vmul.f32 0.01, %v1123_v43  ;;  %3009 = vmatprep.mubr.f32.mxu1 %v1194_v47  ;;  %vm1165_vm9 = vcmp.ge.f32.partialorder %v1123_v43, 0.0 }
 0x33c   : > { %v1180_v51 = vmul.f32 0.01, %v1118_v46  ;;  %v2961_v52 = vpop.f32.mrb[26].mxu1  ;;  %3010 = vmatmul.mubr.f32.gmra.mrb[38].mxu1 %v1195_v50  ;;  %vm1164_vm8 = vcmp.ge.f32.partialorder %v1118_v46, 0.0 }
 0x33d   : > { %v1133_v53 = vadd.f32 %v2961_v52, %v4469_v13  ;;  %v1127_v54 = vpop.f32.mrb[27].mxu1  ;;  %v1197_v59 = vsel %vm1165_vm9, %v1123_v43, %v1181_v48 }
 0x33e   : > { %v1128_v55 = vadd.f32 %v4469_v13, %v1127_v54  ;;  %v1196_v56 = vsel %vm1164_vm8, %v1118_v46, %v1180_v51 }
 0x33f   : > { %v1183_v58 = vmul.f32 0.01, %v1133_v53  ;;  %3012 = vmatprep.mubr.f32.mxu1 %v1196_v56  ;;  %vm1167_vm10 = vcmp.ge.f32.partialorder %v1133_v53, 0.0 }
 0x340   : > { %v1182_v60 = vmul.f32 0.01, %v1128_v55  ;;  %3013 = vmatmul.mubr.f32.gmra.mrb[40].mxu1 %v1197_v59  ;;  %v2964_v61 = vpop.f32.mrb[28].mxu1  ;;  %vm1166_vm11 = vcmp.ge.f32.partialorder %v1128_v55, 0.0 }
 0x341   : > { %v1143_v62 = vadd.f32 %v2964_v61, %v4469_v13  ;;  %v1137_v63 = vpop.f32.mrb[29].mxu1  ;;  %v1199_v0 = vsel %vm1167_vm10, %v1133_v53, %v1183_v58 }
 0x342   : > { %v1138_v1 = vadd.f32 %v4469_v13, %v1137_v63  ;;  %v1198_v2 = vsel %vm1166_vm11, %v1128_v55, %v1182_v60 }
 0x343   : > { %v1185_v3 = vmul.f32 0.01, %v1143_v62  ;;  %3015 = vmatprep.mubr.f32.mxu1 %v1198_v2  ;;  %vm1169_vm12 = vcmp.ge.f32.partialorder %v1143_v62, 0.0 }
 0x344   : > { %v1184_v5 = vmul.f32 0.01, %v1138_v1  ;;  %3016 = vmatmul.mubr.f32.gmra.mrb[42].mxu1 %v1199_v0  ;;  %vm1168_vm13 = vcmp.ge.f32.partialorder %v1138_v1, 0.0  ;;  %v2967_v6 = vpop.f32.mrb[30].mxu1 }
 0x345   : > { %v1153_v49 = vadd.f32 %v2967_v6, %v4469_v13  ;;  %v1201_v7 = vsel %vm1169_vm12, %v1143_v62, %v1185_v3  ;;  %v1147_v8 = vpop.f32.mrb[31].mxu1 }
 0x346   : > { %v1200_v9 = vsel %vm1168_vm13, %v1138_v1, %v1184_v5  ;;  %v1148_v10 = vadd.f32 %v4469_v13, %v1147_v8  ;;  %v1721_v13 = vld [vmem:[#allocation13] sm:$0xff] }
 0x347   : > { %3018 = vmatprep.mubr.f32.mxu1 %v1200_v9  ;;  %v1187_v57 = vmul.f32 0.01, %v1153_v49  ;;  %vm1171_vm14 = vcmp.ge.f32.partialorder %v1153_v49, 0.0  ;;  %v3264_v23 = vpack.c.bf16 %v1722_v21, %v1721_v13 }
 0x348   : > { %3019 = vmatmul.mubr.f32.gmra.mrb[44].mxu1 %v1201_v7  ;;  %v1186_v11 = vmul.f32 0.01, %v1148_v10  ;;  %vm1170_vm15 = vcmp.ge.f32.partialorder %v1148_v10, 0.0 }
 0x349   : > { %v1203_v12 = vsel %vm1171_vm14, %v1153_v49, %v1187_v57  ;;  %3265 = vmatprep.subr.bf16.mxu1 %v3264_v23 }
 0x34a   : > { %v1202_v14 = vsel %vm1170_vm15, %v1148_v10, %v1186_v11  ;;  %3267 = vmatpush3.bf16.msra.mxu1 %v3264_v23 }
 0x34b   : > { %3021 = vmatprep.mubr.f32.mxu1 %v1202_v14  ;;  %3269 = vmatprep.subr.bf16.mxu1 %v3268_v25 }
 0x34c   : > { %3022 = vmatmul.mubr.f32.gmra.mrb[46].mxu1 %v1203_v12 }
 0x34e   : > { %3271 = vmatpush3.bf16.msra.mxu1 %v3268_v25 }
 0x3f7   : > { %v3002_v27 = vpop.f32.mrb[32].mxu1 }
 0x3f8   : > { %v1293_v28 = vpop.f32.mrb[33].mxu1  ;;  %v1299_v29 = vadd.f32 %v3002_v27, %v4491_v26 }
 0x3f9   : > { %v1294_v30 = vadd.f32 %v4491_v26, %v1293_v28 }
 0x3fa   : > { %v1389_v32 = vmul.f32 0.01, %v1299_v29  ;;  %vm1373_vm1 = vcmp.ge.f32.partialorder %v1299_v29, 0.0 }
 0x3fb   : > { %vm1372_vm0 = vcmp.ge.f32.partialorder %v1294_v30, 0.0  ;;  %v1388_v31 = vmul.f32 0.01, %v1294_v30 }
 0x3fc   : > { %v1405_v37 = vsel %vm1373_vm1, %v1299_v29, %v1389_v32  ;;  %v1725_v29 = vld [vmem:[#allocation13 + $0x20] sm:$0xff]  ;;  %v1728_v32 = vld [vmem:[#allocation13 + $0x38] sm:$0xff] }
 0x3fd   : > { %v1404_v33 = vsel %vm1372_vm0, %v1294_v30, %v1388_v31  ;;  %v1726_v30 = vld [vmem:[#allocation13 + $0x28] sm:$0xff] }
 0x3fe   : > { %1529 = vmatmul.mubr.f32.vlgmr.msra.gmra.mrb[16].mxu0 %v1404_v33  ;;  %v3272_v31 = vpack.c.bf16 %v1726_v30, %v1725_v29 }
 0x3ff   : > { %v3005_v45 = vpop.f32.mrb[34].mxu1  ;;  %1534 = vmatprep.mubr.f32.mxu0 %v3931_v20 }
 0x400   : > { %v1303_v34 = vpop.f32.mrb[35].mxu1  ;;  %v1309_v35 = vadd.f32 %v3005_v45, %v4491_v26  ;;  %3273 = vmatprep.subr.bf16.mxu1 %v3272_v31  ;;  %v1729_v45 = vld [vmem:[#allocation13 + $0x40] sm:$0xff] }
 0x401   : > { %v1304_v36 = vadd.f32 %v4491_v26, %v1303_v34  ;;  %3275 = vmatpush3.bf16.msra.mxu1 %v3272_v31  ;;  %v1730_v34 = vld [vmem:[#allocation13 + $0x48] sm:$0xff] }
 0x402   : > { %1535 = vmatmul.mubr.f32.gmra.mrb[18].mxu0 %v1405_v37  ;;  %v1391_v39 = vmul.f32 0.01, %v1309_v35  ;;  %vm1375_vm3 = vcmp.ge.f32.partialorder %v1309_v35, 0.0  ;;  %v1732_v37 = vld [vmem:[#allocation13 + $0x58] sm:$0xff] }
 0x403   : > { %v1390_v38 = vmul.f32 0.01, %v1304_v36  ;;  %1540 = vmatprep.mubr.f32.mxu0 %v3931_v20  ;;  %vm1374_vm2 = vcmp.ge.f32.partialorder %v1304_v36, 0.0 }
 0x404   : > { %v1407_v46 = vsel %vm1375_vm3, %v1309_v35, %v1391_v39  ;;  %v3280_v35 = vpack.c.bf16 %v1730_v34, %v1729_v45  ;;  %v1733_v39 = vld [vmem:[#allocation13 + $0x60] sm:$0xff]  ;;  %v1940_v45 = vld [vmem:[#allocation14 + $0x18] sm:$0xff] }
 0x405   : > { %v1406_v40 = vsel %vm1374_vm2, %v1304_v36, %v1390_v38  ;;  %v1731_v36 = vld [vmem:[#allocation13 + $0x50] sm:$0xff] }
 0x406   : > { %1541 = vmatmul.mubr.f32.gmra.mrb[20].mxu0 %v1406_v40  ;;  %v3284_v38 = vpack.c.bf16 %v1732_v37, %v1731_v36  ;;  %v1734_v40 = vld [vmem:[#allocation13 + $0x68] sm:$0xff]  ;;  %v1627_v37 = vld [vmem:[%s4376_s16 + $0x10] sm:$0xff] }
 0x407   : > { %v3008_v41 = vpop.f32.mrb[36].mxu1  ;;  %1546 = vmatprep.mubr.f32.mxu0 %v3931_v20 }
 0x408   : > { %v1313_v42 = vpop.f32.mrb[37].mxu1  ;;  %v1319_v43 = vadd.f32 %v3008_v41, %v4491_v26  ;;  %v3288_v41 = vpack.c.bf16 %v1734_v40, %v1733_v39 }
 0x409   : > { %v1314_v44 = vadd.f32 %v4491_v26, %v1313_v42  ;;  %v1735_v42 = vld [vmem:[#allocation13 + $0x70] sm:$0xff] }
 0x40a   : > { %1547 = vmatmul.mubr.f32.gmra.mrb[22].mxu0 %v1407_v46  ;;  %v1393_v48 = vmul.f32 0.01, %v1319_v43  ;;  %vm1377_vm5 = vcmp.ge.f32.partialorder %v1319_v43, 0.0  ;;  %v1937_v46 = vld [vmem:[#allocation14] sm:$0xff] }
 0x40b   : > { %v1392_v47 = vmul.f32 0.01, %v1314_v44  ;;  %1552 = vmatprep.mubr.f32.mxu0 %v3931_v20  ;;  %vm1376_vm4 = vcmp.ge.f32.partialorder %v1314_v44, 0.0 }
 0x40c   : > { %v1409_v55 = vsel %vm1377_vm5, %v1319_v43, %v1393_v48  ;;  %v1736_v43 = vld [vmem:[#allocation13 + $0x78] sm:$0xff] }
 0x40d   : > { %v1408_v50 = vsel %vm1376_vm4, %v1314_v44, %v1392_v47  ;;  %v3292_v44 = vpack.c.bf16 %v1736_v43, %v1735_v42  ;;  %v1938_v47 = vld [vmem:[#allocation14 + $0x8] sm:$0xff] }
 0x40e   : > { %1553 = vmatmul.mubr.f32.gmra.mrb[24].mxu0 %v1408_v50  ;;  %v4525_v48 = vpack.c.bf16 %v1938_v47, %v1937_v46  ;;  %v1454_v50 = vlaneseq  ;;  %v1941_v46 = vld [vmem:[#allocation14 + $0x20] sm:$0xff]  ;;  %v1942_v47 = vld [vmem:[#allocation14 + $0x28] sm:$0xff] }
 0x40f   : > { %v3011_v51 = vpop.f32.mrb[38].mxu1  ;;  %1558 = vmatprep.mubr.f32.mxu0 %v3931_v20 }
 0x410   : > { %v1323_v52 = vpop.f32.mrb[39].mxu1  ;;  %v1329_v53 = vadd.f32 %v3011_v51, %v4491_v26  ;;  %v4528_v51 = vshrl.u32 %v1454_v50, 7 }
 0x411   : > { %v1324_v54 = vadd.f32 %v4491_v26, %v1323_v52 }
 0x412   : > { %1559 = vmatmul.mubr.f32.gmra.mrb[26].mxu0 %v1409_v55  ;;  %v1395_v60 = vmul.f32 0.01, %v1329_v53  ;;  %vm1379_vm7 = vcmp.ge.f32.partialorder %v1329_v53, 0.0  ;;  %v1456_v52 = vsub.s32 0, %v4528_v51 }
 0x413   : > { %v1394_v56 = vmul.f32 0.01, %v1324_v54  ;;  %v3014_v58 = vpop.f32.mrb[40].mxu1  ;;  %1564 = vmatprep.mubr.f32.mxu0 %v3931_v20  ;;  %vm1378_vm6 = vcmp.ge.f32.partialorder %v1324_v54, 0.0 }
 0x414   : > { %v1333_v59 = vpop.f32.mrb[41].mxu1  ;;  %v1339_v1 = vadd.f32 %v3014_v58, %v4491_v26  ;;  %v1411_v3 = vsel %vm1379_vm7, %v1329_v53, %v1395_v60  ;;  %v1452_v53 = vld [vmem:[%s4983_s12] sm:$0x3] }
 0x415   : > { %v1334_v61 = vadd.f32 %v4491_v26, %v1333_v59  ;;  %v1410_v62 = vsel %vm1378_vm6, %v1324_v54, %v1394_v56  ;;  %v1460_v54 = vsub.s32 1, %v4528_v51  ;;  %v4537_v55 = vrot.slane %v1452_v53, %v1456_v52 }
 0x416   : > { %1565 = vmatmul.mubr.f32.gmra.mrb[28].mxu0 %v1410_v62  ;;  %v1397_v49 = vmul.f32 0.01, %v1339_v1  ;;  %vm1381_vm9 = vcmp.ge.f32.partialorder %v1339_v1, 0.0 }
 0x417   : > { %v3017_v63 = vpop.f32.mrb[42].mxu1  ;;  %1570 = vmatprep.mubr.f32.mxu0 %v3931_v20  ;;  %v1396_v2 = vmul.f32 0.01, %v1334_v61  ;;  %vm1380_vm8 = vcmp.ge.f32.partialorder %v1334_v61, 0.0  ;;  %v4541_v56 = vrot.slane %v1452_v53, %v1460_v54 }
 0x418   : > { %v1343_v0 = vpop.f32.mrb[43].mxu1  ;;  %v1349_v57 = vadd.f32 %v3017_v63, %v4491_v26  ;;  %v1413_v12 = vsel %vm1381_vm9, %v1339_v1, %v1397_v49 }
 0x419   : > { %v1344_v7 = vadd.f32 %v4491_v26, %v1343_v0  ;;  %v1412_v8 = vsel %vm1380_vm8, %v1334_v61, %v1396_v2 }
 0x41a   : > { %1571 = vmatmul.mubr.f32.gmra.mrb[30].mxu0 %v1411_v3  ;;  %v1399_v14 = vmul.f32 0.01, %v1349_v57  ;;  %vm1383_vm11 = vcmp.ge.f32.partialorder %v1349_v57, 0.0 }
 0x41b   : > { %v3020_v5 = vpop.f32.mrb[44].mxu1  ;;  %1576 = vmatprep.mubr.f32.mxu0 %v3931_v20  ;;  %v1398_v11 = vmul.f32 0.01, %v1344_v7  ;;  %vm1382_vm10 = vcmp.ge.f32.partialorder %v1344_v7, 0.0 }
 0x41c   : > { %v1353_v6 = vpop.f32.mrb[45].mxu1  ;;  %v1359_v17 = vadd.f32 %v3020_v5, %v4491_v26  ;;  %v1415_v19 = vsel %vm1383_vm11, %v1349_v57, %v1399_v14 }
 0x41d   : > { %v1354_v4 = vadd.f32 %v4491_v26, %v1353_v6  ;;  %v1414_v15 = vsel %vm1382_vm10, %v1344_v7, %v1398_v11 }
 0x41e   : > { %1577 = vmatmul.mubr.f32.gmra.mrb[32].mxu0 %v1412_v8  ;;  %v1401_v16 = vmul.f32 0.01, %v1359_v17  ;;  %vm1385_vm13 = vcmp.ge.f32.partialorder %v1359_v17, 0.0 }
 0x41f   : > { %1582 = vmatprep.mubr.f32.mxu0 %v3931_v20  ;;  %v3023_v9 = vpop.f32.mrb[46].mxu1  ;;  %v1400_v18 = vmul.f32 0.01, %v1354_v4  ;;  %vm1384_vm12 = vcmp.ge.f32.partialorder %v1354_v4, 0.0 }
 0x420   : > { %v1363_v10 = vpop.f32.mrb[47].mxu1  ;;  %v1369_v22 = vadd.f32 %v3023_v9, %v4491_v26  ;;  %v1417_v24 = vsel %vm1385_vm13, %v1359_v17, %v1401_v16 }
 0x421   : > { %v1364_v13 = vadd.f32 %v4491_v26, %v1363_v10  ;;  %v1416_v21 = vsel %vm1384_vm12, %v1354_v4, %v1400_v18  ;;  %v1727_v26 = vld [vmem:[#allocation13 + $0x30] sm:$0xff]  ;;  %v1625_v18 = vld [vmem:[%s4376_s16] sm:$0xff] }
 0x422   : > { %1583 = vmatmul.mubr.f32.gmra.mrb[34].mxu0 %v1413_v12  ;;  %v1403_v25 = vmul.f32 0.01, %v1369_v22  ;;  %vm1387_vm15 = vcmp.ge.f32.partialorder %v1369_v22, 0.0  ;;  %v3276_v33 = vpack.c.bf16 %v1728_v32, %v1727_v26 }
 0x423   : > { %1588 = vmatprep.mubr.f32.mxu0 %v3931_v20  ;;  %v1402_v23 = vmul.f32 0.01, %v1364_v13  ;;  %vm1386_vm14 = vcmp.ge.f32.partialorder %v1364_v13, 0.0 }
 0x424   : > { %v1419_v28 = vsel %vm1387_vm15, %v1369_v22, %v1403_v25  ;;  %3277 = vmatprep.subr.bf16.mxu1 %v3276_v33 }
 0x425   : > { %v1418_v27 = vsel %vm1386_vm14, %v1364_v13, %v1402_v23  ;;  %3279 = vmatpush3.bf16.msra.mxu1 %v3276_v33  ;;  %v1939_v33 = vld [vmem:[#allocation14 + $0x10] sm:$0xff] }
 0x426   : > { %1589 = vmatmul.mubr.f32.gmra.mrb[36].mxu0 %v1414_v15  ;;  %3281 = vmatprep.subr.bf16.mxu1 %v3280_v35 }
 0x427   : > { %1594 = vmatprep.mubr.f32.mxu0 %v3931_v20 }
 0x429   : > { %3283 = vmatpush3.bf16.msra.mxu1 %v3280_v35 }
 0x42a   : > { %1595 = vmatmul.mubr.f32.gmra.mrb[38].mxu0 %v1415_v19  ;;  %3285 = vmatprep.subr.bf16.mxu1 %v3284_v38 }
 0x42b   : > { %1600 = vmatprep.mubr.f32.mxu0 %v3931_v20 }
 0x42d   : > { %3287 = vmatpush3.bf16.msra.mxu1 %v3284_v38 }
 0x42e   : > { %1601 = vmatmul.mubr.f32.gmra.mrb[40].mxu0 %v1416_v21  ;;  %3289 = vmatprep.subr.bf16.mxu1 %v3288_v41 }
 0x42f   : > { %1606 = vmatprep.mubr.f32.mxu0 %v3931_v20 }
 0x431   : > { %3291 = vmatpush3.bf16.msra.mxu1 %v3288_v41  ;;  %v3300_v41 = vpack.c.bf16 %v1940_v45, %v1939_v33  ;;  %v1631_v45 = vld [vmem:[%s4376_s16 + $0x30] sm:$0xff] }
 0x432   : > { %1607 = vmatmul.mubr.f32.gmra.mrb[42].mxu0 %v1417_v24  ;;  %3293 = vmatprep.subr.bf16.mxu1 %v3292_v44 }
 0x433   : > { %1612 = vmatprep.mubr.f32.mxu0 %v3931_v20 }
 0x435   : > { %3295 = vmatpush3.bf16.msra.mxu1 %v3292_v44 }
 0x436   : > { %1613 = vmatmul.mubr.f32.gmra.mrb[44].mxu0 %v1418_v27  ;;  %3297 = vmatprep.subr.bf16.mxu1 %v4525_v48  ;;  %v1626_v27 = vld [vmem:[%s4376_s16 + $0x8] sm:$0xff] }
 0x437   : > { %1618 = vmatprep.mubr.f32.mxu0 %v3931_v20 }
 0x43a   : > { %1619 = vmatmul.mubr.f32.gmra.mrb[46].mxu0 %v1419_v28 }
 0x43b   : > { %2261 = vmatprep.mubr.f32.mxu0 %v3931_v20 }
 0x4d1   : > { %v1530_v58 = vpop.f32.mrb[16].mxu0 }
 0x4d2   : > { %v1531_v59 = vadd.f32 %v1530_v58, %v4537_v55  ;;  %v1532_v60 = vpop.f32.mrb[17].mxu0 }
 0x4d3   : > { %v1533_v61 = vadd.f32 %v1532_v60, %v4541_v56 }
 0x4d4   : > { %2358 = vst [vmem:[%s4546_s29] sm:$0xff] %v1531_v59 }
 0x4d5   : > { %v1641_v62 = vmul.f32 0.5, %v1533_v61  ;;  %2359 = vst [vmem:[%s4546_s29 + $0x8] sm:$0xff] %v1533_v61  ;;  %v1536_v63 = vpop.f32.mrb[18].mxu0 }
 0x4d6   : > { %v1537_v0 = vadd.f32 %v1536_v63, %v4537_v55  ;;  %v1538_v1 = vpop.f32.mrb[19].mxu0  ;;  %v3304_v63 = vpack.c.bf16 %v1942_v47, %v1941_v46  ;;  %v1632_v47 = vld [vmem:[%s4376_s16 + $0x38] sm:$0xff] }
 0x4d7   : > { %v1657_v2 = vmul.f32 1.442695, %v1641_v62  ;;  %v1539_v3 = vadd.f32 %v1538_v1, %v4541_v56 }
 0x4d8   : > { %2360 = vst [vmem:[%s4546_s29 + $0x10] sm:$0xff] %v1537_v0 }
 0x4d9   : > { %3510 = vpow2.f32 %v1657_v2  ;;  %v1642_v5 = vmul.f32 0.5, %v1539_v3  ;;  %2361 = vst [vmem:[%s4546_s29 + $0x18] sm:$0xff] %v1539_v3  ;;  %v1542_v6 = vpop.f32.mrb[20].mxu0  ;;  %v1943_v3 = vld [vmem:[#allocation14 + $0x30] sm:$0xff] }
 0x4da   : > { %v4555_v49 = vadd.f32 %v1542_v6, %v4537_v55  ;;  %v1544_v7 = vpop.f32.mrb[21].mxu0 }
 0x4db   : > { %v1659_v8 = vmul.f32 1.442695, %v1642_v5  ;;  %v1545_v9 = vadd.f32 %v1544_v7, %v4541_v56  ;;  %v1944_v5 = vld [vmem:[#allocation14 + $0x38] sm:$0xff] }
 0x4dc   : > { %2362 = vst [vmem:[%s4546_s29 + $0x20] sm:$0xff] %v4555_v49 }
 0x4dd   : > { %3512 = vpow2.f32 %v1659_v8  ;;  %v1643_v10 = vmul.f32 0.5, %v1545_v9  ;;  %2363 = vst [vmem:[%s4546_s29 + $0x28] sm:$0xff] %v1545_v9  ;;  %v1548_v57 = vpop.f32.mrb[22].mxu0  ;;  %v1629_v8 = vld [vmem:[%s4376_s16 + $0x20] sm:$0xff] }
 0x4de   : > { %v4562_v11 = vadd.f32 %v1548_v57, %v4537_v55  ;;  %v1550_v12 = vpop.f32.mrb[23].mxu0  ;;  %v3308_v57 = vpack.c.bf16 %v1944_v5, %v1943_v3 }
 0x4df   : > { %v1661_v14 = vmul.f32 1.442695, %v1643_v10  ;;  %v1551_v4 = vadd.f32 %v1550_v12, %v4541_v56 }
 0x4e0   : > { %2364 = vst [vmem:[%s4546_s29 + $0x30] sm:$0xff] %v4562_v11 }
 0x4e1   : > { %3514 = vpow2.f32 %v1661_v14  ;;  %v1644_v15 = vmul.f32 0.5, %v1551_v4  ;;  %2365 = vst [vmem:[%s4546_s29 + $0x38] sm:$0xff] %v1551_v4  ;;  %v1554_v17 = vpop.f32.mrb[24].mxu0 }
 0x4e2   : > { %v4570_v19 = vadd.f32 %v1554_v17, %v4537_v55  ;;  %v1556_v16 = vpop.f32.mrb[25].mxu0  ;;  %v1946_v17 = vld [vmem:[#allocation14 + $0x48] sm:$0xff] }
 0x4e3   : > { %v3511_v13 = vpop.eup %3510  ;;  %v1663_v21 = vmul.f32 1.442695, %v1644_v15  ;;  %v1557_v22 = vadd.f32 %v1556_v16, %v4541_v56  ;;  %v1945_v15 = vld [vmem:[#allocation14 + $0x40] sm:$0xff] }
 0x4e4   : > { %2366 = vst [vmem:[%s4546_s29 + $0x40] sm:$0xff] %v4570_v19  ;;  %v1689_v23 = vmul.f32 %v3511_v13, %v1625_v18 }
 0x4e5   : > { %3516 = vpow2.f32 %v1663_v21  ;;  %v1645_v24 = vmul.f32 0.5, %v1557_v22  ;;  %2367 = vst [vmem:[%s4546_s29 + $0x48] sm:$0xff] %v1557_v22  ;;  %v1560_v25 = vpop.f32.mrb[26].mxu0  ;;  %v1630_v21 = vld [vmem:[%s4376_s16 + $0x28] sm:$0xff] }
 0x4e6   : > { %v4578_v28 = vadd.f32 %v1560_v25, %v4537_v55  ;;  %v1562_v29 = vpop.f32.mrb[27].mxu0  ;;  %v1705_v30 = vadd.f32 %v1689_v23, %v1531_v59  ;;  %v1628_v59 = vld [vmem:[%s4376_s16 + $0x18] sm:$0xff] }
 0x4e7   : > { %v3513_v31 = vpop.eup %3512  ;;  %v1665_v26 = vmul.f32 1.442695, %v1645_v24  ;;  %v1563_v32 = vadd.f32 %v1562_v29, %v4541_v56  ;;  %v3312_v24 = vpack.c.bf16 %v1946_v17, %v1945_v15 }
 0x4e8   : > { %2368 = vst [vmem:[%s4546_s29 + $0x50] sm:$0xff] %v4578_v28  ;;  %3056 = vmatprep.mubr.f32.mxu1 %v1705_v30  ;;  %v1690_v34 = vmul.f32 %v3513_v31, %v1626_v27  ;;  %v1947_v30 = vld [vmem:[#allocation14 + $0x50] sm:$0xff]  ;;  %v1948_v31 = vld [vmem:[#allocation14 + $0x58] sm:$0xff] }
 0x4e9   : > { %3518 = vpow2.f32 %v1665_v26  ;;  %v1646_v35 = vmul.f32 0.5, %v1563_v32  ;;  %2369 = vst [vmem:[%s4546_s29 + $0x58] sm:$0xff] %v1563_v32  ;;  %v1566_v36 = vpop.f32.mrb[28].mxu0 }
 0x4ea   : > { %v4586_v38 = vadd.f32 %v1566_v36, %v4537_v55  ;;  %v1568_v39 = vpop.f32.mrb[29].mxu0  ;;  %v1706_v40 = vadd.f32 %v1690_v34, %v1537_v0  ;;  %v3316_v36 = vpack.c.bf16 %v1948_v31, %v1947_v30 }
 0x4eb   : > { %v3515_v42 = vpop.eup %3514  ;;  %v1667_v43 = vmul.f32 1.442695, %v1646_v35  ;;  %v1569_v44 = vadd.f32 %v1568_v39, %v4541_v56 }
 0x4ec   : > { %2370 = vst [vmem:[%s4546_s29 + $0x60] sm:$0xff] %v4586_v38  ;;  %3057 = vmatmul.mubr.f32.vlgmr.msra.gmra.mrb[48].mxu1 %v1706_v40  ;;  %v1691_v50 = vmul.f32 %v3515_v42, %v1627_v37  ;;  %v1950_v42 = vld [vmem:[#allocation14 + $0x68] sm:$0xff] }
 0x4ed   : > { %3520 = vpow2.f32 %v1667_v43  ;;  %v1647_v53 = vmul.f32 0.5, %v1569_v44  ;;  %2371 = vst [vmem:[%s4546_s29 + $0x68] sm:$0xff] %v1569_v44  ;;  %v1572_v58 = vpop.f32.mrb[30].mxu0  ;;  %3299 = vmatpush3.bf16.msra.mxu1 %v4525_v48 }
 0x4ee   : > { %v4595_v60 = vadd.f32 %v1572_v58, %v4537_v55  ;;  %v1574_v61 = vpop.f32.mrb[31].mxu0  ;;  %v1707_v62 = vadd.f32 %v1691_v50, %v4555_v49  ;;  %3301 = vmatprep.subr.bf16.mxu1 %v3300_v41 }
 0x4ef   : > { %v3517_v0 = vpop.eup %3516  ;;  %v1669_v1 = vmul.f32 1.442695, %v1647_v53  ;;  %v1575_v2 = vadd.f32 %v1574_v61, %v4541_v56 }
 0x4f0   : > { %2372 = vst [vmem:[%s4546_s29 + $0x70] sm:$0xff] %v4595_v60  ;;  %3059 = vmatprep.mubr.f32.mxu1 %v1707_v62  ;;  %v1692_v48 = vmul.f32 %v3517_v0, %v1628_v59 }
 0x4f1   : > { %3522 = vpow2.f32 %v1669_v1  ;;  %v1648_v6 = vmul.f32 0.5, %v1575_v2  ;;  %2373 = vst [vmem:[%s4546_s29 + $0x78] sm:$0xff] %v1575_v2  ;;  %v1578_v7 = vpop.f32.mrb[32].mxu0  ;;  %3303 = vmatpush3.bf16.msra.mxu1 %v3300_v41  ;;  %v1949_v41 = vld [vmem:[#allocation14 + $0x60] sm:$0xff] }
 0x4f2   : > { %v4604_v49 = vadd.f32 %v1578_v7, %v4537_v55  ;;  %v1580_v9 = vpop.f32.mrb[33].mxu0  ;;  %v1708_v10 = vadd.f32 %v1692_v48, %v4562_v11  ;;  %3305 = vmatprep.subr.bf16.mxu1 %v3304_v63  ;;  %v3320_v58 = vpack.c.bf16 %v1950_v42, %v1949_v41  ;;  %v1633_v2 = vld [vmem:[%s4376_s16 + $0x40] sm:$0xff]  ;;  %v1638_v42 = vld [vmem:[%s4376_s16 + $0x68] sm:$0xff] }
 0x4f3   : > { %v3519_v12 = vpop.eup %3518  ;;  %v1671_v14 = vmul.f32 1.442695, %v1648_v6  ;;  %v1581_v4 = vadd.f32 %v1580_v9, %v4541_v56 }
 0x4f4   : > { %2374 = vst [vmem:[%s4546_s29 + $0x80] sm:$0xff] %v4604_v49  ;;  %3060 = vmatmul.mubr.f32.gmra.mrb[50].mxu1 %v1708_v10  ;;  %v1693_v18 = vmul.f32 %v3519_v12, %v1629_v8 }
 0x4f5   : > { %3524 = vpow2.f32 %v1671_v14  ;;  %v1649_v16 = vmul.f32 0.5, %v1581_v4  ;;  %2375 = vst [vmem:[%s4546_s29 + $0x88] sm:$0xff] %v1581_v4  ;;  %v1584_v13 = vpop.f32.mrb[34].mxu0  ;;  %3307 = vmatpush3.bf16.msra.mxu1 %v3304_v63 }
 0x4f6   : > { %v4613_v11 = vadd.f32 %v1584_v13, %v4537_v55  ;;  %v1586_v22 = vpop.f32.mrb[35].mxu0  ;;  %v1709_v23 = vadd.f32 %v1693_v18, %v4570_v19  ;;  %3309 = vmatprep.subr.bf16.mxu1 %v3308_v57 }
 0x4f7   : > { %v3521_v25 = vpop.eup %3520  ;;  %v1673_v27 = vmul.f32 1.442695, %v1649_v16  ;;  %v1587_v29 = vadd.f32 %v1586_v22, %v4541_v56 }
 0x4f8   : > { %2376 = vst [vmem:[%s4546_s29 + $0x90] sm:$0xff] %v4613_v11  ;;  %3062 = vmatprep.mubr.f32.mxu1 %v1709_v23  ;;  %v1694_v26 = vmul.f32 %v3521_v25, %v1630_v21  ;;  %v1635_v21 = vld [vmem:[%s4376_s16 + $0x50] sm:$0xff] }
 0x4f9   : > { %3526 = vpow2.f32 %v1673_v27  ;;  %v1650_v32 = vmul.f32 0.5, %v1587_v29  ;;  %2377 = vst [vmem:[%s4546_s29 + $0x98] sm:$0xff] %v1587_v29  ;;  %v1590_v33 = vpop.f32.mrb[36].mxu0  ;;  %3311 = vmatpush3.bf16.msra.mxu1 %v3308_v57  ;;  %v1634_v57 = vld [vmem:[%s4376_s16 + $0x48] sm:$0xff] }
 0x4fa   : > { %v4622_v19 = vadd.f32 %v1590_v33, %v4537_v55  ;;  %v1592_v34 = vpop.f32.mrb[37].mxu0  ;;  %v1710_v35 = vadd.f32 %v1694_v26, %v4578_v28  ;;  %3313 = vmatprep.subr.bf16.mxu1 %v3312_v24  ;;  %v1636_v26 = vld [vmem:[%s4376_s16 + $0x58] sm:$0xff] }
 0x4fb   : > { %v3523_v37 = vpop.eup %3522  ;;  %v1675_v39 = vmul.f32 1.442695, %v1650_v32  ;;  %v1593_v40 = vadd.f32 %v1592_v34, %v4541_v56 }
 0x4fc   : > { %2378 = vst [vmem:[%s4546_s29 + $0xa0] sm:$0xff] %v4622_v19  ;;  %3063 = vmatmul.mubr.f32.gmra.mrb[52].mxu1 %v1710_v35  ;;  %v1695_v43 = vmul.f32 %v3523_v37, %v1631_v45 }
 0x4fd   : > { %3528 = vpow2.f32 %v1675_v39  ;;  %v1651_v44 = vmul.f32 0.5, %v1593_v40  ;;  %2379 = vst [vmem:[%s4546_s29 + $0xa8] sm:$0xff] %v1593_v40  ;;  %v1596_v46 = vpop.f32.mrb[38].mxu0  ;;  %3315 = vmatpush3.bf16.msra.mxu1 %v3312_v24  ;;  %v1637_v39 = vld [vmem:[%s4376_s16 + $0x60] sm:$0xff] }
 0x4fe   : > { %v4631_v28 = vadd.f32 %v1596_v46, %v4537_v55  ;;  %v1598_v50 = vpop.f32.mrb[39].mxu0  ;;  %v1711_v53 = vadd.f32 %v1695_v43, %v4586_v38  ;;  %3317 = vmatprep.subr.bf16.mxu1 %v3316_v36  ;;  %v1639_v46 = vld [vmem:[%s4376_s16 + $0x70] sm:$0xff] }
 0x4ff   : > { %v3525_v59 = vpop.eup %3524  ;;  %v1677_v61 = vmul.f32 1.442695, %v1651_v44  ;;  %v1599_v62 = vadd.f32 %v1598_v50, %v4541_v56 }
 0x500   : > { %2380 = vst [vmem:[%s4546_s29 + $0xb0] sm:$0xff] %v4631_v28  ;;  %3065 = vmatprep.mubr.f32.mxu1 %v1711_v53  ;;  %v1696_v63 = vmul.f32 %v3525_v59, %v1632_v47 }
 0x501   : > { %3530 = vpow2.f32 %v1677_v61  ;;  %v1652_v0 = vmul.f32 0.5, %v1599_v62  ;;  %2381 = vst [vmem:[%s4546_s29 + $0xb8] sm:$0xff] %v1599_v62  ;;  %v1602_v1 = vpop.f32.mrb[40].mxu0  ;;  %3319 = vmatpush3.bf16.msra.mxu1 %v3316_v36 }
 0x502   : > { %v4640_v38 = vadd.f32 %v1602_v1, %v4537_v55  ;;  %v1604_v3 = vpop.f32.mrb[41].mxu0  ;;  %v1712_v5 = vadd.f32 %v1696_v63, %v4595_v60  ;;  %3321 = vmatprep.subr.bf16.mxu1 %v3320_v58  ;;  %v1951_v63 = vld [vmem:[#allocation14 + $0x70] sm:$0xff] }
 0x503   : > { %v3527_v48 = vpop.eup %3526  ;;  %v1679_v6 = vmul.f32 1.442695, %v1652_v0  ;;  %v1605_v7 = vadd.f32 %v1604_v3, %v4541_v56  ;;  %v1952_v0 = vld [vmem:[#allocation14 + $0x78] sm:$0xff]  ;;  %v2153_v3 = vld [vmem:[#allocation16] sm:$0xff] }
 0x504   : > { %2382 = vst [vmem:[%s4546_s29 + $0xc0] sm:$0xff] %v4640_v38  ;;  %3066 = vmatmul.mubr.f32.gmra.mrb[54].mxu1 %v1712_v5  ;;  %v1697_v8 = vmul.f32 %v3527_v48, %v1633_v2  ;;  %v3324_v1 = vpack.c.bf16 %v1952_v0, %v1951_v63  ;;  %v2154_v2 = vld [vmem:[#allocation16 + $0x8] sm:$0xff]  ;;  %v2155_v48 = vld [vmem:[#allocation16 + $0x10] sm:$0xff] }
 0x505   : > { %3532 = vpow2.f32 %v1679_v6  ;;  %v1653_v9 = vmul.f32 0.5, %v1605_v7  ;;  %2383 = vst [vmem:[%s4546_s29 + $0xc8] sm:$0xff] %v1605_v7  ;;  %v1608_v10 = vpop.f32.mrb[42].mxu0  ;;  %3323 = vmatpush3.bf16.msra.mxu1 %v3320_v58  ;;  %v1640_v58 = vld [vmem:[%s4376_s16 + $0x78] sm:$0xff]  ;;  %v2158_v6 = vld [vmem:[#allocation16 + $0x28] sm:$0xff]  ;;  %s2442_s16 = sshll.u32 %s4546_s29, 4  ;;  %s4737_s16 = int_to_ptr.vmem [resolvable:$true] %s2442_s16 }
 0x506   : > { %v1609_v60 = vadd.f32 %v1608_v10, %v4537_v55  ;;  %v1610_v12 = vpop.f32.mrb[43].mxu0  ;;  %v1713_v14 = vadd.f32 %v1697_v8, %v4604_v49  ;;  %3325 = vmatprep.subr.bf16.mxu1 %v3324_v1  ;;  %v2160_v7 = vld [vmem:[#allocation16 + $0x38] sm:$0xff]  ;;  %v3330_v8 = vpack.c.bf16 %v2155_v48, %v2153_v3  ;;  %v2157_v10 = vld [vmem:[#allocation16 + $0x20] sm:$0xff]  ;;  %s3798_s9 = scalar_lea.vmem %s4737_s16, 4096  ;;  %p3805_p4 = scmp.lt.s32.totalorder %s4737_s16, %s3803_s2 }
 0x507   : > { %v3529_v4 = vpop.eup %3528  ;;  %v1681_v15 = vmul.f32 1.442695, %v1653_v9  ;;  %v1611_v17 = vadd.f32 %v1610_v12, %v4541_v56  ;;  %v3332_v9 = vpack.c.bf16 %v2160_v7, %v2158_v6  ;;  %v2164_v12 = vld [vmem:[#allocation16 + $0x58] sm:$0xff]  ;;  %p3799_p6 = scmp.ne.s32.totalorder %s4737_s16, %s3798_s9  ;;  %p3806_p8 = scmp.lt.s32.totalorder %s3804_s4, %s3798_s9 }
 0x508   : > { %2384 = vst [vmem:[%s4546_s29 + $0xd0] sm:$0xff] %v1609_v60  ;;  %3068 = vmatprep.mubr.f32.mxu1 %v1713_v14  ;;  %v1698_v18 = vmul.f32 %v3529_v4, %v1634_v57  ;;  %v2159_v57 = vld [vmem:[#allocation16 + $0x30] sm:$0xff] }
 0x509   : > { %3534 = vpow2.f32 %v1681_v15  ;;  %v1654_v16 = vmul.f32 0.5, %v1611_v17  ;;  %2385 = vst [vmem:[%s4546_s29 + $0xd8] sm:$0xff] %v1611_v17  ;;  %v1614_v13 = vpop.f32.mrb[44].mxu0  ;;  %3327 = vmatpush3.bf16.msra.mxu1 %v3324_v1  ;;  %v3334_v14 = vpack.c.bf16 %v2159_v57, %v2157_v10  ;;  %v2161_v15 = vld [vmem:[#allocation16 + $0x40] sm:$0xff]  ;;  %v2163_v17 = vld [vmem:[#allocation16 + $0x50] sm:$0xff]  ;;  %p3800_p5 = pnand %p3799_p6, %p4987_p10  ;;  %p3807_p11 = por %p3806_p8, %p3805_p4 }
 0x50a   : > { %v1615_v22 = vadd.f32 %v1614_v13, %v4537_v55  ;;  %v1616_v23 = vpop.f32.mrb[45].mxu0  ;;  %v1714_v49 = vadd.f32 %v1698_v18, %v4613_v11  ;;  %v2166_v18 = vld [vmem:[#allocation16 + $0x68] sm:$0xff]  ;;  %v3338_v13 = vpack.c.bf16 %v2163_v17, %v2161_v15 }
 0x50b   : > { %v3531_v24 = vpop.eup %3530  ;;  %v1683_v25 = vmul.f32 1.442695, %v1654_v16  ;;  %v1617_v27 = vadd.f32 %v1616_v23, %v4541_v56  ;;  %v2168_v16 = vld [vmem:[#allocation16 + $0x78] sm:$0xff]  ;;  %v2167_v23 = vld [vmem:[#allocation16 + $0x70] sm:$0xff]  ;;  %p3801_p9 = pneg %p3800_p5 }
 0x50c   : > { %2386 = vst [vmem:[%s4546_s29 + $0xe0] sm:$0xff] %v1615_v22  ;;  %3069 = vmatmul.mubr.f32.gmra.mrb[56].mxu1 %v1714_v49  ;;  %v1699_v29 = vmul.f32 %v3531_v24, %v1635_v21  ;;  %v3340_v21 = vpack.c.bf16 %v2168_v16, %v2166_v18  ;;  %v2170_v49 = vld [vmem:[#allocation16 + $0x88] sm:$0xff]  ;;  %v2172_v24 = vld [vmem:[#allocation16 + $0x98] sm:$0xff] }
 0x50d   : > { %3536 = vpow2.f32 %v1683_v25  ;;  %v1655_v30 = vmul.f32 0.5, %v1617_v27  ;;  %2387 = vst [vmem:[%s4546_s29 + $0xe8] sm:$0xff] %v1617_v27  ;;  %v1620_v31 = vpop.f32.mrb[46].mxu0  ;;  %v3344_v27 = vpack.c.bf16 %v2172_v24, %v2170_v49  ;;  %p3808_p3 = pnand %p3807_p11, %p3801_p9 }
 0x50e   : > { %v1621_v32 = vadd.f32 %v1620_v31, %v4537_v55  ;;  %v1622_v33 = vpop.f32.mrb[47].mxu0  ;;  %v1715_v11 = vadd.f32 %v1699_v29, %v4622_v19  ;;  %v2169_v29 = vld [vmem:[#allocation16 + $0x80] sm:$0xff]  ;;  %v2174_v31 = vld [vmem:[#allocation16 + $0xa8] sm:$0xff] }
 0x50f   : > { %v3533_v45 = vpop.eup %3532  ;;  %v1685_v34 = vmul.f32 1.442695, %v1655_v30  ;;  %v1623_v35 = vadd.f32 %v1622_v33, %v4541_v56  ;;  %v2171_v30 = vld [vmem:[#allocation16 + $0x90] sm:$0xff] }
 0x510   : > { %2388 = vst [vmem:[%s4546_s29 + $0xf0] sm:$0xff] %v1621_v32  ;;  %3071 = vmatprep.mubr.f32.mxu1 %v1715_v11  ;;  %v1700_v36 = vmul.f32 %v3533_v45, %v1636_v26  ;;  %v2176_v26 = vld [vmem:[#allocation16 + $0xb8] sm:$0xff]  ;;  %v2173_v11 = vld [vmem:[#allocation16 + $0xa0] sm:$0xff]  ;;  %v2175_v45 = vld [vmem:[#allocation16 + $0xb0] sm:$0xff] }
 0x511   : > { %3538 = vpow2.f32 %v1685_v34  ;;  %v1656_v37 = vmul.f32 0.5, %v1623_v35  ;;  %2389 = vst [vmem:[%s4546_s29 + $0xf8] sm:$0xff] %v1623_v35  ;;  %v3348_v33 = vpack.c.bf16 %v2176_v26, %v2174_v31  ;;  %v2178_v34 = vld [vmem:[#allocation16 + $0xc8] sm:$0xff]  ;;  %v2180_v35 = vld [vmem:[#allocation16 + $0xd8] sm:$0xff] }
 0x512   : > { %v1716_v40 = vadd.f32 %v1700_v36, %v4631_v28  ;;  %v3350_v36 = vpack.c.bf16 %v2175_v45, %v2173_v11 }
 0x513   : > { %v3535_v55 = vpop.eup %3534  ;;  %v1687_v41 = vmul.f32 1.442695, %v1656_v37  ;;  %v3352_v37 = vpack.c.bf16 %v2180_v35, %v2178_v34 }
 0x514   : > { %3072 = vmatmul.mubr.f32.gmra.mrb[58].mxu1 %v1716_v40  ;;  %v1701_v19 = vmul.f32 %v3535_v55, %v1637_v39  ;;  %v2177_v39 = vld [vmem:[#allocation16 + $0xc0] sm:$0xff]  ;;  %v2179_v40 = vld [vmem:[#allocation16 + $0xd0] sm:$0xff]  ;;  %v2182_v55 = vld [vmem:[#allocation16 + $0xe8] sm:$0xff] }
 0x515   : > { %3540 = vpow2.f32 %v1687_v41  ;;  %v2184_v41 = vld [vmem:[#allocation16 + $0xf8] sm:$0xff] }
 0x516   : > { %v1717_v43 = vadd.f32 %v1701_v19, %v4640_v38  ;;  %v2156_v38 = vld [vmem:[#allocation16 + $0x18] sm:$0xff]  ;;  %v3354_v19 = vpack.c.bf16 %v2179_v40, %v2177_v39 }
 0x517   : > { %v3537_v56 = vpop.eup %3536  ;;  %v3328_v5 = vpack.c.bf16 %v2156_v38, %v2154_v2 }
 0x518   : > { %3074 = vmatprep.mubr.f32.mxu1 %v1717_v43  ;;  %v1702_v44 = vmul.f32 %v3537_v56, %v1638_v42  ;;  %v3356_v42 = vpack.c.bf16 %v2184_v41, %v2182_v55  ;;  %v2181_v43 = vld [vmem:[#allocation16 + $0xe0] sm:$0xff]  ;;  %v2183_v56 = vld [vmem:[#allocation16 + $0xf0] sm:$0xff] }
 0x519   : > { %3329 = vmatprep.subr.bf16.mxu0 %v3328_v5 }
 0x51a   : > { %v1718_v47 = vadd.f32 %v1702_v44, %v1609_v60  ;;  %v2162_v60 = vld [vmem:[#allocation16 + $0x48] sm:$0xff]  ;;  %3331 = vmatpush1.bf16.msra.mxu0 %v3330_v8  ;;  %v3358_v44 = vpack.c.bf16 %v2183_v56, %v2181_v43 }
 0x51b   : > { %v3539_v50 = vpop.eup %3538  ;;  %3333 = vmatprep.subr.bf16.mxu0 %v3332_v9  ;;  %v3336_v4 = vpack.c.bf16 %v2164_v12, %v2162_v60 }
 0x51c   : > { %3075 = vmatmul.mubr.f32.gmra.mrb[60].mxu1 %v1718_v47  ;;  %v1703_v53 = vmul.f32 %v3539_v50, %v1639_v46  ;;  %v4674_v46 = vld [vmem:[%s4984_s7] ss:$0 sm:$0xff] }
 0x51e   : > { %v1719_v59 = vadd.f32 %v1703_v53, %v1615_v22  ;;  %3335 = vmatpush1.bf16.msra.mxu0 %v3334_v14  ;;  %v2165_v22 = vld [vmem:[#allocation16 + $0x60] sm:$0xff] }
 0x51f   : > { %v3541_v28 = vpop.eup %3540  ;;  %3337 = vmatprep.subr.bf16.mxu0 %v3336_v4  ;;  %v3342_v25 = vpack.c.bf16 %v2167_v23, %v2165_v22 }
 0x520   : > { %3077 = vmatprep.mubr.f32.mxu1 %v1719_v59  ;;  %v1704_v61 = vmul.f32 %v3541_v28, %v1640_v58 }
 0x522   : > { %v1720_v62 = vadd.f32 %v1704_v61, %v1621_v32  ;;  %3339 = vmatpush1.bf16.msra.mxu0 %v3338_v13  ;;  %v3346_v32 = vpack.c.bf16 %v2171_v30, %v2169_v29 }
 0x523   : > { %3341 = vmatprep.subr.bf16.mxu0 %v3340_v21 }
 0x524   : > { %3078 = vmatmul.mubr.f32.gmra.mrb[62].mxu1 %v1720_v62 }
 0x526   : > { %3343 = vmatpush1.bf16.msra.mxu0 %v3342_v25 }
 0x527   : > { %3345 = vmatprep.subr.bf16.mxu0 %v3344_v27 }
 0x52a   : > { %3347 = vmatpush1.bf16.msra.mxu0 %v3346_v32 }
 0x52b   : > { %3349 = vmatprep.subr.bf16.mxu0 %v3348_v33 }
 0x52e   : > { %3351 = vmatpush1.bf16.msra.mxu0 %v3350_v36 }
 0x52f   : > { %3353 = vmatprep.subr.bf16.mxu0 %v3352_v37 }
 0x532   : > { %3355 = vmatpush1.bf16.msra.mxu0 %v3354_v19 }
 0x533   : > { %3357 = vmatprep.subr.bf16.mxu0 %v3356_v42 }
 0x536   : > { %3359 = vmatpush1.bf16.msra.mxu0 %v3358_v44 }
 0x5bf   : > { %v3058_v47 = vpop.f32.mrb[48].mxu1 }
 0x5c0   : > { %v1816_v50 = vadd.f32 %v3058_v47, %v4674_v46  ;;  %v1810_v53 = vpop.f32.mrb[49].mxu1 }
 0x5c1   : > { %v1811_v58 = vadd.f32 %v4674_v46, %v1810_v53 }
 0x5c2   : > { %v1906_v59 = vmul.f32 0.01, %v1816_v50  ;;  %vm1890_vm0 = vcmp.ge.f32.partialorder %v1816_v50, 0.0 }
 0x5c3   : > { %v1905_v28 = vmul.f32 0.01, %v1811_v58  ;;  %vm1889_vm1 = vcmp.ge.f32.partialorder %v1811_v58, 0.0 }
 0x5c4   : > { %v1922_v62 = vsel %vm1890_vm0, %v1816_v50, %v1906_v59 }
 0x5c5   : > { %v1921_v61 = vsel %vm1889_vm1, %v1811_v58, %v1905_v28  ;;  %v4695_v28 = vld [vmem:[%s4985_s30] ss:$0 sm:$0xff] }
 0x5c6   : > { %3112 = vmatprep.mubr.f32.mxu1 %v1921_v61 }
 0x5c7   : > { %v3061_v63 = vpop.f32.mrb[50].mxu1  ;;  %3113 = vmatmul.mubr.f32.vlgmr.msra.gmra.mrb[64].mxu1 %v1922_v62 }
 0x5c8   : > { %v1826_v0 = vadd.f32 %v3061_v63, %v4674_v46  ;;  %v1820_v1 = vpop.f32.mrb[51].mxu1 }
 0x5c9   : > { %v1821_v2 = vadd.f32 %v4674_v46, %v1820_v1 }
 0x5ca   : > { %v1908_v38 = vmul.f32 0.01, %v1826_v0  ;;  %vm1892_vm3 = vcmp.ge.f32.partialorder %v1826_v0, 0.0 }
 0x5cb   : > { %v1907_v3 = vmul.f32 0.01, %v1821_v2  ;;  %vm1891_vm2 = vcmp.ge.f32.partialorder %v1821_v2, 0.0 }
 0x5cc   : > { %v1924_v48 = vsel %vm1892_vm3, %v1826_v0, %v1908_v38 }
 0x5cd   : > { %v1923_v5 = vsel %vm1891_vm2, %v1821_v2, %v1907_v3 }
 0x5ce   : > { %3115 = vmatprep.mubr.f32.mxu1 %v1923_v5 }
 0x5cf   : > { %v3064_v6 = vpop.f32.mrb[52].mxu1  ;;  %3116 = vmatmul.mubr.f32.gmra.mrb[66].mxu1 %v1924_v48 }
 0x5d0   : > { %v1836_v7 = vadd.f32 %v3064_v6, %v4674_v46  ;;  %v1830_v8 = vpop.f32.mrb[53].mxu1 }
 0x5d1   : > { %v1831_v9 = vadd.f32 %v4674_v46, %v1830_v8 }
 0x5d2   : > { %v1910_v10 = vmul.f32 0.01, %v1836_v7  ;;  %vm1894_vm5 = vcmp.ge.f32.partialorder %v1836_v7, 0.0 }
 0x5d3   : > { %v1909_v57 = vmul.f32 0.01, %v1831_v9  ;;  %vm1893_vm4 = vcmp.ge.f32.partialorder %v1831_v9, 0.0 }
 0x5d4   : > { %v1926_v12 = vsel %vm1894_vm5, %v1836_v7, %v1910_v10 }
 0x5d5   : > { %v1925_v60 = vsel %vm1893_vm4, %v1831_v9, %v1909_v57 }
 0x5d6   : > { %3118 = vmatprep.mubr.f32.mxu1 %v1925_v60 }
 0x5d7   : > { %v3067_v14 = vpop.f32.mrb[54].mxu1  ;;  %3119 = vmatmul.mubr.f32.gmra.mrb[68].mxu1 %v1926_v12 }
 0x5d8   : > { %v1846_v4 = vadd.f32 %v3067_v14, %v4674_v46  ;;  %v1840_v15 = vpop.f32.mrb[55].mxu1 }
 0x5d9   : > { %v1841_v17 = vadd.f32 %v4674_v46, %v1840_v15 }
 0x5da   : > { %v1912_v18 = vmul.f32 0.01, %v1846_v4  ;;  %vm1896_vm7 = vcmp.ge.f32.partialorder %v1846_v4, 0.0 }
 0x5db   : > { %v1911_v16 = vmul.f32 0.01, %v1841_v17  ;;  %vm1895_vm6 = vcmp.ge.f32.partialorder %v1841_v17, 0.0 }
 0x5dc   : > { %v1928_v21 = vsel %vm1896_vm7, %v1846_v4, %v1912_v18 }
 0x5dd   : > { %v1927_v13 = vsel %vm1895_vm6, %v1841_v17, %v1911_v16 }
 0x5de   : > { %3121 = vmatprep.mubr.f32.mxu1 %v1927_v13 }
 0x5df   : > { %v3070_v22 = vpop.f32.mrb[56].mxu1  ;;  %3122 = vmatmul.mubr.f32.gmra.mrb[70].mxu1 %v1928_v21 }
 0x5e0   : > { %v1856_v23 = vadd.f32 %v3070_v22, %v4674_v46  ;;  %v1850_v49 = vpop.f32.mrb[57].mxu1 }
 0x5e1   : > { %v1851_v24 = vadd.f32 %v4674_v46, %v1850_v49 }
 0x5e2   : > { %v1914_v25 = vmul.f32 0.01, %v1856_v23  ;;  %vm1898_vm9 = vcmp.ge.f32.partialorder %v1856_v23, 0.0 }
 0x5e3   : > { %v1913_v27 = vmul.f32 0.01, %v1851_v24  ;;  %vm1897_vm8 = vcmp.ge.f32.partialorder %v1851_v24, 0.0 }
 0x5e4   : > { %v1930_v30 = vsel %vm1898_vm9, %v1856_v23, %v1914_v25 }
 0x5e5   : > { %v1929_v29 = vsel %vm1897_vm8, %v1851_v24, %v1913_v27 }
 0x5e6   : > { %3124 = vmatprep.mubr.f32.mxu1 %v1929_v29 }
 0x5e7   : > { %v3073_v31 = vpop.f32.mrb[58].mxu1  ;;  %3125 = vmatmul.mubr.f32.gmra.mrb[72].mxu1 %v1930_v30 }
 0x5e8   : > { %v1866_v26 = vadd.f32 %v3073_v31, %v4674_v46  ;;  %v1860_v32 = vpop.f32.mrb[59].mxu1 }
 0x5e9   : > { %v1861_v33 = vadd.f32 %v4674_v46, %v1860_v32 }
 0x5ea   : > { %v1916_v11 = vmul.f32 0.01, %v1866_v26  ;;  %vm1900_vm11 = vcmp.ge.f32.partialorder %v1866_v26, 0.0 }
 0x5eb   : > { %v1915_v45 = vmul.f32 0.01, %v1861_v33  ;;  %vm1899_vm10 = vcmp.ge.f32.partialorder %v1861_v33, 0.0 }
 0x5ec   : > { %v1932_v35 = vsel %vm1900_vm11, %v1866_v26, %v1916_v11 }
 0x5ed   : > { %v1931_v34 = vsel %vm1899_vm10, %v1861_v33, %v1915_v45 }
 0x5ee   : > { %3127 = vmatprep.mubr.f32.mxu1 %v1931_v34 }
 0x5ef   : > { %v3076_v36 = vpop.f32.mrb[60].mxu1  ;;  %3128 = vmatmul.mubr.f32.gmra.mrb[74].mxu1 %v1932_v35 }
 0x5f0   : > { %v1876_v37 = vadd.f32 %v3076_v36, %v4674_v46  ;;  %v1870_v39 = vpop.f32.mrb[61].mxu1 }
 0x5f1   : > { %v1871_v40 = vadd.f32 %v4674_v46, %v1870_v39 }
 0x5f2   : > { %v1918_v55 = vmul.f32 0.01, %v1876_v37  ;;  %vm1902_vm13 = vcmp.ge.f32.partialorder %v1876_v37, 0.0 }
 0x5f3   : > { %v1917_v41 = vmul.f32 0.01, %v1871_v40  ;;  %vm1901_vm12 = vcmp.ge.f32.partialorder %v1871_v40, 0.0 }
 0x5f4   : > { %v1934_v42 = vsel %vm1902_vm13, %v1876_v37, %v1918_v55 }
 0x5f5   : > { %v1933_v19 = vsel %vm1901_vm12, %v1871_v40, %v1917_v41 }
 0x5f6   : > { %3130 = vmatprep.mubr.f32.mxu1 %v1933_v19 }
 0x5f7   : > { %v3079_v43 = vpop.f32.mrb[62].mxu1  ;;  %3131 = vmatmul.mubr.f32.gmra.mrb[76].mxu1 %v1934_v42 }
 0x5f8   : > { %v1886_v56 = vadd.f32 %v3079_v43, %v4674_v46  ;;  %v1880_v44 = vpop.f32.mrb[63].mxu1 }
 0x5f9   : > { %v1881_v47 = vadd.f32 %v4674_v46, %v1880_v44 }
 0x5fa   : > { %v1920_v50 = vmul.f32 0.01, %v1886_v56  ;;  %vm1904_vm15 = vcmp.ge.f32.partialorder %v1886_v56, 0.0 }
 0x5fb   : > { %v1919_v53 = vmul.f32 0.01, %v1881_v47  ;;  %vm1903_vm14 = vcmp.ge.f32.partialorder %v1881_v47, 0.0 }
 0x5fc   : > { %v1936_v59 = vsel %vm1904_vm15, %v1886_v56, %v1920_v50 }
 0x5fd   : > { %v1935_v58 = vsel %vm1903_vm14, %v1881_v47, %v1919_v53 }
 0x5fe   : > { %3133 = vmatprep.mubr.f32.mxu1 %v1935_v58 }
 0x5ff   : > { %3134 = vmatmul.mubr.f32.gmra.mrb[78].mxu1 %v1936_v59 }
 0x69a   : > { %v3114_v61 = vpop.f32.mrb[64].mxu1 }
 0x69b   : > { %v2026_v62 = vpop.f32.mrb[65].mxu1  ;;  %v2032_v63 = vadd.f32 %v3114_v61, %v4695_v28 }
 0x69c   : > { %v2027_v0 = vadd.f32 %v4695_v28, %v2026_v62 }
 0x69d   : > { %v2122_v1 = vmul.f32 0.01, %v2032_v63  ;;  %vm2106_vm1 = vcmp.ge.f32.partialorder %v2032_v63, 0.0 }
 0x69e   : > { %vm2105_vm0 = vcmp.ge.f32.partialorder %v2027_v0, 0.0  ;;  %v2121_v46 = vmul.f32 0.01, %v2027_v0 }
 0x69f   : > { %v2138_v6 = vsel %vm2106_vm1, %v2032_v63, %v2122_v1 }
 0x6a0   : > { %v2137_v2 = vsel %vm2105_vm0, %v2027_v0, %v2121_v46 }
 0x6a1   : > { %2262 = vmatmul.mubr.f32.vlgmr.msra.gmra.mrb[48].mxu0 %v2137_v2 }
 0x6a2   : > { %v3117_v38 = vpop.f32.mrb[66].mxu1  ;;  %2267 = vmatprep.mubr.f32.mxu0 %v3931_v20 }
 0x6a3   : > { %v2036_v3 = vpop.f32.mrb[67].mxu1  ;;  %v2042_v5 = vadd.f32 %v3117_v38, %v4695_v28 }
 0x6a4   : > { %v2037_v48 = vadd.f32 %v4695_v28, %v2036_v3 }
 0x6a5   : > { %2268 = vmatmul.mubr.f32.gmra.mrb[50].mxu0 %v2138_v6  ;;  %v2124_v8 = vmul.f32 0.01, %v2042_v5  ;;  %vm2108_vm3 = vcmp.ge.f32.partialorder %v2042_v5, 0.0 }
 0x6a6   : > { %v2123_v7 = vmul.f32 0.01, %v2037_v48  ;;  %2273 = vmatprep.mubr.f32.mxu0 %v3931_v20  ;;  %vm2107_vm2 = vcmp.ge.f32.partialorder %v2037_v48, 0.0 }
 0x6a7   : > { %v2140_v14 = vsel %vm2108_vm3, %v2042_v5, %v2124_v8 }
 0x6a8   : > { %v2139_v9 = vsel %vm2107_vm2, %v2037_v48, %v2123_v7 }
 0x6a9   : > { %2274 = vmatmul.mubr.f32.gmra.mrb[52].mxu0 %v2139_v9 }
 0x6aa   : > { %v3120_v10 = vpop.f32.mrb[68].mxu1  ;;  %2279 = vmatprep.mubr.f32.mxu0 %v3931_v20 }
 0x6ab   : > { %v2046_v57 = vpop.f32.mrb[69].mxu1  ;;  %v2052_v60 = vadd.f32 %v3120_v10, %v4695_v28 }
 0x6ac   : > { %v2047_v12 = vadd.f32 %v4695_v28, %v2046_v57 }
 0x6ad   : > { %2280 = vmatmul.mubr.f32.gmra.mrb[54].mxu0 %v2140_v14  ;;  %v2126_v15 = vmul.f32 0.01, %v2052_v60  ;;  %vm2110_vm5 = vcmp.ge.f32.partialorder %v2052_v60, 0.0 }
 0x6ae   : > { %v2125_v4 = vmul.f32 0.01, %v2047_v12  ;;  %2285 = vmatprep.mubr.f32.mxu0 %v3931_v20  ;;  %vm2109_vm4 = vcmp.ge.f32.partialorder %v2047_v12, 0.0 }
 0x6af   : > { %v2142_v22 = vsel %vm2110_vm5, %v2052_v60, %v2126_v15 }
 0x6b0   : > { %v2141_v17 = vsel %vm2109_vm4, %v2047_v12, %v2125_v4 }
 0x6b1   : > { %2286 = vmatmul.mubr.f32.gmra.mrb[56].mxu0 %v2141_v17 }
 0x6b2   : > { %v3123_v18 = vpop.f32.mrb[70].mxu1  ;;  %2291 = vmatprep.mubr.f32.mxu0 %v3931_v20 }
 0x6b3   : > { %v2056_v16 = vpop.f32.mrb[71].mxu1  ;;  %v2062_v13 = vadd.f32 %v3123_v18, %v4695_v28 }
 0x6b4   : > { %v2057_v21 = vadd.f32 %v4695_v28, %v2056_v16 }
 0x6b5   : > { %2292 = vmatmul.mubr.f32.gmra.mrb[58].mxu0 %v2142_v22  ;;  %v2128_v49 = vmul.f32 0.01, %v2062_v13  ;;  %vm2112_vm7 = vcmp.ge.f32.partialorder %v2062_v13, 0.0 }
 0x6b6   : > { %v2127_v23 = vmul.f32 0.01, %v2057_v21  ;;  %2297 = vmatprep.mubr.f32.mxu0 %v3931_v20  ;;  %vm2111_vm6 = vcmp.ge.f32.partialorder %v2057_v21, 0.0 }
 0x6b7   : > { %v2144_v31 = vsel %vm2112_vm7, %v2062_v13, %v2128_v49 }
 0x6b8   : > { %v2143_v24 = vsel %vm2111_vm6, %v2057_v21, %v2127_v23 }
 0x6b9   : > { %2298 = vmatmul.mubr.f32.gmra.mrb[60].mxu0 %v2143_v24 }
 0x6ba   : > { %v3126_v25 = vpop.f32.mrb[72].mxu1  ;;  %2303 = vmatprep.mubr.f32.mxu0 %v3931_v20 }
 0x6bb   : > { %v2066_v27 = vpop.f32.mrb[73].mxu1  ;;  %v2072_v29 = vadd.f32 %v3126_v25, %v4695_v28 }
 0x6bc   : > { %v2067_v30 = vadd.f32 %v4695_v28, %v2066_v27 }
 0x6bd   : > { %2304 = vmatmul.mubr.f32.gmra.mrb[62].mxu0 %v2144_v31  ;;  %v2130_v32 = vmul.f32 0.01, %v2072_v29  ;;  %vm2114_vm9 = vcmp.ge.f32.partialorder %v2072_v29, 0.0 }
 0x6be   : > { %v2129_v26 = vmul.f32 0.01, %v2067_v30  ;;  %2309 = vmatprep.mubr.f32.mxu0 %v3931_v20  ;;  %vm2113_vm8 = vcmp.ge.f32.partialorder %v2067_v30, 0.0 }
 0x6bf   : > { %v2146_v36 = vsel %vm2114_vm9, %v2072_v29, %v2130_v32 }
 0x6c0   : > { %v2145_v33 = vsel %vm2113_vm8, %v2067_v30, %v2129_v26 }
 0x6c1   : > { %2310 = vmatmul.mubr.f32.gmra.mrb[64].mxu0 %v2145_v33 }
 0x6c2   : > { %v3129_v11 = vpop.f32.mrb[74].mxu1  ;;  %2315 = vmatprep.mubr.f32.mxu0 %v3931_v20 }
 0x6c3   : > { %v2076_v45 = vpop.f32.mrb[75].mxu1  ;;  %v2082_v34 = vadd.f32 %v3129_v11, %v4695_v28 }
 0x6c4   : > { %v2077_v35 = vadd.f32 %v4695_v28, %v2076_v45 }
 0x6c5   : > { %2316 = vmatmul.mubr.f32.gmra.mrb[66].mxu0 %v2146_v36  ;;  %v2132_v39 = vmul.f32 0.01, %v2082_v34  ;;  %vm2116_vm11 = vcmp.ge.f32.partialorder %v2082_v34, 0.0 }
 0x6c6   : > { %v2131_v37 = vmul.f32 0.01, %v2077_v35  ;;  %2321 = vmatprep.mubr.f32.mxu0 %v3931_v20  ;;  %vm2115_vm10 = vcmp.ge.f32.partialorder %v2077_v35, 0.0 }
 0x6c7   : > { %v2148_v43 = vsel %vm2116_vm11, %v2082_v34, %v2132_v39 }
 0x6c8   : > { %v2147_v40 = vsel %vm2115_vm10, %v2077_v35, %v2131_v37 }
 0x6c9   : > { %2322 = vmatmul.mubr.f32.gmra.mrb[68].mxu0 %v2147_v40 }
 0x6ca   : > { %v3132_v55 = vpop.f32.mrb[76].mxu1  ;;  %2327 = vmatprep.mubr.f32.mxu0 %v3931_v20 }
 0x6cb   : > { %v2086_v41 = vpop.f32.mrb[77].mxu1  ;;  %v2092_v19 = vadd.f32 %v3132_v55, %v4695_v28 }
 0x6cc   : > { %v2087_v42 = vadd.f32 %v4695_v28, %v2086_v41 }
 0x6cd   : > { %2328 = vmatmul.mubr.f32.gmra.mrb[70].mxu0 %v2148_v43  ;;  %v2134_v44 = vmul.f32 0.01, %v2092_v19  ;;  %vm2118_vm13 = vcmp.ge.f32.partialorder %v2092_v19, 0.0 }
 0x6ce   : > { %v2133_v56 = vmul.f32 0.01, %v2087_v42  ;;  %2333 = vmatprep.mubr.f32.mxu0 %v3931_v20  ;;  %vm2117_vm12 = vcmp.ge.f32.partialorder %v2087_v42, 0.0 }
 0x6cf   : > { %v2150_v61 = vsel %vm2118_vm13, %v2092_v19, %v2134_v44 }
 0x6d0   : > { %v2149_v47 = vsel %vm2117_vm12, %v2087_v42, %v2133_v56 }
 0x6d1   : > { %2334 = vmatmul.mubr.f32.gmra.mrb[72].mxu0 %v2149_v47 }
 0x6d2   : > { %v3135_v50 = vpop.f32.mrb[78].mxu1  ;;  %2339 = vmatprep.mubr.f32.mxu0 %v3931_v20 }
 0x6d3   : > { %v2096_v53 = vpop.f32.mrb[79].mxu1  ;;  %v2102_v58 = vadd.f32 %v3135_v50, %v4695_v28 }
 0x6d4   : > { %v2097_v59 = vadd.f32 %v4695_v28, %v2096_v53 }
 0x6d5   : > { %2340 = vmatmul.mubr.f32.gmra.mrb[74].mxu0 %v2150_v61  ;;  %v2136_v63 = vmul.f32 0.01, %v2102_v58  ;;  %vm2120_vm15 = vcmp.ge.f32.partialorder %v2102_v58, 0.0 }
 0x6d6   : > { %v2135_v62 = vmul.f32 0.01, %v2097_v59  ;;  %2345 = vmatprep.mubr.f32.mxu0 %v3931_v20  ;;  %vm2119_vm14 = vcmp.ge.f32.partialorder %v2097_v59, 0.0 }
 0x6d7   : > { %v2152_v46 = vsel %vm2120_vm15, %v2102_v58, %v2136_v63 }
 0x6d8   : > { %v2151_v0 = vsel %vm2119_vm14, %v2097_v59, %v2135_v62 }
 0x6d9   : > { %2346 = vmatmul.mubr.f32.gmra.mrb[76].mxu0 %v2151_v0 }
 0x6da   : > { %2351 = vmatprep.mubr.f32.mxu0 %v3931_v20 }
 0x6dd   : > { %2352 = vmatmul.mubr.f32.gmra.mrb[78].mxu0 %v2152_v46 }
 0x6de   : > { %3811 = shalt.err (!%p3808_p3)
}
 0x6df   : > { %s3812_s12 = scalar_lea.hbm %s4735_s28, 4096  ;;  %s3816_s22 = scalar_lea.hbm %s4986_s19, 8192 }
 0x6e0   : > { %p3813_p12 = scmp.ne.s32.totalorder %s4735_s28, %s3812_s12  ;;  %p3817_p0 = scmp.lt.u32.totalorder %s4735_s28, %s4986_s19 }
 0x6e1   : > { %p3818_p7 = scmp.lt.u32.totalorder %s3816_s22, %s3812_s12  ;;  %p3820_p6 = scmp.lt.u32.totalorder %s3812_s12, %s4735_s28 }
 0x6e2   : > { %p3814_p1 = pnand %p3813_p12, %p4987_p10 }
 0x6e3   : > { %p3819_p2 = por %p3818_p7, %p3817_p0 }
 0x6e4   : > { %p3815_p13 = pneg %p3814_p1 }
 0x6e5   : > { %p3821_p5 = por %p3820_p6, %p3819_p2 }
 0x6e7   : > { %p3822_p9 = pnand %p3821_p5, %p3815_p13 }
 0x6e9   : > { %3825 = shalt.err (!%p3822_p9)
}
 0x6ea   : > { %s3933_s14 = smov 256   ;;  %s3934_s30 = smov 16  }
 0x6eb   : > { %3408 = dma.vmem_to_hbm [thread:$0]  (%p4987_p10), %s4737_s16, 4096, %s4735_s28, %s2423_s8, %s3933_s14, %s3933_s14, %s3934_s30  }
 0x6ec   : > { %s4988_s9 = sld [smem:[#allocation43_spill]]  ;;  %s4780_s20 = scalar_lea.vmem [#allocation18], %s4364_s1 }
 0x6ed   : > { %s2459_s1 = sshll.u32 %s4780_s20, 4  ;;  %s4989_s8 = sld [smem:[#allocation45_spill]]  ;;  %s4850_s1 = int_to_ptr.vmem [resolvable:$true] %s2459_s1 }
 0x6ee   : > { %s2428_s4 = scalar_lea.sflag [#allocation19], %s4361_s26  ;;  %s3826_s12 = scalar_lea.vmem %s4850_s1, 4096 }
 0x6ef   : > { %p3827_p4 = scmp.ne.s32.totalorder %s4850_s1, %s3826_s12  ;;  %s3935_s29 = smov [#allocation18]  }
 0x6f0   : > { %s3830_s0 = sshll.u32 %s3935_s29, 4  ;;  %s3831_s0 = int_to_ptr.vmem [resolvable:$false] %s3830_s0 }
 0x6f1   : > { %p3828_p8 = pnand %p3827_p4, %p4987_p10  ;;  %s3832_s10 = scalar_lea.vmem %s3831_s0, 8192 }
 0x6f2   : > { %v2185_v20 = vld [vmem:[%s4988_s9] sm:$0x3]  ;;  %p3833_p3 = scmp.lt.s32.totalorder %s4850_s1, %s3831_s0  ;;  %p3834_p12 = scmp.lt.s32.totalorder %s3832_s10, %s3826_s12 }
 0x6f3   : > { %v4771_v28 = vrot.slane %v2185_v20, %v1456_v52  ;;  %v4775_v1 = vrot.slane %v2185_v20, %v1460_v54  ;;  %s4848_s2 = scalar_lea.hbm %s4989_s8, %s2701_s17  ;;  %p3829_p11 = pneg %p3828_p8 }
 0x6f4   : > { %p3835_p1 = por %p3834_p12, %p3833_p3 }
 0x6f6   : > { %p3836_p13 = pnand %p3835_p1, %p3829_p11 }
 0x774   : > { %v2263_v2 = vpop.f32.mrb[48].mxu0 }
 0x775   : > { %v2264_v38 = vadd.f32 %v2263_v2, %v4771_v28  ;;  %v2265_v3 = vpop.f32.mrb[49].mxu0 }
 0x776   : > { %v2266_v5 = vadd.f32 %v2265_v3, %v4775_v1 }
 0x777   : > { %2390 = vst [vmem:[%s4780_s20] sm:$0xff] %v2264_v38 }
 0x778   : > { %2391 = vst [vmem:[%s4780_s20 + $0x8] sm:$0xff] %v2266_v5  ;;  %v2269_v52 = vpop.f32.mrb[50].mxu0 }
 0x779   : > { %v2270_v51 = vadd.f32 %v2269_v52, %v4771_v28  ;;  %v2271_v54 = vpop.f32.mrb[51].mxu0 }
 0x77a   : > { %v2272_v48 = vadd.f32 %v2271_v54, %v4775_v1 }
 0x77b   : > { %2392 = vst [vmem:[%s4780_s20 + $0x10] sm:$0xff] %v2270_v51 }
 0x77c   : > { %2393 = vst [vmem:[%s4780_s20 + $0x18] sm:$0xff] %v2272_v48  ;;  %v2275_v6 = vpop.f32.mrb[52].mxu0 }
 0x77d   : > { %v2276_v7 = vadd.f32 %v2275_v6, %v4771_v28  ;;  %v2277_v8 = vpop.f32.mrb[53].mxu0 }
 0x77e   : > { %v2278_v9 = vadd.f32 %v2277_v8, %v4775_v1 }
 0x77f   : > { %2394 = vst [vmem:[%s4780_s20 + $0x20] sm:$0xff] %v2276_v7 }
 0x780   : > { %2395 = vst [vmem:[%s4780_s20 + $0x28] sm:$0xff] %v2278_v9  ;;  %v2281_v10 = vpop.f32.mrb[54].mxu0 }
 0x781   : > { %v2282_v57 = vadd.f32 %v2281_v10, %v4771_v28  ;;  %v2283_v60 = vpop.f32.mrb[55].mxu0 }
 0x782   : > { %v2284_v12 = vadd.f32 %v2283_v60, %v4775_v1 }
 0x783   : > { %2396 = vst [vmem:[%s4780_s20 + $0x30] sm:$0xff] %v2282_v57 }
 0x784   : > { %2397 = vst [vmem:[%s4780_s20 + $0x38] sm:$0xff] %v2284_v12  ;;  %v2287_v14 = vpop.f32.mrb[56].mxu0 }
 0x785   : > { %v2288_v4 = vadd.f32 %v2287_v14, %v4771_v28  ;;  %v2289_v15 = vpop.f32.mrb[57].mxu0 }
 0x786   : > { %v2290_v17 = vadd.f32 %v2289_v15, %v4775_v1 }
 0x787   : > { %2398 = vst [vmem:[%s4780_s20 + $0x40] sm:$0xff] %v2288_v4 }
 0x788   : > { %2399 = vst [vmem:[%s4780_s20 + $0x48] sm:$0xff] %v2290_v17  ;;  %v2293_v18 = vpop.f32.mrb[58].mxu0 }
 0x789   : > { %v2294_v16 = vadd.f32 %v2293_v18, %v4771_v28  ;;  %v2295_v13 = vpop.f32.mrb[59].mxu0 }
 0x78a   : > { %v2296_v21 = vadd.f32 %v2295_v13, %v4775_v1 }
 0x78b   : > { %2400 = vst [vmem:[%s4780_s20 + $0x50] sm:$0xff] %v2294_v16 }
 0x78c   : > { %2401 = vst [vmem:[%s4780_s20 + $0x58] sm:$0xff] %v2296_v21  ;;  %v2299_v22 = vpop.f32.mrb[60].mxu0 }
 0x78d   : > { %v2300_v23 = vadd.f32 %v2299_v22, %v4771_v28  ;;  %v2301_v49 = vpop.f32.mrb[61].mxu0 }
 0x78e   : > { %v2302_v24 = vadd.f32 %v2301_v49, %v4775_v1 }
 0x78f   : > { %2402 = vst [vmem:[%s4780_s20 + $0x60] sm:$0xff] %v2300_v23 }
 0x790   : > { %2403 = vst [vmem:[%s4780_s20 + $0x68] sm:$0xff] %v2302_v24  ;;  %v2305_v25 = vpop.f32.mrb[62].mxu0 }
 0x791   : > { %v2306_v27 = vadd.f32 %v2305_v25, %v4771_v28  ;;  %v2307_v29 = vpop.f32.mrb[63].mxu0 }
 0x792   : > { %v2308_v30 = vadd.f32 %v2307_v29, %v4775_v1 }
 0x793   : > { %2404 = vst [vmem:[%s4780_s20 + $0x70] sm:$0xff] %v2306_v27 }
 0x794   : > { %2405 = vst [vmem:[%s4780_s20 + $0x78] sm:$0xff] %v2308_v30  ;;  %v2311_v31 = vpop.f32.mrb[64].mxu0 }
 0x795   : > { %v2312_v26 = vadd.f32 %v2311_v31, %v4771_v28  ;;  %v2313_v32 = vpop.f32.mrb[65].mxu0 }
 0x796   : > { %v2314_v33 = vadd.f32 %v2313_v32, %v4775_v1 }
 0x797   : > { %2406 = vst [vmem:[%s4780_s20 + $0x80] sm:$0xff] %v2312_v26 }
 0x798   : > { %2407 = vst [vmem:[%s4780_s20 + $0x88] sm:$0xff] %v2314_v33  ;;  %v2317_v11 = vpop.f32.mrb[66].mxu0 }
 0x799   : > { %v2318_v45 = vadd.f32 %v2317_v11, %v4771_v28  ;;  %v2319_v34 = vpop.f32.mrb[67].mxu0 }
 0x79a   : > { %v2320_v35 = vadd.f32 %v2319_v34, %v4775_v1 }
 0x79b   : > { %2408 = vst [vmem:[%s4780_s20 + $0x90] sm:$0xff] %v2318_v45 }
 0x79c   : > { %2409 = vst [vmem:[%s4780_s20 + $0x98] sm:$0xff] %v2320_v35  ;;  %v2323_v36 = vpop.f32.mrb[68].mxu0 }
 0x79d   : > { %v2324_v37 = vadd.f32 %v2323_v36, %v4771_v28  ;;  %v2325_v39 = vpop.f32.mrb[69].mxu0 }
 0x79e   : > { %v2326_v40 = vadd.f32 %v2325_v39, %v4775_v1 }
 0x79f   : > { %2410 = vst [vmem:[%s4780_s20 + $0xa0] sm:$0xff] %v2324_v37 }
 0x7a0   : > { %2411 = vst [vmem:[%s4780_s20 + $0xa8] sm:$0xff] %v2326_v40  ;;  %v2329_v55 = vpop.f32.mrb[70].mxu0 }
 0x7a1   : > { %v2330_v41 = vadd.f32 %v2329_v55, %v4771_v28  ;;  %v2331_v19 = vpop.f32.mrb[71].mxu0 }
 0x7a2   : > { %v2332_v42 = vadd.f32 %v2331_v19, %v4775_v1 }
 0x7a3   : > { %2412 = vst [vmem:[%s4780_s20 + $0xb0] sm:$0xff] %v2330_v41 }
 0x7a4   : > { %2413 = vst [vmem:[%s4780_s20 + $0xb8] sm:$0xff] %v2332_v42  ;;  %v2335_v43 = vpop.f32.mrb[72].mxu0 }
 0x7a5   : > { %v2336_v56 = vadd.f32 %v2335_v43, %v4771_v28  ;;  %v2337_v44 = vpop.f32.mrb[73].mxu0 }
 0x7a6   : > { %v2338_v47 = vadd.f32 %v2337_v44, %v4775_v1 }
 0x7a7   : > { %2414 = vst [vmem:[%s4780_s20 + $0xc0] sm:$0xff] %v2336_v56 }
 0x7a8   : > { %2415 = vst [vmem:[%s4780_s20 + $0xc8] sm:$0xff] %v2338_v47  ;;  %v2341_v50 = vpop.f32.mrb[74].mxu0 }
 0x7a9   : > { %v2342_v53 = vadd.f32 %v2341_v50, %v4771_v28  ;;  %v2343_v58 = vpop.f32.mrb[75].mxu0 }
 0x7aa   : > { %v2344_v59 = vadd.f32 %v2343_v58, %v4775_v1 }
 0x7ab   : > { %2416 = vst [vmem:[%s4780_s20 + $0xd0] sm:$0xff] %v2342_v53 }
 0x7ac   : > { %2417 = vst [vmem:[%s4780_s20 + $0xd8] sm:$0xff] %v2344_v59  ;;  %v2347_v61 = vpop.f32.mrb[76].mxu0 }
 0x7ad   : > { %v2348_v62 = vadd.f32 %v2347_v61, %v4771_v28  ;;  %v2349_v63 = vpop.f32.mrb[77].mxu0 }
 0x7ae   : > { %v2350_v0 = vadd.f32 %v2349_v63, %v4775_v1 }
 0x7af   : > { %2418 = vst [vmem:[%s4780_s20 + $0xe0] sm:$0xff] %v2348_v62 }
 0x7b0   : > { %2419 = vst [vmem:[%s4780_s20 + $0xe8] sm:$0xff] %v2350_v0  ;;  %v2353_v46 = vpop.f32.mrb[78].mxu0 }
 0x7b1   : > { %v2354_v20 = vadd.f32 %v2353_v46, %v4771_v28  ;;  %v2355_v2 = vpop.f32.mrb[79].mxu0 }
 0x7b2   : > { %v2356_v38 = vadd.f32 %v2355_v2, %v4775_v1 }
 0x7b3   : > { %2420 = vst [vmem:[%s4780_s20 + $0xf0] sm:$0xff] %v2354_v20 }
 0x7b4   : > { %2421 = vst [vmem:[%s4780_s20 + $0xf8] sm:$0xff] %v2356_v38 }
 0x7b5   : > { %3839 = shalt.err (!%p3836_p13)
}
 0x7b6   : > { %s3840_s17 = scalar_lea.hbm %s4848_s2, 4096  ;;  %s3844_s6 = scalar_lea.hbm %s4989_s8, 8192 }
 0x7b7   : > { %p3841_p0 = scmp.ne.s32.totalorder %s4848_s2, %s3840_s17  ;;  %p3845_p6 = scmp.lt.u32.totalorder %s4848_s2, %s4989_s8 }
 0x7b8   : > { %p3846_p5 = scmp.lt.u32.totalorder %s3844_s6, %s3840_s17  ;;  %p3848_p4 = scmp.lt.u32.totalorder %s3840_s17, %s4848_s2 }
 0x7b9   : > { %p3842_p7 = pnand %p3841_p0, %p4987_p10 }
 0x7ba   : > { %p3847_p9 = por %p3846_p5, %p3845_p6 }
 0x7bb   : > { %p3843_p2 = pneg %p3842_p7 }
 0x7bc   : > { %p3849_p8 = por %p3848_p4, %p3847_p9 }
 0x7be   : > { %p3850_p11 = pnand %p3849_p8, %p3843_p2 }
 0x7c0   : > { %3853 = shalt.err (!%p3850_p11)
}
 0x7c1   : > { %3409 = dma.vmem_to_hbm [thread:$0]  (%p4987_p10), %s4850_s1, 4096, %s4848_s2, %s2428_s4, %s3933_s14, %s3933_s14, %s3934_s30  }
 0x7c2 PF: > { %s2474_s9 = sand.u32 1, %s3904_s24   ;;  %p4990_p3 = scmp.ne.s32.totalorder %s4967_s15, 0 }
 0x7c3   : > { %p4991_p12 = scmp.ge.s32.totalorder %s3916_s27, 2  ;;  %s2475_s20 = scalar_lea.sflag [#allocation4], %s2474_s9 }
 0x7c5   : > { %p3442_p1 = pnand %p4991_p12, %p4990_p3 }
 0x7c7   : > { %3895 = dma.done.wait (!%p3442_p1), %s2475_s20, 4096  }
 0x7c8   : > { %3897 = vsyncadd (!%p3442_p1), %s2475_s20, 4294963200  ;;  %s2484_s23 = scalar_lea.sflag [#allocation19], %s2474_s9 }
 0x7c9   : > { %3899 = dma.done.wait (!%p3442_p1), %s2484_s23, 4096  }
 0x7ca   : > { %3901 = vsyncadd (!%p3442_p1), %s2484_s23, 4294963200  ;;  %s4992_s26 = sld [smem:[#allocation28_spill]]  ;;  %s4993_s16 = sld [smem:[#allocation29_spill]] }
 0x7cb   : > { %p40_p10 = scmp.ge.s32.totalorder %s4241_s18, 4   ;;  %s4994_s24 = smov %s3908_s25 }
 0x7cc   : > { %s4997_s27 = smov %s4241_s18 }
 0x7cd   :  { %42 = sbr.rel (!%p40_p10) target bundleno = 29 (0x1d), region = 187 }
 0x7d0   : > { %s4995_s25 = smov %s4992_s26  ;;  %s4996_s26 = smov %s4993_s16 }
 0x7d4   :  { %2489 = vsyncpa [#allocation3], 1 }
 0x7d5   :  { %2491 = vsyncpa [#allocation3 + $0x1], 1 }
 0x7d6   :  { %2492 = vsyncpa [#allocation6], 1 }
 0x7d7   :  { %2494 = vsyncpa [#allocation6 + $0x1], 1 }
 0x7d8   :  { %2495 = vsyncpa [#allocation9], 1 }
 0x7d9   :  { %2496 = vsyncpa [#allocation12], 1 }
 0x7da   :  { %2497 = vsyncpa [#allocation15], 1 }
 0x7db   :  { %2498 = vsyncpa [#allocation4], 1 }
 0x7dc   :  { %2500 = vsyncpa [#allocation4 + $0x1], 1 }
 0x7dd   :  { %2501 = vsyncpa [#allocation19], 1 }
 0x7de   :  { %2503 = vsyncpa [#allocation19 + $0x1], 1 }

// kernel: tpu_custom_call.1
= control target key start
LH: loop header
LB: loop body
LE: loop exit
PB: predicated region body
PF: predicated region fallthrough
CT: control target
= control target key end

     0   :  { %s4899_s0 = inlined_call_operand.hbm [shape: f32[256,256], index: 0, kind: input, shape index: {}]   ;;  %s4900_s1 = inlined_call_operand.hbm [shape: f32[256,128], index: 1, kind: input, shape index: {}]   ;;  %s4901_s2 = inlined_call_operand.hbm [shape: f32[256,128], index: 2, kind: input, shape index: {}]   ;;  %s4902_s3 = inlined_call_operand.vmem [shape: f32[1,128], index: 3, kind: input, shape index: {}]   ;;  %s4903_s4 = inlined_call_operand.hbm [shape: f32[128,128], index: 4, kind: input, shape index: {}]   ;;  %s4904_s5 = inlined_call_operand.vmem [shape: f32[1,128], index: 5, kind: input, shape index: {}]   ;;  %s4905_s6 = inlined_call_operand.hbm [shape: f32[128,128], index: 6, kind: input, shape index: {}]   ;;  %s4906_s7 = inlined_call_operand.vmem [shape: f32[1,128], index: 7, kind: input, shape index: {}]   ;;  %s4907_s8 = inlined_call_operand.hbm [shape: f32[128,256], index: 8, kind: input, shape index: {}]   ;;  %s4908_s9 = inlined_call_operand.vmem [shape: f32[1,256], index: 9, kind: input, shape index: {}]   ;;  %s4909_s10 = inlined_call_operand.hbm [shape: f32[128,128], index: 10, kind: input, shape index: {}]   ;;  %s4910_s11 = inlined_call_operand.vmem [shape: f32[1,128], index: 11, kind: input, shape index: {}]   ;;  %s4911_s12 = inlined_call_operand.hbm [shape: f32[128,128], index: 12, kind: input, shape index: {}]   ;;  %s4912_s13 = inlined_call_operand.vmem [shape: f32[1,128], index: 13, kind: input, shape index: {}]   ;;  %s4913_s14 = inlined_call_operand.hbm [shape: f32[128,256], index: 14, kind: input, shape index: {}]   ;;  %s4914_s15 = inlined_call_operand.vmem [shape: f32[1,256], index: 15, kind: input, shape index: {}]   ;;  %s4915_s16 = inlined_call_operand.hbm [shape: f32[256,256], index: 16, kind: output, shape index: {0}]   ;;  %s4916_s17 = inlined_call_operand.hbm [shape: f32[256,256], index: 17, kind: output, shape index: {1}]  }
   0x1   :  { %4933 = sst [smem:[#allocation30_spill]] %s4899_s0 }
   0x2   :  { %4934 = sst [smem:[#allocation31_spill]] %s4900_s1 }
   0x3   :  { %4935 = sst [smem:[#allocation32_spill]] %s4901_s2 }
   0x4   :  { %4936 = sst [smem:[#allocation33_spill]] %s4903_s4 }
   0x5   :  { %4937 = sst [smem:[#allocation34_spill]] %s4905_s6 }
   0x6   :  { %4938 = sst [smem:[#allocation35_spill]] %s4906_s7 }
   0x7   :  { %4939 = sst [smem:[#allocation36_spill]] %s4907_s8 }
   0x8   :  { %4940 = sst [smem:[#allocation37_spill]] %s4908_s9 }
   0x9   :  { %4941 = sst [smem:[#allocation38_spill]] %s4909_s10 }
   0xa   :  { %4942 = sst [smem:[#allocation39_spill]] %s4910_s11 }
   0xb   :  { %4943 = sst [smem:[#allocation40_spill]] %s4911_s12 }
   0xc   :  { %4944 = sst [smem:[#allocation41_spill]] %s4912_s13 }
   0xd   :  { %4945 = sst [smem:[#allocation42_spill]] %s4913_s14 }
   0xe   :  { %4946 = sst [smem:[#allocation43_spill]] %s4914_s15 }
   0xf   :  { %4947 = sst [smem:[#allocation44_spill]] %s4915_s16 }
  0x10   :  { %4948 = sst [smem:[#allocation45_spill]] %s4916_s17 }
  0x11   :  { %23 = vsyncpa [#allocation3], 0 }
  0x12   :  { %25 = vsyncpa [#allocation3 + $0x1], 0 }
  0x13   :  { %26 = vsyncpa [#allocation6], 0 }
  0x14   :  { %28 = vsyncpa [#allocation6 + $0x1], 0 }
  0x15   :  { %29 = vsyncpa [#allocation9], 0 }
  0x16   :  { %30 = vsyncpa [#allocation12], 0 }
  0x17   :  { %31 = vsyncpa [#allocation15], 0 }
  0x18   :  { %32 = vsyncpa [#allocation4], 0 }
  0x19   :  { %34 = vsyncpa [#allocation4 + $0x1], 0 }
  0x1a   :  { %35 = vsyncpa [#allocation19], 0 }
  0x1b   :  { %37 = vsyncpa [#allocation19 + $0x1], 0  ;;  %s4026_s24 = smov 0   ;;  %s4028_s25 = smov 0  }
  0x1c   :  { %s4030_s26 = smov 0   ;;  %s4032_s27 = smov 0  }
  0x1d LB: > { %4949 = sst [smem:[#allocation28_spill]] %s3912_s26  ;;  %s3918_s28 = smov [#allocation7]   ;;  %s3916_s27 = sphi %s4032_s27, %s4997_s27   ;;  %s3912_s26 = sphi %s4030_s26, %s4996_s26   ;;  %s3908_s25 = sphi %s4028_s25, %s4995_s25   ;;  %s3904_s24 = sphi %s4026_s24, %s4994_s24  }
  0x1e   : > { %s458_s29 = sshll.u32 %s3918_s28, 4  ;;  %s4047_s0 = sadd.s32 4294967295, %s3916_s27   ;;  %s4052_s29 = int_to_ptr.vmem [resolvable:$true] %s458_s29 }
  0x1f   : > { %p2654_p0 = scmp.ge.s32.totalorder %s3916_s27, 1  ;;  %p4925_p1 = scmp.eq.s32.totalorder %s4047_s0, 0 }
  0x20   : > { %p446_p2 = scmp.lt.s32.totalorder %s3916_s27, 3  ;;  %s3919_s18 = smov [#allocation8]  }
  0x21   : > { %s474_s19 = sshll.u32 %s3919_s18, 4  ;;  %s3920_s20 = smov [#allocation11]   ;;  %s4067_s19 = int_to_ptr.vmem [resolvable:$true] %s474_s19 }
  0x22   : > { %p4054_p3 = pnand %p2654_p0, %p446_p2  ;;  %s506_s21 = sshll.u32 %s3920_s20, 4  ;;  %s4069_s21 = int_to_ptr.vmem [resolvable:$true] %s506_s21 }
  0x23   : > { %s4952_s2 = sld [smem:[#allocation32_spill]] }
  0x24   : > { %s4950_s30 = scalar_select %p4054_p3, 1, 0 }
  0x25   : > { %p3412_p5 = pneg %p4054_p3 }
  0x27   : > { %p4063_p6 = pnand %p3412_p5, %p4925_p1 }
  0x29   : > { %s3542_s28 = scalar_lea.hbm %s4952_s2, 4096  ;;  %p4079_p8 = pneg %p4063_p6 }
  0x2a   : > { %p3543_p7 = scmp.ne.s32.totalorder %s4952_s2, %s3542_s28  ;;  %p3549_p11 = scmp.lt.u32.totalorder %s3542_s28, %s4952_s2 }
  0x2c   : > { %p3545_p9 = pnand %p4079_p8, %p3543_p7 }
  0x2e   : > { %p3546_p10 = pneg %p3545_p9 }
  0x30   : > { %p3551_p12 = pnand %p3549_p11, %p3546_p10 }
  0x32   : > { %3554 = shalt.err (!%p3551_p12)
}
  0x33   : > { %s3555_s15 = scalar_lea.vmem %s4052_s29, 4096  ;;  %p3563_p5 = scmp.lt.s32.totalorder %s4052_s29, %s4052_s29 }
  0x34   : > { %p3556_p13 = scmp.ne.s32.totalorder %s4052_s29, %s3555_s15  ;;  %p3564_p4 = scmp.lt.s32.totalorder %s3555_s15, %s3555_s15 }
  0x36   : > { %p3558_p0 = pnand %p3556_p13, %p4079_p8  ;;  %p3565_p7 = por %p3564_p4, %p3563_p5 }
  0x38   : > { %p3559_p2 = pneg %p3558_p0 }
  0x3a   : > { %p3566_p9 = pnand %p3565_p7, %p3559_p2 }
  0x3c   : > { %3569 = shalt.err (!%p3566_p9)
}
  0x3d   : > { %s4921_s17 = smov 128   ;;  %s4923_s16 = smov 8  }
  0x3e   : > { %3415 = dma.hbm_to_vmem [thread:$0]  (!%p4063_p6), %s4952_s2, 4096, %s4052_s29, [#allocation6], %s4921_s17, %s4921_s17, %s4923_s16  }
  0x3f   : > { %s4954_s4 = sld [smem:[#allocation33_spill]] }
  0x45   : > { %s3570_s15 = scalar_lea.hbm %s4954_s4, 2048 }
  0x46   : > { %p3571_p4 = scmp.ne.s32.totalorder %s4954_s4, %s3570_s15  ;;  %p3577_p12 = scmp.lt.u32.totalorder %s3570_s15, %s4954_s4 }
  0x48   : > { %p3573_p10 = pnand %p3571_p4, %p4079_p8 }
  0x4a   : > { %p3574_p11 = pneg %p3573_p10 }
  0x4c   : > { %p3579_p13 = pnand %p3577_p12, %p3574_p11 }
  0x4e   : > { %3582 = shalt.err (!%p3579_p13)
}
  0x4f   : > { %s3583_s29 = scalar_lea.vmem %s4067_s19, 2048  ;;  %p3591_p7 = scmp.lt.s32.totalorder %s4067_s19, %s4067_s19 }
  0x50   : > { %p3584_p0 = scmp.ne.s32.totalorder %s4067_s19, %s3583_s29  ;;  %p3592_p9 = scmp.lt.s32.totalorder %s3583_s29, %s3583_s29 }
  0x52   : > { %p3586_p2 = pnand %p3584_p0, %p4079_p8  ;;  %p3593_p4 = por %p3592_p9, %p3591_p7 }
  0x54   : > { %p3587_p5 = pneg %p3586_p2 }
  0x56   : > { %p3594_p10 = pnand %p3593_p4, %p3587_p5 }
  0x58   : > { %3597 = shalt.err (!%p3594_p10)
}
  0x59   : > { %3418 = dma.hbm_to_vmem [thread:$0]  (!%p4063_p6), %s4954_s4, 2048, %s4067_s19, [#allocation9], %s4921_s17, %s4921_s17, %s4923_s16  }
  0x5a   : > { %s4955_s8 = sld [smem:[#allocation36_spill]] }
  0x60   : > { %s3598_s22 = scalar_lea.hbm %s4955_s8, 4096 }
  0x61   : > { %p3599_p11 = scmp.ne.s32.totalorder %s4955_s8, %s3598_s22  ;;  %p3605_p0 = scmp.lt.u32.totalorder %s3598_s22, %s4955_s8 }
  0x63   : > { %p3601_p12 = pnand %p3599_p11, %p4079_p8 }
  0x65   : > { %p3602_p13 = pneg %p3601_p12 }
  0x67   : > { %p3607_p2 = pnand %p3605_p0, %p3602_p13 }
  0x69   : > { %3610 = shalt.err (!%p3607_p2)
}
  0x6a   : > { %s3611_s19 = scalar_lea.vmem %s4069_s21, 4096  ;;  %p3619_p4 = scmp.lt.s32.totalorder %s4069_s21, %s4069_s21 }
  0x6b   : > { %p3612_p5 = scmp.ne.s32.totalorder %s4069_s21, %s3611_s19  ;;  %p3620_p10 = scmp.lt.s32.totalorder %s3611_s19, %s3611_s19 }
  0x6d   : > { %p3614_p7 = pnand %p3612_p5, %p4079_p8  ;;  %p3621_p11 = por %p3620_p10, %p3619_p4 }
  0x6f   : > { %p3615_p9 = pneg %p3614_p7 }
  0x71   : > { %p3622_p12 = pnand %p3621_p11, %p3615_p9 }
  0x73   : > { %3625 = shalt.err (!%p3622_p12)
}
  0x74   : > { %s4927_s29 = smov 256   ;;  %s4929_s7 = smov 16  }
  0x75   : > { %3424 = dma.hbm_to_vmem [thread:$0]  (!%p4063_p6), %s4955_s8, 4096, %s4069_s21, [#allocation12], %s4927_s29, %s4927_s29, %s4929_s7  }
  0x76   : > { %s3925_s13 = smov [#allocation14]   ;;  %s3926_s23 = smov [#allocation10]  }
  0x77   : > { %s538_s22 = sshll.u32 %s3925_s13, 4  ;;  %s490_s28 = sshll.u32 %s3926_s23, 4  ;;  %s539_s22 = int_to_ptr.vmem [resolvable:$true] %s538_s22  ;;  %s491_s28 = int_to_ptr.vmem [resolvable:$true] %s490_s28 }
  0x78   : > { %s4956_s12 = sld [smem:[#allocation40_spill]] }
  0x7e   : > { %s3626_s19 = scalar_lea.hbm %s4956_s12, 2048 }
  0x7f   : > { %p3627_p13 = scmp.ne.s32.totalorder %s4956_s12, %s3626_s19  ;;  %p3633_p5 = scmp.lt.u32.totalorder %s3626_s19, %s4956_s12 }
  0x81   : > { %p3629_p0 = pnand %p3627_p13, %p4079_p8 }
  0x83   : > { %p3630_p2 = pneg %p3629_p0 }
  0x85   : > { %p3635_p7 = pnand %p3633_p5, %p3630_p2 }
  0x87   : > { %3638 = shalt.err (!%p3635_p7)
}
  0x88   : > { %s3639_s21 = scalar_lea.vmem %s539_s22, 2048  ;;  %p3647_p11 = scmp.lt.s32.totalorder %s539_s22, %s539_s22 }
  0x89   : > { %p3640_p9 = scmp.ne.s32.totalorder %s539_s22, %s3639_s21  ;;  %p3648_p12 = scmp.lt.s32.totalorder %s3639_s21, %s3639_s21 }
  0x8b   : > { %p3642_p4 = pnand %p3640_p9, %p4079_p8  ;;  %p3649_p1 = por %p3648_p12, %p3647_p11 }
  0x8d   : > { %p3643_p10 = pneg %p3642_p4 }
  0x8f   : > { %p3650_p3 = pnand %p3649_p1, %p3643_p10 }
  0x91   : > { %3653 = shalt.err (!%p3650_p3)
}
  0x92   : > { %s4957_s17 = smov 8   ;;  %s4958_s16 = smov 128  }
  0x93   : > { %3430 = dma.hbm_to_vmem [thread:$0]  (!%p4063_p6), %s4956_s12, 2048, %s539_s22, [#allocation15], %s4958_s16, %s4958_s16, %s4957_s17  }
  0x94   : > { %s4959_s6 = sld [smem:[#allocation34_spill]] }
  0x9a   : > { %s3654_s13 = scalar_lea.hbm %s4959_s6, 2048 }
  0x9b   : > { %p3655_p1 = scmp.ne.s32.totalorder %s4959_s6, %s3654_s13  ;;  %p3661_p0 = scmp.lt.u32.totalorder %s3654_s13, %s4959_s6 }
  0x9d   : > { %p3657_p3 = pnand %p3655_p1, %p4079_p8 }
  0x9f   : > { %p3658_p13 = pneg %p3657_p3 }
  0xa1   : > { %p3663_p2 = pnand %p3661_p0, %p3658_p13 }
  0xa3   : > { %3666 = shalt.err (!%p3663_p2)
}
  0xa4   : > { %s3667_s21 = scalar_lea.vmem %s491_s28, 2048  ;;  %p3675_p4 = scmp.lt.s32.totalorder %s491_s28, %s491_s28 }
  0xa5   : > { %p3668_p5 = scmp.ne.s32.totalorder %s491_s28, %s3667_s21  ;;  %p3676_p10 = scmp.lt.s32.totalorder %s3667_s21, %s3667_s21 }
  0xa7   : > { %p3670_p7 = pnand %p3668_p5, %p4079_p8  ;;  %p3677_p11 = por %p3676_p10, %p3675_p4 }
  0xa9   : > { %p3671_p9 = pneg %p3670_p7 }
  0xab   : > { %p3678_p12 = pnand %p3677_p11, %p3671_p9 }
  0xad   : > { %3681 = shalt.err (!%p3678_p12)
}
  0xae   : > { %3421 = dma.hbm_to_vmem [thread:$0]  (!%p4063_p6), %s4959_s6, 2048, %s491_s28, [#allocation9], %s4958_s16, %s4958_s16, %s4957_s17  }
  0xaf   : > { %s3927_s4 = smov [#allocation13]   ;;  %s3928_s11 = smov [#allocation16]  }
  0xb0   : > { %s522_s9 = sshll.u32 %s3927_s4, 4  ;;  %s554_s13 = sshll.u32 %s3928_s11, 4  ;;  %s523_s9 = int_to_ptr.vmem [resolvable:$true] %s522_s9  ;;  %s555_s13 = int_to_ptr.vmem [resolvable:$true] %s554_s13 }
  0xb1   : > { %s4960_s10 = sld [smem:[#allocation38_spill]] }
  0xb7   : > { %s3682_s15 = scalar_lea.hbm %s4960_s10, 2048 }
  0xb8   : > { %p3683_p1 = scmp.ne.s32.totalorder %s4960_s10, %s3682_s15  ;;  %p3689_p0 = scmp.lt.u32.totalorder %s3682_s15, %s4960_s10 }
  0xba   : > { %p3685_p3 = pnand %p3683_p1, %p4079_p8 }
  0xbc   : > { %p3686_p13 = pneg %p3685_p3 }
  0xbe   : > { %p3691_p2 = pnand %p3689_p0, %p3686_p13 }
  0xc0   : > { %3694 = shalt.err (!%p3691_p2)
}
  0xc1   : > { %s3695_s28 = scalar_lea.vmem %s523_s9, 2048  ;;  %p3703_p4 = scmp.lt.s32.totalorder %s523_s9, %s523_s9 }
  0xc2   : > { %p3696_p5 = scmp.ne.s32.totalorder %s523_s9, %s3695_s28  ;;  %p3704_p10 = scmp.lt.s32.totalorder %s3695_s28, %s3695_s28 }
  0xc4   : > { %p3698_p7 = pnand %p3696_p5, %p4079_p8  ;;  %p3705_p11 = por %p3704_p10, %p3703_p4 }
  0xc6   : > { %p3699_p9 = pneg %p3698_p7 }
  0xc8   : > { %p3706_p12 = pnand %p3705_p11, %p3699_p9 }
  0xca   : > { %3709 = shalt.err (!%p3706_p12)
}
  0xcb   : > { %3427 = dma.hbm_to_vmem [thread:$0]  (!%p4063_p6), %s4960_s10, 2048, %s523_s9, [#allocation12], %s4958_s16, %s4958_s16, %s4957_s17  }
  0xcc   : > { %s4961_s14 = sld [smem:[#allocation42_spill]] }
  0xd2   : > { %s3710_s23 = scalar_lea.hbm %s4961_s14, 4096 }
  0xd3   : > { %p3711_p1 = scmp.ne.s32.totalorder %s4961_s14, %s3710_s23  ;;  %p3717_p0 = scmp.lt.u32.totalorder %s3710_s23, %s4961_s14 }
  0xd5   : > { %p3713_p3 = pnand %p3711_p1, %p4079_p8 }
  0xd7   : > { %p3714_p13 = pneg %p3713_p3 }
  0xd9   : > { %p3719_p2 = pnand %p3717_p0, %p3714_p13 }
  0xdb   : > { %3722 = shalt.err (!%p3719_p2)
}
  0xdc   : > { %s3723_s22 = scalar_lea.vmem %s555_s13, 4096  ;;  %p3731_p4 = scmp.lt.s32.totalorder %s555_s13, %s555_s13 }
  0xdd   : > { %p3724_p5 = scmp.ne.s32.totalorder %s555_s13, %s3723_s22  ;;  %p3732_p10 = scmp.lt.s32.totalorder %s3723_s22, %s3723_s22 }
  0xdf   : > { %p3726_p7 = pnand %p3724_p5, %p4079_p8  ;;  %p3733_p11 = por %p3732_p10, %p3731_p4 }
  0xe1   : > { %p3727_p9 = pneg %p3726_p7 }
  0xe3   : > { %p3734_p12 = pnand %p3733_p11, %p3727_p9 }
  0xe5   : > { %3737 = shalt.err (!%p3734_p12)
}
  0xe6   : > { %s4962_s9 = smov 256   ;;  %s2653_s1 = sadd.s32 4294967294, %s3916_s27  }
  0xe7   : > { %3433 = dma.hbm_to_vmem [thread:$0]  (!%p4063_p6), %s4961_s14, 4096, %s555_s13, [#allocation15], %s4962_s9, %s4962_s9, %s4929_s7  }
  0xe8   : > { %s4241_s18 = sadd.s32 1, %s3916_s27   ;;  %s50_s2 = sadd.s32 1, %s3912_s26 }
  0xe9   : > { %s47_s4 = ssub.s32 %s3916_s27, %s4241_s18  ;;  %p57_p8 = scmp.ne.s32.totalorder %s3912_s26, %s3908_s25 }
  0xea   : > { %p48_p1 = scmp.eq.s32.totalorder %s47_s4, 0  ;;  %p58_p3 = scmp.eq.s32.totalorder %s3916_s27, 0 }
  0xeb   : > { %p63_p13 = scmp.ne.s32.totalorder %s3908_s25, %s3904_s24  ;;  %p407_p0 = scmp.eq.s32.totalorder %s4047_s0, 1 }
  0xec   : > { %s4253_s11 = scalar_select %p48_p1, %s3912_s26, %s50_s2  }
  0xed   : > { %p59_p2 = por %p58_p3, %p57_p8  ;;  %p4964_p5 = scmp.eq.s32.totalorder %s4047_s0, 0 }
  0xee   : > { %4963 = sst [smem:[#allocation29_spill]] %s4253_s11  ;;  %p4261_p6 = por %p407_p0, %p57_p8 }
  0xef   : > { %p4257_p7 = por %p4964_p5, %p63_p13  ;;  %p413_p9 = scmp.eq.s32.totalorder %s2653_s1, 1 }
  0xf0   : > { %s4966_s23 = scalar_select %p4261_p6, 1, 0 }
  0xf1   : > { %p3455_p4 = scmp.lt.s32.totalorder %s3916_s27, 2  ;;  %s4267_s20 = sand.u32 1, %s3912_s26  }
  0xf2   : > { %p4269_p10 = por %p413_p9, %p63_p13  ;;  %s2663_s19 = sshll.u32 %s4267_s20, 8 }
  0xf3   : > { %s2698_s21 = sshll.u32 %s3916_s27, 12  ;;  %s4968_s29 = sld [smem:[#allocation30_spill]] }
  0xf4   : > { %s4967_s15 = scalar_select %p4269_p10, 1, 0 }
  0xf5   : > { %s575_s1 = scalar_lea.vmem [#allocation2], %s2663_s19  ;;  %p4280_p11 = pnand %p3455_p4, %p59_p2 }
  0xf6   : > { %s583_s4 = sshll.u32 %s575_s1, 4  ;;  %s572_s8 = scalar_lea.sflag [#allocation3], %s4267_s20  ;;  %s4284_s4 = int_to_ptr.vmem [resolvable:$true] %s583_s4 }
  0xf7   : > { %p3740_p8 = pneg %p4280_p11 }
  0xf9   : > { %s4278_s2 = scalar_lea.hbm %s4968_s29, %s2698_s21  ;;  %s3743_s22 = scalar_lea.hbm %s4968_s29, 8192 }
  0xfa   : > { %s3738_s10 = scalar_lea.hbm %s4278_s2, 4096  ;;  %p3744_p13 = scmp.lt.u32.totalorder %s4278_s2, %s4968_s29 }
  0xfb   : > { %p3739_p12 = scmp.ne.s32.totalorder %s4278_s2, %s3738_s10  ;;  %p3745_p0 = scmp.lt.u32.totalorder %s3743_s22, %s3738_s10 }
  0xfc   : > { %p3747_p5 = scmp.lt.u32.totalorder %s3738_s10, %s4278_s2 }
  0xfd   : > { %p3741_p1 = pnand %p3740_p8, %p3739_p12  ;;  %p3746_p2 = por %p3745_p0, %p3744_p13 }
  0xff   : > { %p3742_p3 = pneg %p3741_p1  ;;  %p3748_p9 = por %p3747_p5, %p3746_p2 }
 0x101   : > { %p3749_p4 = pnand %p3748_p9, %p3742_p3 }
 0x103   : > { %3752 = shalt.err (!%p3749_p4)
}
 0x104   : > { %s3753_s6 = scalar_lea.vmem %s4284_s4, 4096  ;;  %s3929_s19 = smov [#allocation2]  }
 0x105   : > { %p3754_p12 = scmp.ne.s32.totalorder %s4284_s4, %s3753_s6  ;;  %s3758_s21 = sshll.u32 %s3929_s19, 4  ;;  %s3759_s21 = int_to_ptr.vmem [resolvable:$false] %s3758_s21 }
 0x106   : > { %s3760_s28 = scalar_lea.vmem %s3759_s21, 8192  ;;  %p3761_p6 = scmp.lt.s32.totalorder %s4284_s4, %s3759_s21 }
 0x107   : > { %p3756_p1 = pnand %p3754_p12, %p3740_p8  ;;  %p3762_p13 = scmp.lt.s32.totalorder %s3760_s28, %s3753_s6 }
 0x109   : > { %p3757_p10 = pneg %p3756_p1  ;;  %p3763_p0 = por %p3762_p13, %p3761_p6 }
 0x10b   : > { %p3764_p2 = pnand %p3763_p0, %p3757_p10 }
 0x10d   : > { %3767 = shalt.err (!%p3764_p2)
}
 0x10e   : > { %s4970_s10 = smov 16   ;;  %s2667_s22 = sshll.u32 %s4267_s20, 7 }
 0x10f   : > { %3437 = dma.hbm_to_vmem [thread:$0]  (!%p4280_p11), %s4278_s2, 4096, %s4284_s4, %s572_s8, %s4962_s9, %s4962_s9, %s4970_s10  }
 0x110   : > { %s2699_s1 = sshll.u32 %s3916_s27, 11  ;;  %s4971_s21 = sld [smem:[#allocation31_spill]] }
 0x111   : > { %s597_s12 = scalar_lea.vmem [#allocation5], %s2667_s22  ;;  %s4972_s29 = sand.u32 1, %s3916_s27  }
 0x112   : > { %s604_s14 = sshll.u32 %s597_s12, 4  ;;  %s4329_s11 = scalar_lea.sflag [#allocation6], %s4972_s29  ;;  %s4325_s14 = int_to_ptr.vmem [resolvable:$true] %s604_s14 }
 0x116   : > { %s4323_s28 = scalar_lea.hbm %s4971_s21, %s2699_s1  ;;  %s3773_s20 = scalar_lea.hbm %s4971_s21, 4096 }
 0x117   : > { %s3768_s26 = scalar_lea.hbm %s4323_s28, 2048  ;;  %p3774_p5 = scmp.lt.u32.totalorder %s4323_s28, %s4971_s21 }
 0x118   : > { %p3769_p6 = scmp.ne.s32.totalorder %s4323_s28, %s3768_s26  ;;  %p3775_p9 = scmp.lt.u32.totalorder %s3773_s20, %s3768_s26 }
 0x119   : > { %p3777_p12 = scmp.lt.u32.totalorder %s3768_s26, %s4323_s28 }
 0x11a   : > { %p3771_p10 = pnand %p3769_p6, %p3740_p8  ;;  %p3776_p4 = por %p3775_p9, %p3774_p5 }
 0x11c   : > { %p3772_p3 = pneg %p3771_p10  ;;  %p3778_p1 = por %p3777_p12, %p3776_p4 }
 0x11e   : > { %p3779_p13 = pnand %p3778_p1, %p3772_p3 }
 0x120   : > { %3782 = shalt.err (!%p3779_p13)
}
 0x121   : > { %s3783_s12 = scalar_lea.vmem %s4325_s14, 2048  ;;  %s3930_s29 = smov [#allocation5]  }
 0x122   : > { %p3784_p0 = scmp.ne.s32.totalorder %s4325_s14, %s3783_s12  ;;  %s3788_s10 = sshll.u32 %s3930_s29, 4  ;;  %s3789_s10 = int_to_ptr.vmem [resolvable:$false] %s3788_s10 }
 0x123   : > { %s3790_s22 = scalar_lea.vmem %s3789_s10, 4096  ;;  %p3791_p10 = scmp.lt.s32.totalorder %s4325_s14, %s3789_s10 }
 0x124   : > { %p3786_p2 = pnand %p3784_p0, %p3740_p8  ;;  %p3792_p5 = scmp.lt.s32.totalorder %s3790_s22, %s3783_s12 }
 0x126   : > { %p3787_p6 = pneg %p3786_p2  ;;  %p3793_p9 = por %p3792_p5, %p3791_p10 }
 0x128   : > { %p3794_p4 = pnand %p3793_p9, %p3787_p6 }
 0x12a   : > { %3797 = shalt.err (!%p3794_p4)
}
 0x12b   : > { %3440 = dma.hbm_to_vmem [thread:$0]  (!%p4280_p11), %s4323_s28, 2048, %s4325_s14, %s4329_s11, %s4958_s16, %s4958_s16, %s4957_s17  }
 0x12c   : > { %p4973_p8 = scmp.ne.s32.totalorder %s4950_s30, 0 }
 0x12d   : > { %s4361_s26 = sand.u32 (!%p4973_p8), 1, %s3908_s25  }
 0x12e   : > { %616 = sbr.rel (%p4973_p8) target bundleno = 1986 (0x7c2), region = 84  ;;  %s4364_s1 = sshll.u32 (!%p4973_p8), %s4361_s26, 8 }
 0x12f   : > { %s619_s7 = scalar_lea.sflag (!%p4973_p8), [#allocation3], %s4361_s26  ;;  %s4368_s6 = scalar_lea.vmem (!%p4973_p8), [#allocation2], %s4364_s1 }
 0x135   : > { %3871 = dma.done.wait (%p4257_p7), %s619_s7, 4096  }
 0x136   : > { %3873 = vsyncadd (%p4257_p7), %s619_s7, 4294963200  ;;  %s627_s14 = sand.u32 1, %s4047_s0   ;;  %s2672_s30 = sshll.u32 %s4361_s26, 7 }
 0x137   : > { %s628_s17 = scalar_lea.sflag [#allocation6], %s627_s14  ;;  %s4376_s16 = scalar_lea.vmem [#allocation5], %s2672_s30 }
 0x138   : > { %3875 = dma.done.wait (%p4257_p7), %s628_s17, 2048  }
 0x139   : > { %3877 = vsyncadd (%p4257_p7), %s628_s17, 4294965248  ;;  %p4974_p11 = scmp.eq.s32.totalorder %s4047_s0, 0 }
 0x13b   : > { %3879 = dma.done.wait (%p4974_p11), [#allocation6], 4096   ;;  %p4975_p3 = pmov %p4974_p11 }
 0x13d   : > { %3881 = vsyncadd (%p4975_p3), [#allocation6], 4294963200  ;;  %p4976_p12 = pmov %p4975_p3 }
 0x13e   : > { %p4977_p1 = pmov %p4975_p3 }
 0x13f   : > { %3883 = dma.done.wait (%p4976_p12), [#allocation9], 4096  }
 0x140   : > { %3885 = vsyncadd (%p4977_p1), [#allocation9], 4294963200  ;;  %p4978_p13 = pmov %p4977_p1 }
 0x141   : > { %p4979_p0 = pmov %p4977_p1 }
 0x142   : > { %3887 = dma.done.wait (%p4978_p13), [#allocation12], 6144  }
 0x143   : > { %3889 = vsyncadd (%p4979_p0), [#allocation12], 4294961152  ;;  %p4980_p7 = pmov %p4979_p0 }
 0x144   : > { %p4981_p2 = pmov %p4979_p0 }
 0x145   : > { %3891 = dma.done.wait (%p4980_p7), [#allocation15], 6144  }
 0x146   : > { %3893 = vsyncadd (%p4981_p2), [#allocation15], 4294961152  ;;  %v772_v0 = vld [vmem:[#allocation7 + $0x80] sm:$0xff]  ;;  %v773_v1 = vld [vmem:[#allocation7 + $0x88] sm:$0xff]  ;;  %s4982_s20 = sld [smem:[#allocation35_spill]]  ;;  %s4983_s12 = sld [smem:[#allocation37_spill]] }
 0x147   : > { %v756_v2 = vld [vmem:[#allocation7] sm:$0xff]  ;;  %v3136_v3 = vpack.c.bf16 %v773_v1, %v772_v0  ;;  %v757_v4 = vld [vmem:[#allocation7 + $0x8] sm:$0xff]  ;;  %v774_v5 = vld [vmem:[#allocation7 + $0x90] sm:$0xff]  ;;  %s4546_s29 = scalar_lea.vmem [#allocation17], %s4364_s1  ;;  %s4984_s7 = sld [smem:[#allocation39_spill]] }
 0x148   : > { %v775_v6 = vld [vmem:[#allocation7 + $0x98] sm:$0xff]  ;;  %v3138_v7 = vpack.c.bf16 %v757_v4, %v756_v2  ;;  %v758_v9 = vld [vmem:[#allocation7 + $0x10] sm:$0xff]  ;;  %v776_v11 = vld [vmem:[#allocation7 + $0xa0] sm:$0xff]  ;;  %s4985_s30 = sld [smem:[#allocation41_spill]]  ;;  %s2701_s17 = sshll.u32 %s4047_s0, 12 }
 0x149   : > { %v3140_v8 = vpack.c.bf16 %v775_v6, %v774_v5  ;;  %v759_v10 = vld [vmem:[#allocation7 + $0x18] sm:$0xff]  ;;  %3137 = vmatprep.subr.bf16.mxu0 %v3136_v3  ;;  %v777_v12 = vld [vmem:[#allocation7 + $0xa8] sm:$0xff]  ;;  %3360 = vmatprep.subr.bf16.mxu1 %v3136_v3  ;;  %v760_v15 = vld [vmem:[#allocation7 + $0x20] sm:$0xff]  ;;  %s4986_s19 = sld [smem:[#allocation44_spill]]  ;;  %s2423_s8 = scalar_lea.sflag [#allocation4], %s4361_s26 }
 0x14a   : > { %3139 = vmatpush3.bf16.msra.mxu0 %v3138_v7  ;;  %v3142_v13 = vpack.c.bf16 %v759_v10, %v758_v9  ;;  %3368 = vmatpush3.bf16.msra.mxu1 %v3138_v7  ;;  %v3144_v14 = vpack.c.bf16 %v777_v12, %v776_v11  ;;  %v761_v16 = vld [vmem:[#allocation7 + $0x28] sm:$0xff]  ;;  %v778_v17 = vld [vmem:[#allocation7 + $0xb0] sm:$0xff]  ;;  %v779_v18 = vld [vmem:[#allocation7 + $0xb8] sm:$0xff]  ;;  %p4987_p10 = scmp.ne.s32.totalorder %s4966_s23, 0 }
 0x14b   : > { %3141 = vmatprep.subr.bf16.mxu0 %v3140_v8  ;;  %3361 = vmatprep.subr.bf16.mxu1 %v3140_v8  ;;  %v3146_v19 = vpack.c.bf16 %v761_v16, %v760_v15  ;;  %v3148_v20 = vpack.c.bf16 %v779_v18, %v778_v17  ;;  %v762_v21 = vld [vmem:[#allocation7 + $0x30] sm:$0xff]  ;;  %v763_v22 = vld [vmem:[#allocation7 + $0x38] sm:$0xff]  ;;  %v780_v23 = vld [vmem:[#allocation7 + $0xc0] sm:$0xff] }
 0x14c   : > { %v781_v24 = vld [vmem:[#allocation7 + $0xc8] sm:$0xff]  ;;  %v3150_v26 = vpack.c.bf16 %v763_v22, %v762_v21  ;;  %v764_v28 = vld [vmem:[#allocation7 + $0x40] sm:$0xff]  ;;  %v782_v30 = vld [vmem:[#allocation7 + $0xd0] sm:$0xff] }
 0x14d   : > { %v725_v25 = vld [vmem:[%s4368_s6 + $0x8] sm:$0xff]  ;;  %v3152_v27 = vpack.c.bf16 %v781_v24, %v780_v23  ;;  %v783_v31 = vld [vmem:[#allocation7 + $0xd8] sm:$0xff]  ;;  %v766_v35 = vld [vmem:[#allocation7 + $0x50] sm:$0xff] }
 0x14e   : > { %3143 = vmatpush3.bf16.msra.mxu0 %v3142_v13  ;;  %3369 = vmatpush3.bf16.msra.mxu1 %v3142_v13  ;;  %v765_v29 = vld [vmem:[#allocation7 + $0x48] sm:$0xff]  ;;  %v3156_v34 = vpack.c.bf16 %v783_v31, %v782_v30  ;;  %v767_v36 = vld [vmem:[#allocation7 + $0x58] sm:$0xff]  ;;  %v784_v37 = vld [vmem:[#allocation7 + $0xe0] sm:$0xff] }
 0x14f   : > { %3145 = vmatprep.subr.bf16.mxu0 %v3144_v14  ;;  %3362 = vmatprep.subr.bf16.mxu1 %v3144_v14  ;;  %v741_v32 = vld [vmem:[%s4368_s6 + $0x88] sm:$0xff]  ;;  %v3154_v33 = vpack.c.bf16 %v765_v29, %v764_v28  ;;  %v3158_v39 = vpack.c.bf16 %v767_v36, %v766_v35  ;;  %v768_v41 = vld [vmem:[#allocation7 + $0x60] sm:$0xff]  ;;  %v786_v43 = vld [vmem:[#allocation7 + $0xf0] sm:$0xff]  ;;  %s4735_s28 = scalar_lea.hbm %s4986_s19, %s2701_s17 }
 0x150   : > { %859 = vmatprep.mubr.f32.mxu0 %v725_v25  ;;  %899 = vmatprep.mubr.f32.mxu1 %v741_v32  ;;  %v785_v38 = vld [vmem:[#allocation7 + $0xe8] sm:$0xff]  ;;  %v787_v44 = vld [vmem:[#allocation7 + $0xf8] sm:$0xff]  ;;  %v770_v47 = vld [vmem:[#allocation7 + $0x70] sm:$0xff] }
 0x151   : > { %v3160_v40 = vpack.c.bf16 %v785_v38, %v784_v37  ;;  %v769_v42 = vld [vmem:[#allocation7 + $0x68] sm:$0xff]  ;;  %v3164_v46 = vpack.c.bf16 %v787_v44, %v786_v43  ;;  %v771_v48 = vld [vmem:[#allocation7 + $0x78] sm:$0xff]  ;;  %v988_v49 = vld [vmem:[#allocation8] sm:$0xff] }
 0x152   : > { %3147 = vmatpush3.bf16.msra.mxu0 %v3146_v19  ;;  %3370 = vmatpush3.bf16.msra.mxu1 %v3146_v19  ;;  %v3162_v45 = vpack.c.bf16 %v769_v42, %v768_v41  ;;  %v989_v50 = vld [vmem:[#allocation8 + $0x8] sm:$0xff]  ;;  %v3166_v51 = vpack.c.bf16 %v771_v48, %v770_v47  ;;  %v990_v53 = vld [vmem:[#allocation8 + $0x10] sm:$0xff]  ;;  %v991_v54 = vld [vmem:[#allocation8 + $0x18] sm:$0xff] }
 0x153   : > { %3149 = vmatprep.subr.bf16.mxu0 %v3148_v20  ;;  %3363 = vmatprep.subr.bf16.mxu1 %v3148_v20  ;;  %v3168_v52 = vpack.c.bf16 %v989_v50, %v988_v49  ;;  %v724_v55 = vld [vmem:[%s4368_s6] sm:$0xff]  ;;  %v727_v57 = vld [vmem:[%s4368_s6 + $0x18] sm:$0xff]  ;;  %v3172_v59 = vpack.c.bf16 %v991_v54, %v990_v53  ;;  %v993_v61 = vld [vmem:[#allocation8 + $0x28] sm:$0xff] }
 0x154   : > { %v740_v56 = vld [vmem:[%s4368_s6 + $0x80] sm:$0xff]  ;;  %v743_v58 = vld [vmem:[%s4368_s6 + $0x98] sm:$0xff]  ;;  %v726_v62 = vld [vmem:[%s4368_s6 + $0x10] sm:$0xff] }
 0x155   : > { %v992_v60 = vld [vmem:[#allocation8 + $0x20] sm:$0xff]  ;;  %v742_v63 = vld [vmem:[%s4368_s6 + $0x90] sm:$0xff]  ;;  %v729_v0 = vld [vmem:[%s4368_s6 + $0x28] sm:$0xff] }
 0x156   : > { %3151 = vmatpush3.bf16.msra.mxu0 %v3150_v26  ;;  %3371 = vmatpush3.bf16.msra.mxu1 %v3150_v26  ;;  %v745_v1 = vld [vmem:[%s4368_s6 + $0xa8] sm:$0xff]  ;;  %v3176_v2 = vpack.c.bf16 %v993_v61, %v992_v60  ;;  %v994_v3 = vld [vmem:[#allocation8 + $0x30] sm:$0xff]  ;;  %v995_v4 = vld [vmem:[#allocation8 + $0x38] sm:$0xff] }
 0x157   : > { %3153 = vmatprep.subr.bf16.mxu0 %v3152_v27  ;;  %3364 = vmatprep.subr.bf16.mxu1 %v3152_v27  ;;  %v728_v5 = vld [vmem:[%s4368_s6 + $0x20] sm:$0xff]  ;;  %v731_v7 = vld [vmem:[%s4368_s6 + $0x38] sm:$0xff]  ;;  %v3180_v9 = vpack.c.bf16 %v995_v4, %v994_v3  ;;  %v997_v11 = vld [vmem:[#allocation8 + $0x48] sm:$0xff] }
 0x158   : > { %v744_v6 = vld [vmem:[%s4368_s6 + $0xa0] sm:$0xff]  ;;  %v747_v8 = vld [vmem:[%s4368_s6 + $0xb8] sm:$0xff]  ;;  %v730_v12 = vld [vmem:[%s4368_s6 + $0x30] sm:$0xff] }
 0x159   : > { %v996_v10 = vld [vmem:[#allocation8 + $0x40] sm:$0xff]  ;;  %v746_v13 = vld [vmem:[%s4368_s6 + $0xb0] sm:$0xff]  ;;  %v733_v14 = vld [vmem:[%s4368_s6 + $0x48] sm:$0xff] }
 0x15a   : > { %3155 = vmatpush3.bf16.msra.mxu0 %v3154_v33  ;;  %3372 = vmatpush3.bf16.msra.mxu1 %v3154_v33  ;;  %v749_v15 = vld [vmem:[%s4368_s6 + $0xc8] sm:$0xff]  ;;  %v3184_v16 = vpack.c.bf16 %v997_v11, %v996_v10  ;;  %v732_v17 = vld [vmem:[%s4368_s6 + $0x40] sm:$0xff]  ;;  %v735_v19 = vld [vmem:[%s4368_s6 + $0x58] sm:$0xff] }
 0x15b   : > { %3157 = vmatprep.subr.bf16.mxu0 %v3156_v34  ;;  %3365 = vmatprep.subr.bf16.mxu1 %v3156_v34  ;;  %v748_v18 = vld [vmem:[%s4368_s6 + $0xc0] sm:$0xff]  ;;  %v751_v20 = vld [vmem:[%s4368_s6 + $0xd8] sm:$0xff]  ;;  %v734_v21 = vld [vmem:[%s4368_s6 + $0x50] sm:$0xff] }
 0x15c   : > { %v750_v22 = vld [vmem:[%s4368_s6 + $0xd0] sm:$0xff]  ;;  %v737_v23 = vld [vmem:[%s4368_s6 + $0x68] sm:$0xff]  ;;  %v736_v25 = vld [vmem:[%s4368_s6 + $0x60] sm:$0xff] }
 0x15d   : > { %v753_v24 = vld [vmem:[%s4368_s6 + $0xe8] sm:$0xff]  ;;  %v752_v26 = vld [vmem:[%s4368_s6 + $0xe0] sm:$0xff]  ;;  %v739_v27 = vld [vmem:[%s4368_s6 + $0x78] sm:$0xff] }
 0x15e   : > { %3159 = vmatpush3.bf16.msra.mxu0 %v3158_v39  ;;  %3373 = vmatpush3.bf16.msra.mxu1 %v3158_v39  ;;  %v755_v28 = vld [vmem:[%s4368_s6 + $0xf8] sm:$0xff]  ;;  %v738_v29 = vld [vmem:[%s4368_s6 + $0x70] sm:$0xff]  ;;  %v1000_v34 = vld [vmem:[#allocation8 + $0x60] sm:$0xff] }
 0x15f   : > { %3161 = vmatprep.subr.bf16.mxu0 %v3160_v40  ;;  %3366 = vmatprep.subr.bf16.mxu1 %v3160_v40  ;;  %v754_v30 = vld [vmem:[%s4368_s6 + $0xf0] sm:$0xff]  ;;  %v999_v32 = vld [vmem:[#allocation8 + $0x58] sm:$0xff]  ;;  %v1001_v35 = vld [vmem:[#allocation8 + $0x68] sm:$0xff] }
 0x160   : > { %v998_v31 = vld [vmem:[#allocation8 + $0x50] sm:$0xff]  ;;  %v3192_v36 = vpack.c.bf16 %v1001_v35, %v1000_v34  ;;  %v1003_v38 = vld [vmem:[#allocation8 + $0x78] sm:$0xff]  ;;  %v1204_v40 = vld [vmem:[#allocation10] sm:$0xff] }
 0x161   : > { %v3188_v33 = vpack.c.bf16 %v999_v32, %v998_v31  ;;  %v1002_v37 = vld [vmem:[#allocation8 + $0x70] sm:$0xff]  ;;  %v1205_v41 = vld [vmem:[#allocation10 + $0x8] sm:$0xff]  ;;  %v1208_v10 = vld [vmem:[#allocation10 + $0x20] sm:$0xff] }
 0x162   : > { %3163 = vmatpush3.bf16.msra.mxu0 %v3162_v45  ;;  %3374 = vmatpush3.bf16.msra.mxu1 %v3162_v45  ;;  %v3196_v39 = vpack.c.bf16 %v1003_v38, %v1002_v37  ;;  %v3200_v42 = vpack.c.bf16 %v1205_v41, %v1204_v40  ;;  %v4433_v45 = vld [vmem:[%s4902_s3] ss:$0 sm:$0xff]  ;;  %v1209_v11 = vld [vmem:[#allocation10 + $0x28] sm:$0xff] }
 0x163   : > { %3165 = vmatprep.subr.bf16.mxu0 %v3164_v46  ;;  %3367 = vmatprep.subr.bf16.mxu1 %v3164_v46  ;;  %v1212_v34 = vld [vmem:[#allocation10 + $0x40] sm:$0xff]  ;;  %v1213_v35 = vld [vmem:[#allocation10 + $0x48] sm:$0xff] }
 0x164   : > { %v3216_v41 = vpack.c.bf16 %v1213_v35, %v1212_v34  ;;  %v1423_v34 = vld [vmem:[#allocation11 + $0x18] sm:$0xff]  ;;  %v1420_v35 = vld [vmem:[#allocation11] sm:$0xff] }
 0x166   : > { %3167 = vmatpush3.bf16.msra.mxu0 %v3166_v51  ;;  %3375 = vmatpush3.bf16.msra.mxu1 %v3166_v51 }
 0x167   : > { %3169 = vmatprep.subr.bf16.mxu1 %v3168_v52 }
 0x169   : > { %860 = vmatmul.mubr.f32.vlgmr.msra.gmra.mrb[0].mxu0 %v724_v55  ;;  %900 = vmatmul.mubr.f32.vlgmr.msra.gmra.mrb[0].mxu1 %v740_v56 }
 0x16a   : > { %864 = vmatprep.mubr.f32.mxu0 %v727_v57  ;;  %904 = vmatprep.mubr.f32.mxu1 %v743_v58 }
 0x16b   : > { %3171 = vmatpush3.bf16.msra.mxu1 %v3168_v52 }
 0x16c   : > { %3173 = vmatprep.subr.bf16.mxu1 %v3172_v59 }
 0x16d   : > { %865 = vmatmul.mubr.f32.gmra.mrb[2].mxu0 %v726_v62  ;;  %905 = vmatmul.mubr.f32.gmra.mrb[2].mxu1 %v742_v63  ;;  %v1206_v62 = vld [vmem:[#allocation10 + $0x10] sm:$0xff]  ;;  %v1207_v63 = vld [vmem:[#allocation10 + $0x18] sm:$0xff] }
 0x16e   : > { %869 = vmatprep.mubr.f32.mxu0 %v729_v0  ;;  %909 = vmatprep.mubr.f32.mxu1 %v745_v1 }
 0x16f   : > { %3175 = vmatpush3.bf16.msra.mxu1 %v3172_v59 }
 0x170   : > { %3177 = vmatprep.subr.bf16.mxu1 %v3176_v2 }
 0x171   : > { %870 = vmatmul.mubr.f32.gmra.mrb[4].mxu0 %v728_v5  ;;  %910 = vmatmul.mubr.f32.gmra.mrb[4].mxu1 %v744_v6  ;;  %v3204_v5 = vpack.c.bf16 %v1207_v63, %v1206_v62  ;;  %v1216_v62 = vld [vmem:[#allocation10 + $0x60] sm:$0xff]  ;;  %v1217_v63 = vld [vmem:[#allocation10 + $0x68] sm:$0xff] }
 0x172   : > { %874 = vmatprep.mubr.f32.mxu0 %v731_v7  ;;  %914 = vmatprep.mubr.f32.mxu1 %v747_v8 }
 0x173   : > { %3179 = vmatpush3.bf16.msra.mxu1 %v3176_v2 }
 0x174   : > { %3181 = vmatprep.subr.bf16.mxu1 %v3180_v9 }
 0x175   : > { %875 = vmatmul.mubr.f32.gmra.mrb[6].mxu0 %v730_v12  ;;  %915 = vmatmul.mubr.f32.gmra.mrb[6].mxu1 %v746_v13 }
 0x176   : > { %879 = vmatprep.mubr.f32.mxu0 %v733_v14  ;;  %919 = vmatprep.mubr.f32.mxu1 %v749_v15 }
 0x177   : > { %3183 = vmatpush3.bf16.msra.mxu1 %v3180_v9 }
 0x178   : > { %3185 = vmatprep.subr.bf16.mxu1 %v3184_v16 }
 0x179   : > { %880 = vmatmul.mubr.f32.gmra.mrb[8].mxu0 %v732_v17  ;;  %920 = vmatmul.mubr.f32.gmra.mrb[8].mxu1 %v748_v18  ;;  %v3208_v17 = vpack.c.bf16 %v1209_v11, %v1208_v10 }
 0x17a   : > { %884 = vmatprep.mubr.f32.mxu0 %v735_v19  ;;  %924 = vmatprep.mubr.f32.mxu1 %v751_v20 }
 0x17b   : > { %3187 = vmatpush3.bf16.msra.mxu1 %v3184_v16 }
 0x17c   : > { %3189 = vmatprep.subr.bf16.mxu1 %v3188_v33 }
 0x17d   : > { %885 = vmatmul.mubr.f32.gmra.mrb[10].mxu0 %v734_v21  ;;  %925 = vmatmul.mubr.f32.gmra.mrb[10].mxu1 %v750_v22  ;;  %v1210_v22 = vld [vmem:[#allocation10 + $0x30] sm:$0xff] }
 0x17e   : > { %889 = vmatprep.mubr.f32.mxu0 %v737_v23  ;;  %929 = vmatprep.mubr.f32.mxu1 %v753_v24  ;;  %v1211_v23 = vld [vmem:[#allocation10 + $0x38] sm:$0xff] }
 0x17f   : > { %3191 = vmatpush3.bf16.msra.mxu1 %v3188_v33 }
 0x180   : > { %3193 = vmatprep.subr.bf16.mxu1 %v3192_v36 }
 0x181   : > { %890 = vmatmul.mubr.f32.gmra.mrb[12].mxu0 %v736_v25  ;;  %930 = vmatmul.mubr.f32.gmra.mrb[12].mxu1 %v752_v26 }
 0x182   : > { %894 = vmatprep.mubr.f32.mxu0 %v739_v27  ;;  %934 = vmatprep.mubr.f32.mxu1 %v755_v28 }
 0x183   : > { %3195 = vmatpush3.bf16.msra.mxu1 %v3192_v36 }
 0x184   : > { %3197 = vmatprep.subr.bf16.mxu1 %v3196_v39 }
 0x185   : > { %895 = vmatmul.mubr.f32.gmra.mrb[14].mxu0 %v738_v29  ;;  %935 = vmatmul.mubr.f32.gmra.mrb[14].mxu1 %v754_v30  ;;  %v3212_v29 = vpack.c.bf16 %v1211_v23, %v1210_v22 }
 0x187   : > { %3199 = vmatpush3.bf16.msra.mxu1 %v3196_v39 }
 0x188   : > { %3201 = vmatprep.subr.bf16.mxu1 %v3200_v42 }
 0x23c   : > { %v2736_v43 = vpop.f32.mrb[0].mxu0  ;;  %v2760_v44 = vpop.f32.mrb[0].mxu1 }
 0x23d   : > { %v2737_v46 = vpop.f32.mrb[1].mxu0  ;;  %v2761_v47 = vpop.f32.mrb[1].mxu1 }
 0x23e   : > { %v2738_v48 = vadd.f32 %v2737_v46, %v2736_v43  ;;  %v4435_v49 = vadd.f32 %v2761_v47, %v2760_v44  ;;  %v1214_v47 = vld [vmem:[#allocation10 + $0x50] sm:$0xff] }
 0x240   : > { %v862_v50 = vadd.f32 %v2738_v48, %v4433_v45  ;;  %v2739_v51 = vpop.f32.mrb[2].mxu0  ;;  %v2763_v52 = vpop.f32.mrb[2].mxu1  ;;  %v1215_v48 = vld [vmem:[#allocation10 + $0x58] sm:$0xff] }
 0x241   : > { %v2740_v53 = vpop.f32.mrb[3].mxu0  ;;  %v2764_v54 = vpop.f32.mrb[3].mxu1 }
 0x242   : > { %v2741_v55 = vadd.f32 %v2740_v53, %v2739_v51  ;;  %vm940_vm0 = vcmp.ge.f32.partialorder %v862_v50, 0.0  ;;  %v956_v56 = vmul.f32 0.01, %v862_v50  ;;  %v4438_v57 = vadd.f32 %v2764_v54, %v2763_v52 }
 0x244   : > { %v867_v58 = vadd.f32 %v2741_v55, %v4433_v45  ;;  %v2742_v59 = vpop.f32.mrb[4].mxu0  ;;  %v972_v60 = vsel %vm940_vm0, %v862_v50, %v956_v56  ;;  %v2766_v61 = vpop.f32.mrb[4].mxu1  ;;  %v902_v55 = vadd.f32 %v4435_v49, %v4433_v45  ;;  %v3220_v56 = vpack.c.bf16 %v1215_v48, %v1214_v47 }
 0x245   : > { %v2743_v0 = vpop.f32.mrb[5].mxu0  ;;  %2944 = vmatprep.mubr.f32.mxu1 %v972_v60  ;;  %v2767_v1 = vpop.f32.mrb[5].mxu1 }
 0x246   : > { %vm941_vm1 = vcmp.ge.f32.partialorder %v867_v58, 0.0  ;;  %v957_v2 = vmul.f32 0.01, %v867_v58  ;;  %v2744_v3 = vadd.f32 %v2743_v0, %v2742_v59  ;;  %v4441_v4 = vadd.f32 %v2767_v1, %v2766_v61 }
 0x247   : > { %v907_v1 = vadd.f32 %v4438_v57, %v4433_v45  ;;  %vm948_vm7 = vcmp.ge.f32.partialorder %v902_v55, 0.0 }
 0x248   : > { %v872_v6 = vadd.f32 %v2744_v3, %v4433_v45  ;;  %v2745_v7 = vpop.f32.mrb[6].mxu0  ;;  %v973_v8 = vsel %vm941_vm1, %v867_v58, %v957_v2  ;;  %v2769_v9 = vpop.f32.mrb[6].mxu1  ;;  %v912_v49 = vadd.f32 %v4441_v4, %v4433_v45 }
 0x249   : > { %v2746_v12 = vpop.f32.mrb[7].mxu0  ;;  %2945 = vmatmul.mubr.f32.vlgmr.msra.gmra.mrb[16].mxu1 %v973_v8  ;;  %v2770_v13 = vpop.f32.mrb[7].mxu1  ;;  %v3224_v8 = vpack.c.bf16 %v1217_v63, %v1216_v62  ;;  %vm949_vm9 = vcmp.ge.f32.partialorder %v907_v1, 0.0  ;;  %v1436_v63 = vld [vmem:[#allocation11 + $0x80] sm:$0xff] }
 0x24a   : > { %v2747_v14 = vadd.f32 %v2746_v12, %v2745_v7  ;;  %vm942_vm2 = vcmp.ge.f32.partialorder %v872_v6, 0.0  ;;  %v958_v15 = vmul.f32 0.01, %v872_v6  ;;  %v4444_v16 = vadd.f32 %v2770_v13, %v2769_v9  ;;  %3203 = vmatpush3.bf16.msra.mxu1 %v3200_v42 }
 0x24b   : > { %3205 = vmatprep.subr.bf16.mxu1 %v3204_v5  ;;  %v964_v7 = vmul.f32 0.01, %v902_v55  ;;  %v965_v12 = vmul.f32 0.01, %v907_v1  ;;  %v966_v4 = vmul.f32 0.01, %v912_v49 }
 0x24c   : > { %v877_v18 = vadd.f32 %v2747_v14, %v4433_v45  ;;  %v2748_v19 = vpop.f32.mrb[8].mxu0  ;;  %v974_v20 = vsel %vm942_vm2, %v872_v6, %v958_v15  ;;  %v2772_v21 = vpop.f32.mrb[8].mxu1  ;;  %v917_v57 = vadd.f32 %v4444_v16, %v4433_v45  ;;  %vm950_vm10 = vcmp.ge.f32.partialorder %v912_v49, 0.0 }
 0x24d   : > { %v2749_v24 = vpop.f32.mrb[9].mxu0  ;;  %2947 = vmatprep.mubr.f32.mxu1 %v974_v20  ;;  %v2773_v25 = vpop.f32.mrb[9].mxu1  ;;  %v980_v13 = vsel %vm948_vm7, %v902_v55, %v964_v7  ;;  %v982_v16 = vsel %vm950_vm10, %v912_v49, %v966_v4  ;;  %v1442_v49 = vld [vmem:[#allocation11 + $0xb0] sm:$0xff]  ;;  %v1445_v7 = vld [vmem:[#allocation11 + $0xc8] sm:$0xff] }
 0x24e   : > { %v2750_v26 = vadd.f32 %v2749_v24, %v2748_v19  ;;  %vm943_vm3 = vcmp.ge.f32.partialorder %v877_v18, 0.0  ;;  %v959_v27 = vmul.f32 0.01, %v877_v18  ;;  %v4447_v28 = vadd.f32 %v2773_v25, %v2772_v21  ;;  %3207 = vmatpush3.bf16.msra.mxu1 %v3204_v5 }
 0x24f   : > { %3209 = vmatprep.subr.bf16.mxu1 %v3208_v17  ;;  %v967_v19 = vmul.f32 0.01, %v917_v57  ;;  %vm951_vm11 = vcmp.ge.f32.partialorder %v917_v57, 0.0 }
 0x250   : > { %v882_v30 = vadd.f32 %v2750_v26, %v4433_v45  ;;  %v2751_v31 = vpop.f32.mrb[10].mxu0  ;;  %v975_v32 = vsel %vm943_vm3, %v877_v18, %v959_v27  ;;  %v2775_v33 = vpop.f32.mrb[10].mxu1  ;;  %v922_v14 = vadd.f32 %v4447_v28, %v4433_v45 }
 0x251   : > { %v2752_v36 = vpop.f32.mrb[11].mxu0  ;;  %2948 = vmatmul.mubr.f32.gmra.mrb[18].mxu1 %v975_v32  ;;  %v2776_v37 = vpop.f32.mrb[11].mxu1  ;;  %v983_v22 = vsel %vm951_vm11, %v917_v57, %v967_v19  ;;  %v1219_v32 = vld [vmem:[#allocation10 + $0x78] sm:$0xff]  ;;  %v1444_v57 = vld [vmem:[#allocation11 + $0xc0] sm:$0xff] }
 0x252   : > { %v2753_v38 = vadd.f32 %v2752_v36, %v2751_v31  ;;  %vm944_vm4 = vcmp.ge.f32.partialorder %v882_v30, 0.0  ;;  %v960_v39 = vmul.f32 0.01, %v882_v30  ;;  %v2777_v40 = vadd.f32 %v2776_v37, %v2775_v33  ;;  %3211 = vmatpush3.bf16.msra.mxu1 %v3208_v17  ;;  %v1218_v31 = vld [vmem:[#allocation10 + $0x70] sm:$0xff] }
 0x253   : > { %3213 = vmatprep.subr.bf16.mxu1 %v3212_v29  ;;  %v981_v17 = vsel %vm949_vm9, %v907_v1, %v965_v12  ;;  %v968_v21 = vmul.f32 0.01, %v922_v14  ;;  %vm952_vm12 = vcmp.ge.f32.partialorder %v922_v14, 0.0  ;;  %v3228_v33 = vpack.c.bf16 %v1219_v32, %v1218_v31  ;;  %v1422_v37 = vld [vmem:[#allocation11 + $0x10] sm:$0xff]  ;;  %v1441_v1 = vld [vmem:[#allocation11 + $0xa8] sm:$0xff] }
 0x254   : > { %v887_v42 = vadd.f32 %v2753_v38, %v4433_v45  ;;  %v2754_v43 = vpop.f32.mrb[12].mxu0  ;;  %v976_v44 = vsel %vm944_vm4, %v882_v30, %v960_v39  ;;  %v2778_v46 = vpop.f32.mrb[12].mxu1  ;;  %v927_v18 = vadd.f32 %v2777_v40, %v4433_v45  ;;  %v1425_v38 = vld [vmem:[#allocation11 + $0x28] sm:$0xff]  ;;  %v1427_v39 = vld [vmem:[#allocation11 + $0x38] sm:$0xff]  ;;  %v3234_v40 = vpack.c.bf16 %v1422_v37, %v1420_v35 }
 0x255   : > { %v2755_v50 = vpop.f32.mrb[13].mxu0  ;;  %2950 = vmatprep.mubr.f32.mxu1 %v976_v44  ;;  %v2779_v51 = vpop.f32.mrb[13].mxu1  ;;  %v984_v25 = vsel %vm952_vm12, %v922_v14, %v968_v21  ;;  %v1429_v44 = vld [vmem:[#allocation11 + $0x48] sm:$0xff] }
 0x256   : > { %v2756_v52 = vadd.f32 %v2755_v50, %v2754_v43  ;;  %vm945_vm5 = vcmp.ge.f32.partialorder %v887_v42, 0.0  ;;  %v961_v53 = vmul.f32 0.01, %v887_v42  ;;  %v2780_v54 = vadd.f32 %v2779_v51, %v2778_v46  ;;  %3215 = vmatpush3.bf16.msra.mxu1 %v3212_v29  ;;  %v1426_v43 = vld [vmem:[#allocation11 + $0x30] sm:$0xff]  ;;  %v1431_v46 = vld [vmem:[#allocation11 + $0x58] sm:$0xff]  ;;  %v1428_v50 = vld [vmem:[#allocation11 + $0x40] sm:$0xff] }
 0x257   : > { %3217 = vmatprep.subr.bf16.mxu1 %v3216_v41  ;;  %v969_v24 = vmul.f32 0.01, %v927_v18  ;;  %vm953_vm13 = vcmp.ge.f32.partialorder %v927_v18, 0.0  ;;  %v3240_v48 = vpack.c.bf16 %v1431_v46, %v1429_v44  ;;  %v1430_v51 = vld [vmem:[#allocation11 + $0x50] sm:$0xff] }
 0x258   : > { %v892_v58 = vadd.f32 %v2756_v52, %v4433_v45  ;;  %v2757_v59 = vpop.f32.mrb[14].mxu0  ;;  %v977_v60 = vsel %vm945_vm5, %v887_v42, %v961_v53  ;;  %v2781_v61 = vpop.f32.mrb[14].mxu1  ;;  %v932_v20 = vadd.f32 %v2780_v54, %v4433_v45  ;;  %v1424_v42 = vld [vmem:[#allocation11 + $0x20] sm:$0xff]  ;;  %v1433_v52 = vld [vmem:[#allocation11 + $0x68] sm:$0xff]  ;;  %v1435_v53 = vld [vmem:[#allocation11 + $0x78] sm:$0xff]  ;;  %v3242_v54 = vpack.c.bf16 %v1430_v51, %v1428_v50 }
 0x259   : > { %v2758_v0 = vpop.f32.mrb[15].mxu0  ;;  %2951 = vmatmul.mubr.f32.gmra.mrb[20].mxu1 %v977_v60  ;;  %v2782_v2 = vpop.f32.mrb[15].mxu1  ;;  %v985_v27 = vsel %vm953_vm13, %v927_v18, %v969_v24  ;;  %v3238_v47 = vpack.c.bf16 %v1426_v43, %v1424_v42  ;;  %v3244_v55 = vpack.c.bf16 %v1435_v53, %v1433_v52  ;;  %v1439_v60 = vld [vmem:[#allocation11 + $0x98] sm:$0xff] }
 0x25a   : > { %v2759_v3 = vadd.f32 %v2758_v0, %v2757_v59  ;;  %vm946_vm6 = vcmp.ge.f32.partialorder %v892_v58, 0.0  ;;  %v962_v5 = vmul.f32 0.01, %v892_v58  ;;  %v2783_v6 = vadd.f32 %v2782_v2, %v2781_v61  ;;  %3219 = vmatpush3.bf16.msra.mxu1 %v3216_v41  ;;  %v1437_v59 = vld [vmem:[#allocation11 + $0x88] sm:$0xff]  ;;  %v1438_v0 = vld [vmem:[#allocation11 + $0x90] sm:$0xff]  ;;  %v1443_v2 = vld [vmem:[#allocation11 + $0xb8] sm:$0xff] }
 0x25b   : > { %3221 = vmatprep.subr.bf16.mxu1 %v3220_v56  ;;  %v970_v26 = vmul.f32 0.01, %v932_v20  ;;  %vm954_vm14 = vcmp.ge.f32.partialorder %v932_v20, 0.0  ;;  %v3236_v41 = vpack.c.bf16 %v1427_v39, %v1425_v38  ;;  %v3248_v62 = vpack.c.bf16 %v1439_v60, %v1437_v59 }
 0x25c   : > { %v897_v9 = vadd.f32 %v2759_v3, %v4433_v45  ;;  %v978_v10 = vsel %vm946_vm6, %v892_v58, %v962_v5  ;;  %v937_v23 = vadd.f32 %v2783_v6, %v4433_v45  ;;  %v1421_v45 = vld [vmem:[#allocation11 + $0x8] sm:$0xff]  ;;  %v1434_v58 = vld [vmem:[#allocation11 + $0x70] sm:$0xff]  ;;  %v3250_v3 = vpack.c.bf16 %v1438_v0, %v1436_v63  ;;  %v1440_v6 = vld [vmem:[#allocation11 + $0xa0] sm:$0xff] }
 0x25d   : > { %2953 = vmatprep.mubr.f32.mxu1 %v978_v10  ;;  %v986_v29 = vsel %vm954_vm14, %v932_v20, %v970_v26  ;;  %v3232_v36 = vpack.c.bf16 %v1423_v34, %v1421_v45  ;;  %v3252_v5 = vpack.c.bf16 %v1443_v2, %v1441_v1 }
 0x25e   : > { %vm947_vm8 = vcmp.ge.f32.partialorder %v897_v9, 0.0  ;;  %v963_v11 = vmul.f32 0.01, %v897_v9  ;;  %3223 = vmatpush3.bf16.msra.mxu1 %v3220_v56  ;;  %v971_v28 = vmul.f32 0.01, %v937_v23  ;;  %vm955_vm15 = vcmp.ge.f32.partialorder %v937_v23, 0.0 }
 0x25f   : > { %3225 = vmatprep.subr.bf16.mxu1 %v3224_v8  ;;  %3233 = vmatprep.subr.bf16.mxu0 %v3232_v36  ;;  %v1432_v56 = vld [vmem:[#allocation11 + $0x60] sm:$0xff] }
 0x260   : > { %v979_v15 = vsel %vm947_vm8, %v897_v9, %v963_v11  ;;  %v987_v30 = vsel %vm955_vm15, %v937_v23, %v971_v28  ;;  %3235 = vmatpush1.bf16.msra.mxu0 %v3234_v40  ;;  %v3246_v61 = vpack.c.bf16 %v1434_v58, %v1432_v56  ;;  %v3254_v9 = vpack.c.bf16 %v1442_v49, %v1440_v6  ;;  %v1446_v11 = vld [vmem:[#allocation11 + $0xd0] sm:$0xff] }
 0x261   : > { %2954 = vmatmul.mubr.f32.gmra.mrb[22].mxu1 %v979_v15  ;;  %3237 = vmatprep.subr.bf16.mxu0 %v3236_v41  ;;  %v3258_v12 = vpack.c.bf16 %v1446_v11, %v1444_v57 }
 0x262   : > { %2956 = vmatprep.mubr.f32.mxu1 %v980_v13  ;;  %3227 = vmatpush3.bf16.msra.mxu1 %v3224_v8  ;;  %v1447_v8 = vld [vmem:[#allocation11 + $0xd8] sm:$0xff]  ;;  %v4469_v13 = vld [vmem:[%s4904_s5] ss:$0 sm:$0xff] }
 0x263   : > { %3229 = vmatprep.subr.bf16.mxu1 %v3228_v33  ;;  %v3256_v10 = vpack.c.bf16 %v1447_v8, %v1445_v7 }
 0x264   : > { %3239 = vmatpush1.bf16.msra.mxu0 %v3238_v47 }
 0x265   : > { %2957 = vmatmul.mubr.f32.gmra.mrb[24].mxu1 %v981_v17  ;;  %3241 = vmatprep.subr.bf16.mxu0 %v3240_v48 }
 0x266   : > { %2959 = vmatprep.mubr.f32.mxu1 %v982_v16  ;;  %3231 = vmatpush3.bf16.msra.mxu1 %v3228_v33 }
 0x268   : > { %3243 = vmatpush1.bf16.msra.mxu0 %v3242_v54 }
 0x269   : > { %2960 = vmatmul.mubr.f32.gmra.mrb[26].mxu1 %v983_v22  ;;  %3245 = vmatprep.subr.bf16.mxu0 %v3244_v55 }
 0x26a   : > { %2962 = vmatprep.mubr.f32.mxu1 %v984_v25 }
 0x26c   : > { %3247 = vmatpush1.bf16.msra.mxu0 %v3246_v61 }
 0x26d   : > { %2963 = vmatmul.mubr.f32.gmra.mrb[28].mxu1 %v985_v27  ;;  %3249 = vmatprep.subr.bf16.mxu0 %v3248_v62 }
 0x26e   : > { %2965 = vmatprep.mubr.f32.mxu1 %v986_v29 }
 0x270   : > { %3251 = vmatpush1.bf16.msra.mxu0 %v3250_v3 }
 0x271   : > { %2966 = vmatmul.mubr.f32.gmra.mrb[30].mxu1 %v987_v30  ;;  %3253 = vmatprep.subr.bf16.mxu0 %v3252_v5 }
 0x274   : > { %3255 = vmatpush1.bf16.msra.mxu0 %v3254_v9 }
 0x275   : > { %3257 = vmatprep.subr.bf16.mxu0 %v3256_v10 }
 0x278   : > { %3259 = vmatpush1.bf16.msra.mxu0 %v3258_v12 }
 0x31c   : > { %v2946_v14 = vpop.f32.mrb[16].mxu1 }
 0x31d   : > { %v1083_v4 = vadd.f32 %v2946_v14, %v4469_v13  ;;  %v1077_v15 = vpop.f32.mrb[17].mxu1 }
 0x31e   : > { %v1078_v17 = vadd.f32 %v4469_v13, %v1077_v15  ;;  %v1451_v15 = vld [vmem:[#allocation11 + $0xf8] sm:$0xff] }
 0x31f   : > { %v1173_v18 = vmul.f32 0.01, %v1083_v4  ;;  %vm1157_vm0 = vcmp.ge.f32.partialorder %v1083_v4, 0.0 }
 0x320   : > { %v1172_v19 = vmul.f32 0.01, %v1078_v17  ;;  %vm1156_vm1 = vcmp.ge.f32.partialorder %v1078_v17, 0.0 }
 0x321   : > { %v1189_v20 = vsel %vm1157_vm0, %v1083_v4, %v1173_v18  ;;  %v1449_v4 = vld [vmem:[#allocation11 + $0xe8] sm:$0xff]  ;;  %v1448_v18 = vld [vmem:[#allocation11 + $0xe0] sm:$0xff] }
 0x322   : > { %v1188_v16 = vsel %vm1156_vm1, %v1078_v17, %v1172_v19  ;;  %v3260_v17 = vpack.c.bf16 %v1451_v15, %v1449_v4  ;;  %v1450_v19 = vld [vmem:[#allocation11 + $0xf0] sm:$0xff] }
 0x323   : > { %3000 = vmatprep.mubr.f32.mxu1 %v1188_v16  ;;  %v3262_v16 = vpack.c.bf16 %v1450_v19, %v1448_v18 }
 0x324   : > { %v2949_v21 = vpop.f32.mrb[18].mxu1  ;;  %3001 = vmatmul.mubr.f32.vlgmr.msra.gmra.mrb[32].mxu1 %v1189_v20  ;;  %3261 = vmatprep.subr.bf16.mxu0 %v3260_v17  ;;  %v3931_v20 = vmov 0.0  }
 0x325   : > { %v1093_v22 = vadd.f32 %v2949_v21, %v4469_v13  ;;  %v1087_v23 = vpop.f32.mrb[19].mxu1  ;;  %3263 = vmatpush1.bf16.msra.mxu0 %v3262_v16  ;;  %1528 = vmatprep.mubr.f32.mxu0 %v3931_v20  ;;  %v1722_v21 = vld [vmem:[#allocation13 + $0x8] sm:$0xff] }
 0x326   : > { %v1088_v24 = vadd.f32 %v4469_v13, %v1087_v23 }
 0x327   : > { %v1175_v25 = vmul.f32 0.01, %v1093_v22  ;;  %vm1159_vm3 = vcmp.ge.f32.partialorder %v1093_v22, 0.0 }
 0x328   : > { %v1174_v26 = vmul.f32 0.01, %v1088_v24  ;;  %vm1158_vm2 = vcmp.ge.f32.partialorder %v1088_v24, 0.0 }
 0x329   : > { %v1191_v28 = vsel %vm1159_vm3, %v1093_v22, %v1175_v25  ;;  %v1723_v22 = vld [vmem:[#allocation13 + $0x10] sm:$0xff] }
 0x32a   : > { %v1190_v27 = vsel %vm1158_vm2, %v1088_v24, %v1174_v26  ;;  %v1724_v24 = vld [vmem:[#allocation13 + $0x18] sm:$0xff]  ;;  %v4491_v26 = vld [vmem:[%s4982_s20] ss:$0 sm:$0xff]  ;;  %s3932_s20 = smov [#allocation17]  }
 0x32b   : > { %3003 = vmatprep.mubr.f32.mxu1 %v1190_v27  ;;  %v3268_v25 = vpack.c.bf16 %v1724_v24, %v1723_v22  ;;  %s3802_s2 = sshll.u32 %s3932_s20, 4  ;;  %s3803_s2 = int_to_ptr.vmem [resolvable:$false] %s3802_s2 }
 0x32c   : > { %v2952_v29 = vpop.f32.mrb[20].mxu1  ;;  %3004 = vmatmul.mubr.f32.gmra.mrb[34].mxu1 %v1191_v28  ;;  %s3804_s4 = scalar_lea.vmem %s3803_s2, 8192 }
 0x32d   : > { %v1103_v30 = vadd.f32 %v2952_v29, %v4469_v13  ;;  %v1097_v31 = vpop.f32.mrb[21].mxu1 }
 0x32e   : > { %v1098_v32 = vadd.f32 %v4469_v13, %v1097_v31 }
 0x32f   : > { %v1177_v33 = vmul.f32 0.01, %v1103_v30  ;;  %vm1161_vm5 = vcmp.ge.f32.partialorder %v1103_v30, 0.0 }
 0x330   : > { %v1176_v45 = vmul.f32 0.01, %v1098_v32  ;;  %vm1160_vm4 = vcmp.ge.f32.partialorder %v1098_v32, 0.0 }
 0x331   : > { %v1193_v35 = vsel %vm1161_vm5, %v1103_v30, %v1177_v33 }
 0x332   : > { %v1192_v34 = vsel %vm1160_vm4, %v1098_v32, %v1176_v45 }
 0x333   : > { %3006 = vmatprep.mubr.f32.mxu1 %v1192_v34 }
 0x334   : > { %v2955_v36 = vpop.f32.mrb[22].mxu1  ;;  %3007 = vmatmul.mubr.f32.gmra.mrb[36].mxu1 %v1193_v35 }
 0x335   : > { %v1113_v37 = vadd.f32 %v2955_v36, %v4469_v13  ;;  %v1107_v38 = vpop.f32.mrb[23].mxu1 }
 0x336   : > { %v1108_v39 = vadd.f32 %v4469_v13, %v1107_v38 }
 0x337   : > { %v1179_v40 = vmul.f32 0.01, %v1113_v37  ;;  %vm1163_vm7 = vcmp.ge.f32.partialorder %v1113_v37, 0.0 }
 0x338   : > { %v1178_v41 = vmul.f32 0.01, %v1108_v39  ;;  %v2958_v42 = vpop.f32.mrb[24].mxu1  ;;  %vm1162_vm6 = vcmp.ge.f32.partialorder %v1108_v39, 0.0 }
 0x339   : > { %v1123_v43 = vadd.f32 %v2958_v42, %v4469_v13  ;;  %v1117_v44 = vpop.f32.mrb[25].mxu1  ;;  %v1195_v50 = vsel %vm1163_vm7, %v1113_v37, %v1179_v40 }
 0x33a   : > { %v1118_v46 = vadd.f32 %v4469_v13, %v1117_v44  ;;  %v1194_v47 = vsel %vm1162_vm6, %v1108_v39, %v1178_v41 }
 0x33b   : > { %v1181_v48 = vmul.f32 0.01, %v1123_v43  ;;  %3009 = vmatprep.mubr.f32.mxu1 %v1194_v47  ;;  %vm1165_vm9 = vcmp.ge.f32.partialorder %v1123_v43, 0.0 }
 0x33c   : > { %v1180_v51 = vmul.f32 0.01, %v1118_v46  ;;  %v2961_v52 = vpop.f32.mrb[26].mxu1  ;;  %3010 = vmatmul.mubr.f32.gmra.mrb[38].mxu1 %v1195_v50  ;;  %vm1164_vm8 = vcmp.ge.f32.partialorder %v1118_v46, 0.0 }
 0x33d   : > { %v1133_v53 = vadd.f32 %v2961_v52, %v4469_v13  ;;  %v1127_v54 = vpop.f32.mrb[27].mxu1  ;;  %v1197_v59 = vsel %vm1165_vm9, %v1123_v43, %v1181_v48 }
 0x33e   : > { %v1128_v55 = vadd.f32 %v4469_v13, %v1127_v54  ;;  %v1196_v56 = vsel %vm1164_vm8, %v1118_v46, %v1180_v51 }
 0x33f   : > { %v1183_v58 = vmul.f32 0.01, %v1133_v53  ;;  %3012 = vmatprep.mubr.f32.mxu1 %v1196_v56  ;;  %vm1167_vm10 = vcmp.ge.f32.partialorder %v1133_v53, 0.0 }
 0x340   : > { %v1182_v60 = vmul.f32 0.01, %v1128_v55  ;;  %3013 = vmatmul.mubr.f32.gmra.mrb[40].mxu1 %v1197_v59  ;;  %v2964_v61 = vpop.f32.mrb[28].mxu1  ;;  %vm1166_vm11 = vcmp.ge.f32.partialorder %v1128_v55, 0.0 }
 0x341   : > { %v1143_v62 = vadd.f32 %v2964_v61, %v4469_v13  ;;  %v1137_v63 = vpop.f32.mrb[29].mxu1  ;;  %v1199_v0 = vsel %vm1167_vm10, %v1133_v53, %v1183_v58 }
 0x342   : > { %v1138_v1 = vadd.f32 %v4469_v13, %v1137_v63  ;;  %v1198_v2 = vsel %vm1166_vm11, %v1128_v55, %v1182_v60 }
 0x343   : > { %v1185_v3 = vmul.f32 0.01, %v1143_v62  ;;  %3015 = vmatprep.mubr.f32.mxu1 %v1198_v2  ;;  %vm1169_vm12 = vcmp.ge.f32.partialorder %v1143_v62, 0.0 }
 0x344   : > { %v1184_v5 = vmul.f32 0.01, %v1138_v1  ;;  %3016 = vmatmul.mubr.f32.gmra.mrb[42].mxu1 %v1199_v0  ;;  %vm1168_vm13 = vcmp.ge.f32.partialorder %v1138_v1, 0.0  ;;  %v2967_v6 = vpop.f32.mrb[30].mxu1 }
 0x345   : > { %v1153_v49 = vadd.f32 %v2967_v6, %v4469_v13  ;;  %v1201_v7 = vsel %vm1169_vm12, %v1143_v62, %v1185_v3  ;;  %v1147_v8 = vpop.f32.mrb[31].mxu1 }
 0x346   : > { %v1200_v9 = vsel %vm1168_vm13, %v1138_v1, %v1184_v5  ;;  %v1148_v10 = vadd.f32 %v4469_v13, %v1147_v8  ;;  %v1721_v13 = vld [vmem:[#allocation13] sm:$0xff] }
 0x347   : > { %3018 = vmatprep.mubr.f32.mxu1 %v1200_v9  ;;  %v1187_v57 = vmul.f32 0.01, %v1153_v49  ;;  %vm1171_vm14 = vcmp.ge.f32.partialorder %v1153_v49, 0.0  ;;  %v3264_v23 = vpack.c.bf16 %v1722_v21, %v1721_v13 }
 0x348   : > { %3019 = vmatmul.mubr.f32.gmra.mrb[44].mxu1 %v1201_v7  ;;  %v1186_v11 = vmul.f32 0.01, %v1148_v10  ;;  %vm1170_vm15 = vcmp.ge.f32.partialorder %v1148_v10, 0.0 }
 0x349   : > { %v1203_v12 = vsel %vm1171_vm14, %v1153_v49, %v1187_v57  ;;  %3265 = vmatprep.subr.bf16.mxu1 %v3264_v23 }
 0x34a   : > { %v1202_v14 = vsel %vm1170_vm15, %v1148_v10, %v1186_v11  ;;  %3267 = vmatpush3.bf16.msra.mxu1 %v3264_v23 }
 0x34b   : > { %3021 = vmatprep.mubr.f32.mxu1 %v1202_v14  ;;  %3269 = vmatprep.subr.bf16.mxu1 %v3268_v25 }
 0x34c   : > { %3022 = vmatmul.mubr.f32.gmra.mrb[46].mxu1 %v1203_v12 }
 0x34e   : > { %3271 = vmatpush3.bf16.msra.mxu1 %v3268_v25 }
 0x3f7   : > { %v3002_v27 = vpop.f32.mrb[32].mxu1 }
 0x3f8   : > { %v1293_v28 = vpop.f32.mrb[33].mxu1  ;;  %v1299_v29 = vadd.f32 %v3002_v27, %v4491_v26 }
 0x3f9   : > { %v1294_v30 = vadd.f32 %v4491_v26, %v1293_v28 }
 0x3fa   : > { %v1389_v32 = vmul.f32 0.01, %v1299_v29  ;;  %vm1373_vm1 = vcmp.ge.f32.partialorder %v1299_v29, 0.0 }
 0x3fb   : > { %vm1372_vm0 = vcmp.ge.f32.partialorder %v1294_v30, 0.0  ;;  %v1388_v31 = vmul.f32 0.01, %v1294_v30 }
 0x3fc   : > { %v1405_v37 = vsel %vm1373_vm1, %v1299_v29, %v1389_v32  ;;  %v1725_v29 = vld [vmem:[#allocation13 + $0x20] sm:$0xff]  ;;  %v1728_v32 = vld [vmem:[#allocation13 + $0x38] sm:$0xff] }
 0x3fd   : > { %v1404_v33 = vsel %vm1372_vm0, %v1294_v30, %v1388_v31  ;;  %v1726_v30 = vld [vmem:[#allocation13 + $0x28] sm:$0xff] }
 0x3fe   : > { %1529 = vmatmul.mubr.f32.vlgmr.msra.gmra.mrb[16].mxu0 %v1404_v33  ;;  %v3272_v31 = vpack.c.bf16 %v1726_v30, %v1725_v29 }
 0x3ff   : > { %v3005_v45 = vpop.f32.mrb[34].mxu1  ;;  %1534 = vmatprep.mubr.f32.mxu0 %v3931_v20 }
 0x400   : > { %v1303_v34 = vpop.f32.mrb[35].mxu1  ;;  %v1309_v35 = vadd.f32 %v3005_v45, %v4491_v26  ;;  %3273 = vmatprep.subr.bf16.mxu1 %v3272_v31  ;;  %v1729_v45 = vld [vmem:[#allocation13 + $0x40] sm:$0xff] }
 0x401   : > { %v1304_v36 = vadd.f32 %v4491_v26, %v1303_v34  ;;  %3275 = vmatpush3.bf16.msra.mxu1 %v3272_v31  ;;  %v1730_v34 = vld [vmem:[#allocation13 + $0x48] sm:$0xff] }
 0x402   : > { %1535 = vmatmul.mubr.f32.gmra.mrb[18].mxu0 %v1405_v37  ;;  %v1391_v39 = vmul.f32 0.01, %v1309_v35  ;;  %vm1375_vm3 = vcmp.ge.f32.partialorder %v1309_v35, 0.0  ;;  %v1732_v37 = vld [vmem:[#allocation13 + $0x58] sm:$0xff] }
 0x403   : > { %v1390_v38 = vmul.f32 0.01, %v1304_v36  ;;  %1540 = vmatprep.mubr.f32.mxu0 %v3931_v20  ;;  %vm1374_vm2 = vcmp.ge.f32.partialorder %v1304_v36, 0.0 }
 0x404   : > { %v1407_v46 = vsel %vm1375_vm3, %v1309_v35, %v1391_v39  ;;  %v3280_v35 = vpack.c.bf16 %v1730_v34, %v1729_v45  ;;  %v1733_v39 = vld [vmem:[#allocation13 + $0x60] sm:$0xff]  ;;  %v1940_v45 = vld [vmem:[#allocation14 + $0x18] sm:$0xff] }
 0x405   : > { %v1406_v40 = vsel %vm1374_vm2, %v1304_v36, %v1390_v38  ;;  %v1731_v36 = vld [vmem:[#allocation13 + $0x50] sm:$0xff] }
 0x406   : > { %1541 = vmatmul.mubr.f32.gmra.mrb[20].mxu0 %v1406_v40  ;;  %v3284_v38 = vpack.c.bf16 %v1732_v37, %v1731_v36  ;;  %v1734_v40 = vld [vmem:[#allocation13 + $0x68] sm:$0xff]  ;;  %v1627_v37 = vld [vmem:[%s4376_s16 + $0x10] sm:$0xff] }
 0x407   : > { %v3008_v41 = vpop.f32.mrb[36].mxu1  ;;  %1546 = vmatprep.mubr.f32.mxu0 %v3931_v20 }
 0x408   : > { %v1313_v42 = vpop.f32.mrb[37].mxu1  ;;  %v1319_v43 = vadd.f32 %v3008_v41, %v4491_v26  ;;  %v3288_v41 = vpack.c.bf16 %v1734_v40, %v1733_v39 }
 0x409   : > { %v1314_v44 = vadd.f32 %v4491_v26, %v1313_v42  ;;  %v1735_v42 = vld [vmem:[#allocation13 + $0x70] sm:$0xff] }
 0x40a   : > { %1547 = vmatmul.mubr.f32.gmra.mrb[22].mxu0 %v1407_v46  ;;  %v1393_v48 = vmul.f32 0.01, %v1319_v43  ;;  %vm1377_vm5 = vcmp.ge.f32.partialorder %v1319_v43, 0.0  ;;  %v1937_v46 = vld [vmem:[#allocation14] sm:$0xff] }
 0x40b   : > { %v1392_v47 = vmul.f32 0.01, %v1314_v44  ;;  %1552 = vmatprep.mubr.f32.mxu0 %v3931_v20  ;;  %vm1376_vm4 = vcmp.ge.f32.partialorder %v1314_v44, 0.0 }
 0x40c   : > { %v1409_v55 = vsel %vm1377_vm5, %v1319_v43, %v1393_v48  ;;  %v1736_v43 = vld [vmem:[#allocation13 + $0x78] sm:$0xff] }
 0x40d   : > { %v1408_v50 = vsel %vm1376_vm4, %v1314_v44, %v1392_v47  ;;  %v3292_v44 = vpack.c.bf16 %v1736_v43, %v1735_v42  ;;  %v1938_v47 = vld [vmem:[#allocation14 + $0x8] sm:$0xff] }
 0x40e   : > { %1553 = vmatmul.mubr.f32.gmra.mrb[24].mxu0 %v1408_v50  ;;  %v4525_v48 = vpack.c.bf16 %v1938_v47, %v1937_v46  ;;  %v1454_v50 = vlaneseq  ;;  %v1941_v46 = vld [vmem:[#allocation14 + $0x20] sm:$0xff]  ;;  %v1942_v47 = vld [vmem:[#allocation14 + $0x28] sm:$0xff] }
 0x40f   : > { %v3011_v51 = vpop.f32.mrb[38].mxu1  ;;  %1558 = vmatprep.mubr.f32.mxu0 %v3931_v20 }
 0x410   : > { %v1323_v52 = vpop.f32.mrb[39].mxu1  ;;  %v1329_v53 = vadd.f32 %v3011_v51, %v4491_v26  ;;  %v4528_v51 = vshrl.u32 %v1454_v50, 7 }
 0x411   : > { %v1324_v54 = vadd.f32 %v4491_v26, %v1323_v52 }
 0x412   : > { %1559 = vmatmul.mubr.f32.gmra.mrb[26].mxu0 %v1409_v55  ;;  %v1395_v60 = vmul.f32 0.01, %v1329_v53  ;;  %vm1379_vm7 = vcmp.ge.f32.partialorder %v1329_v53, 0.0  ;;  %v1456_v52 = vsub.s32 0, %v4528_v51 }
 0x413   : > { %v1394_v56 = vmul.f32 0.01, %v1324_v54  ;;  %v3014_v58 = vpop.f32.mrb[40].mxu1  ;;  %1564 = vmatprep.mubr.f32.mxu0 %v3931_v20  ;;  %vm1378_vm6 = vcmp.ge.f32.partialorder %v1324_v54, 0.0 }
 0x414   : > { %v1333_v59 = vpop.f32.mrb[41].mxu1  ;;  %v1339_v1 = vadd.f32 %v3014_v58, %v4491_v26  ;;  %v1411_v3 = vsel %vm1379_vm7, %v1329_v53, %v1395_v60  ;;  %v1452_v53 = vld [vmem:[%s4983_s12] sm:$0x3] }
 0x415   : > { %v1334_v61 = vadd.f32 %v4491_v26, %v1333_v59  ;;  %v1410_v62 = vsel %vm1378_vm6, %v1324_v54, %v1394_v56  ;;  %v1460_v54 = vsub.s32 1, %v4528_v51  ;;  %v4537_v55 = vrot.slane %v1452_v53, %v1456_v52 }
 0x416   : > { %1565 = vmatmul.mubr.f32.gmra.mrb[28].mxu0 %v1410_v62  ;;  %v1397_v49 = vmul.f32 0.01, %v1339_v1  ;;  %vm1381_vm9 = vcmp.ge.f32.partialorder %v1339_v1, 0.0 }
 0x417   : > { %v3017_v63 = vpop.f32.mrb[42].mxu1  ;;  %1570 = vmatprep.mubr.f32.mxu0 %v3931_v20  ;;  %v1396_v2 = vmul.f32 0.01, %v1334_v61  ;;  %vm1380_vm8 = vcmp.ge.f32.partialorder %v1334_v61, 0.0  ;;  %v4541_v56 = vrot.slane %v1452_v53, %v1460_v54 }
 0x418   : > { %v1343_v0 = vpop.f32.mrb[43].mxu1  ;;  %v1349_v57 = vadd.f32 %v3017_v63, %v4491_v26  ;;  %v1413_v12 = vsel %vm1381_vm9, %v1339_v1, %v1397_v49 }
 0x419   : > { %v1344_v7 = vadd.f32 %v4491_v26, %v1343_v0  ;;  %v1412_v8 = vsel %vm1380_vm8, %v1334_v61, %v1396_v2 }
 0x41a   : > { %1571 = vmatmul.mubr.f32.gmra.mrb[30].mxu0 %v1411_v3  ;;  %v1399_v14 = vmul.f32 0.01, %v1349_v57  ;;  %vm1383_vm11 = vcmp.ge.f32.partialorder %v1349_v57, 0.0 }
 0x41b   : > { %v3020_v5 = vpop.f32.mrb[44].mxu1  ;;  %1576 = vmatprep.mubr.f32.mxu0 %v3931_v20  ;;  %v1398_v11 = vmul.f32 0.01, %v1344_v7  ;;  %vm1382_vm10 = vcmp.ge.f32.partialorder %v1344_v7, 0.0 }
 0x41c   : > { %v1353_v6 = vpop.f32.mrb[45].mxu1  ;;  %v1359_v17 = vadd.f32 %v3020_v5, %v4491_v26  ;;  %v1415_v19 = vsel %vm1383_vm11, %v1349_v57, %v1399_v14 }
 0x41d   : > { %v1354_v4 = vadd.f32 %v4491_v26, %v1353_v6  ;;  %v1414_v15 = vsel %vm1382_vm10, %v1344_v7, %v1398_v11 }
 0x41e   : > { %1577 = vmatmul.mubr.f32.gmra.mrb[32].mxu0 %v1412_v8  ;;  %v1401_v16 = vmul.f32 0.01, %v1359_v17  ;;  %vm1385_vm13 = vcmp.ge.f32.partialorder %v1359_v17, 0.0 }
 0x41f   : > { %1582 = vmatprep.mubr.f32.mxu0 %v3931_v20  ;;  %v3023_v9 = vpop.f32.mrb[46].mxu1  ;;  %v1400_v18 = vmul.f32 0.01, %v1354_v4  ;;  %vm1384_vm12 = vcmp.ge.f32.partialorder %v1354_v4, 0.0 }
 0x420   : > { %v1363_v10 = vpop.f32.mrb[47].mxu1  ;;  %v1369_v22 = vadd.f32 %v3023_v9, %v4491_v26  ;;  %v1417_v24 = vsel %vm1385_vm13, %v1359_v17, %v1401_v16 }
 0x421   : > { %v1364_v13 = vadd.f32 %v4491_v26, %v1363_v10  ;;  %v1416_v21 = vsel %vm1384_vm12, %v1354_v4, %v1400_v18  ;;  %v1727_v26 = vld [vmem:[#allocation13 + $0x30] sm:$0xff]  ;;  %v1625_v18 = vld [vmem:[%s4376_s16] sm:$0xff] }
 0x422   : > { %1583 = vmatmul.mubr.f32.gmra.mrb[34].mxu0 %v1413_v12  ;;  %v1403_v25 = vmul.f32 0.01, %v1369_v22  ;;  %vm1387_vm15 = vcmp.ge.f32.partialorder %v1369_v22, 0.0  ;;  %v3276_v33 = vpack.c.bf16 %v1728_v32, %v1727_v26 }
 0x423   : > { %1588 = vmatprep.mubr.f32.mxu0 %v3931_v20  ;;  %v1402_v23 = vmul.f32 0.01, %v1364_v13  ;;  %vm1386_vm14 = vcmp.ge.f32.partialorder %v1364_v13, 0.0 }
 0x424   : > { %v1419_v28 = vsel %vm1387_vm15, %v1369_v22, %v1403_v25  ;;  %3277 = vmatprep.subr.bf16.mxu1 %v3276_v33 }
 0x425   : > { %v1418_v27 = vsel %vm1386_vm14, %v1364_v13, %v1402_v23  ;;  %3279 = vmatpush3.bf16.msra.mxu1 %v3276_v33  ;;  %v1939_v33 = vld [vmem:[#allocation14 + $0x10] sm:$0xff] }
 0x426   : > { %1589 = vmatmul.mubr.f32.gmra.mrb[36].mxu0 %v1414_v15  ;;  %3281 = vmatprep.subr.bf16.mxu1 %v3280_v35 }
 0x427   : > { %1594 = vmatprep.mubr.f32.mxu0 %v3931_v20 }
 0x429   : > { %3283 = vmatpush3.bf16.msra.mxu1 %v3280_v35 }
 0x42a   : > { %1595 = vmatmul.mubr.f32.gmra.mrb[38].mxu0 %v1415_v19  ;;  %3285 = vmatprep.subr.bf16.mxu1 %v3284_v38 }
 0x42b   : > { %1600 = vmatprep.mubr.f32.mxu0 %v3931_v20 }
 0x42d   : > { %3287 = vmatpush3.bf16.msra.mxu1 %v3284_v38 }
 0x42e   : > { %1601 = vmatmul.mubr.f32.gmra.mrb[40].mxu0 %v1416_v21  ;;  %3289 = vmatprep.subr.bf16.mxu1 %v3288_v41 }
 0x42f   : > { %1606 = vmatprep.mubr.f32.mxu0 %v3931_v20 }
 0x431   : > { %3291 = vmatpush3.bf16.msra.mxu1 %v3288_v41  ;;  %v3300_v41 = vpack.c.bf16 %v1940_v45, %v1939_v33  ;;  %v1631_v45 = vld [vmem:[%s4376_s16 + $0x30] sm:$0xff] }
 0x432   : > { %1607 = vmatmul.mubr.f32.gmra.mrb[42].mxu0 %v1417_v24  ;;  %3293 = vmatprep.subr.bf16.mxu1 %v3292_v44 }
 0x433   : > { %1612 = vmatprep.mubr.f32.mxu0 %v3931_v20 }
 0x435   : > { %3295 = vmatpush3.bf16.msra.mxu1 %v3292_v44 }
 0x436   : > { %1613 = vmatmul.mubr.f32.gmra.mrb[44].mxu0 %v1418_v27  ;;  %3297 = vmatprep.subr.bf16.mxu1 %v4525_v48  ;;  %v1626_v27 = vld [vmem:[%s4376_s16 + $0x8] sm:$0xff] }
 0x437   : > { %1618 = vmatprep.mubr.f32.mxu0 %v3931_v20 }
 0x43a   : > { %1619 = vmatmul.mubr.f32.gmra.mrb[46].mxu0 %v1419_v28 }
 0x43b   : > { %2261 = vmatprep.mubr.f32.mxu0 %v3931_v20 }
 0x4d1   : > { %v1530_v58 = vpop.f32.mrb[16].mxu0 }
 0x4d2   : > { %v1531_v59 = vadd.f32 %v1530_v58, %v4537_v55  ;;  %v1532_v60 = vpop.f32.mrb[17].mxu0 }
 0x4d3   : > { %v1533_v61 = vadd.f32 %v1532_v60, %v4541_v56 }
 0x4d4   : > { %2358 = vst [vmem:[%s4546_s29] sm:$0xff] %v1531_v59 }
 0x4d5   : > { %v1641_v62 = vmul.f32 0.5, %v1533_v61  ;;  %2359 = vst [vmem:[%s4546_s29 + $0x8] sm:$0xff] %v1533_v61  ;;  %v1536_v63 = vpop.f32.mrb[18].mxu0 }
 0x4d6   : > { %v1537_v0 = vadd.f32 %v1536_v63, %v4537_v55  ;;  %v1538_v1 = vpop.f32.mrb[19].mxu0  ;;  %v3304_v63 = vpack.c.bf16 %v1942_v47, %v1941_v46  ;;  %v1632_v47 = vld [vmem:[%s4376_s16 + $0x38] sm:$0xff] }
 0x4d7   : > { %v1657_v2 = vmul.f32 1.442695, %v1641_v62  ;;  %v1539_v3 = vadd.f32 %v1538_v1, %v4541_v56 }
 0x4d8   : > { %2360 = vst [vmem:[%s4546_s29 + $0x10] sm:$0xff] %v1537_v0 }
 0x4d9   : > { %3510 = vpow2.f32 %v1657_v2  ;;  %v1642_v5 = vmul.f32 0.5, %v1539_v3  ;;  %2361 = vst [vmem:[%s4546_s29 + $0x18] sm:$0xff] %v1539_v3  ;;  %v1542_v6 = vpop.f32.mrb[20].mxu0  ;;  %v1943_v3 = vld [vmem:[#allocation14 + $0x30] sm:$0xff] }
 0x4da   : > { %v4555_v49 = vadd.f32 %v1542_v6, %v4537_v55  ;;  %v1544_v7 = vpop.f32.mrb[21].mxu0 }
 0x4db   : > { %v1659_v8 = vmul.f32 1.442695, %v1642_v5  ;;  %v1545_v9 = vadd.f32 %v1544_v7, %v4541_v56  ;;  %v1944_v5 = vld [vmem:[#allocation14 + $0x38] sm:$0xff] }
 0x4dc   : > { %2362 = vst [vmem:[%s4546_s29 + $0x20] sm:$0xff] %v4555_v49 }
 0x4dd   : > { %3512 = vpow2.f32 %v1659_v8  ;;  %v1643_v10 = vmul.f32 0.5, %v1545_v9  ;;  %2363 = vst [vmem:[%s4546_s29 + $0x28] sm:$0xff] %v1545_v9  ;;  %v1548_v57 = vpop.f32.mrb[22].mxu0  ;;  %v1629_v8 = vld [vmem:[%s4376_s16 + $0x20] sm:$0xff] }
 0x4de   : > { %v4562_v11 = vadd.f32 %v1548_v57, %v4537_v55  ;;  %v1550_v12 = vpop.f32.mrb[23].mxu0  ;;  %v3308_v57 = vpack.c.bf16 %v1944_v5, %v1943_v3 }
 0x4df   : > { %v1661_v14 = vmul.f32 1.442695, %v1643_v10  ;;  %v1551_v4 = vadd.f32 %v1550_v12, %v4541_v56 }
 0x4e0   : > { %2364 = vst [vmem:[%s4546_s29 + $0x30] sm:$0xff] %v4562_v11 }
 0x4e1   : > { %3514 = vpow2.f32 %v1661_v14  ;;  %v1644_v15 = vmul.f32 0.5, %v1551_v4  ;;  %2365 = vst [vmem:[%s4546_s29 + $0x38] sm:$0xff] %v1551_v4  ;;  %v1554_v17 = vpop.f32.mrb[24].mxu0 }
 0x4e2   : > { %v4570_v19 = vadd.f32 %v1554_v17, %v4537_v55  ;;  %v1556_v16 = vpop.f32.mrb[25].mxu0  ;;  %v1946_v17 = vld [vmem:[#allocation14 + $0x48] sm:$0xff] }
 0x4e3   : > { %v3511_v13 = vpop.eup %3510  ;;  %v1663_v21 = vmul.f32 1.442695, %v1644_v15  ;;  %v1557_v22 = vadd.f32 %v1556_v16, %v4541_v56  ;;  %v1945_v15 = vld [vmem:[#allocation14 + $0x40] sm:$0xff] }
 0x4e4   : > { %2366 = vst [vmem:[%s4546_s29 + $0x40] sm:$0xff] %v4570_v19  ;;  %v1689_v23 = vmul.f32 %v3511_v13, %v1625_v18 }
 0x4e5   : > { %3516 = vpow2.f32 %v1663_v21  ;;  %v1645_v24 = vmul.f32 0.5, %v1557_v22  ;;  %2367 = vst [vmem:[%s4546_s29 + $0x48] sm:$0xff] %v1557_v22  ;;  %v1560_v25 = vpop.f32.mrb[26].mxu0  ;;  %v1630_v21 = vld [vmem:[%s4376_s16 + $0x28] sm:$0xff] }
 0x4e6   : > { %v4578_v28 = vadd.f32 %v1560_v25, %v4537_v55  ;;  %v1562_v29 = vpop.f32.mrb[27].mxu0  ;;  %v1705_v30 = vadd.f32 %v1689_v23, %v1531_v59  ;;  %v1628_v59 = vld [vmem:[%s4376_s16 + $0x18] sm:$0xff] }
 0x4e7   : > { %v3513_v31 = vpop.eup %3512  ;;  %v1665_v26 = vmul.f32 1.442695, %v1645_v24  ;;  %v1563_v32 = vadd.f32 %v1562_v29, %v4541_v56  ;;  %v3312_v24 = vpack.c.bf16 %v1946_v17, %v1945_v15 }
 0x4e8   : > { %2368 = vst [vmem:[%s4546_s29 + $0x50] sm:$0xff] %v4578_v28  ;;  %3056 = vmatprep.mubr.f32.mxu1 %v1705_v30  ;;  %v1690_v34 = vmul.f32 %v3513_v31, %v1626_v27  ;;  %v1947_v30 = vld [vmem:[#allocation14 + $0x50] sm:$0xff]  ;;  %v1948_v31 = vld [vmem:[#allocation14 + $0x58] sm:$0xff] }
 0x4e9   : > { %3518 = vpow2.f32 %v1665_v26  ;;  %v1646_v35 = vmul.f32 0.5, %v1563_v32  ;;  %2369 = vst [vmem:[%s4546_s29 + $0x58] sm:$0xff] %v1563_v32  ;;  %v1566_v36 = vpop.f32.mrb[28].mxu0 }
 0x4ea   : > { %v4586_v38 = vadd.f32 %v1566_v36, %v4537_v55  ;;  %v1568_v39 = vpop.f32.mrb[29].mxu0  ;;  %v1706_v40 = vadd.f32 %v1690_v34, %v1537_v0  ;;  %v3316_v36 = vpack.c.bf16 %v1948_v31, %v1947_v30 }
 0x4eb   : > { %v3515_v42 = vpop.eup %3514  ;;  %v1667_v43 = vmul.f32 1.442695, %v1646_v35  ;;  %v1569_v44 = vadd.f32 %v1568_v39, %v4541_v56 }
 0x4ec   : > { %2370 = vst [vmem:[%s4546_s29 + $0x60] sm:$0xff] %v4586_v38  ;;  %3057 = vmatmul.mubr.f32.vlgmr.msra.gmra.mrb[48].mxu1 %v1706_v40  ;;  %v1691_v50 = vmul.f32 %v3515_v42, %v1627_v37  ;;  %v1950_v42 = vld [vmem:[#allocation14 + $0x68] sm:$0xff] }
 0x4ed   : > { %3520 = vpow2.f32 %v1667_v43  ;;  %v1647_v53 = vmul.f32 0.5, %v1569_v44  ;;  %2371 = vst [vmem:[%s4546_s29 + $0x68] sm:$0xff] %v1569_v44  ;;  %v1572_v58 = vpop.f32.mrb[30].mxu0  ;;  %3299 = vmatpush3.bf16.msra.mxu1 %v4525_v48 }
 0x4ee   : > { %v4595_v60 = vadd.f32 %v1572_v58, %v4537_v55  ;;  %v1574_v61 = vpop.f32.mrb[31].mxu0  ;;  %v1707_v62 = vadd.f32 %v1691_v50, %v4555_v49  ;;  %3301 = vmatprep.subr.bf16.mxu1 %v3300_v41 }
 0x4ef   : > { %v3517_v0 = vpop.eup %3516  ;;  %v1669_v1 = vmul.f32 1.442695, %v1647_v53  ;;  %v1575_v2 = vadd.f32 %v1574_v61, %v4541_v56 }
 0x4f0   : > { %2372 = vst [vmem:[%s4546_s29 + $0x70] sm:$0xff] %v4595_v60  ;;  %3059 = vmatprep.mubr.f32.mxu1 %v1707_v62  ;;  %v1692_v48 = vmul.f32 %v3517_v0, %v1628_v59 }
 0x4f1   : > { %3522 = vpow2.f32 %v1669_v1  ;;  %v1648_v6 = vmul.f32 0.5, %v1575_v2  ;;  %2373 = vst [vmem:[%s4546_s29 + $0x78] sm:$0xff] %v1575_v2  ;;  %v1578_v7 = vpop.f32.mrb[32].mxu0  ;;  %3303 = vmatpush3.bf16.msra.mxu1 %v3300_v41  ;;  %v1949_v41 = vld [vmem:[#allocation14 + $0x60] sm:$0xff] }
 0x4f2   : > { %v4604_v49 = vadd.f32 %v1578_v7, %v4537_v55  ;;  %v1580_v9 = vpop.f32.mrb[33].mxu0  ;;  %v1708_v10 = vadd.f32 %v1692_v48, %v4562_v11  ;;  %3305 = vmatprep.subr.bf16.mxu1 %v3304_v63  ;;  %v3320_v58 = vpack.c.bf16 %v1950_v42, %v1949_v41  ;;  %v1633_v2 = vld [vmem:[%s4376_s16 + $0x40] sm:$0xff]  ;;  %v1638_v42 = vld [vmem:[%s4376_s16 + $0x68] sm:$0xff] }
 0x4f3   : > { %v3519_v12 = vpop.eup %3518  ;;  %v1671_v14 = vmul.f32 1.442695, %v1648_v6  ;;  %v1581_v4 = vadd.f32 %v1580_v9, %v4541_v56 }
 0x4f4   : > { %2374 = vst [vmem:[%s4546_s29 + $0x80] sm:$0xff] %v4604_v49  ;;  %3060 = vmatmul.mubr.f32.gmra.mrb[50].mxu1 %v1708_v10  ;;  %v1693_v18 = vmul.f32 %v3519_v12, %v1629_v8 }
 0x4f5   : > { %3524 = vpow2.f32 %v1671_v14  ;;  %v1649_v16 = vmul.f32 0.5, %v1581_v4  ;;  %2375 = vst [vmem:[%s4546_s29 + $0x88] sm:$0xff] %v1581_v4  ;;  %v1584_v13 = vpop.f32.mrb[34].mxu0  ;;  %3307 = vmatpush3.bf16.msra.mxu1 %v3304_v63 }
 0x4f6   : > { %v4613_v11 = vadd.f32 %v1584_v13, %v4537_v55  ;;  %v1586_v22 = vpop.f32.mrb[35].mxu0  ;;  %v1709_v23 = vadd.f32 %v1693_v18, %v4570_v19  ;;  %3309 = vmatprep.subr.bf16.mxu1 %v3308_v57 }
 0x4f7   : > { %v3521_v25 = vpop.eup %3520  ;;  %v1673_v27 = vmul.f32 1.442695, %v1649_v16  ;;  %v1587_v29 = vadd.f32 %v1586_v22, %v4541_v56 }
 0x4f8   : > { %2376 = vst [vmem:[%s4546_s29 + $0x90] sm:$0xff] %v4613_v11  ;;  %3062 = vmatprep.mubr.f32.mxu1 %v1709_v23  ;;  %v1694_v26 = vmul.f32 %v3521_v25, %v1630_v21  ;;  %v1635_v21 = vld [vmem:[%s4376_s16 + $0x50] sm:$0xff] }
 0x4f9   : > { %3526 = vpow2.f32 %v1673_v27  ;;  %v1650_v32 = vmul.f32 0.5, %v1587_v29  ;;  %2377 = vst [vmem:[%s4546_s29 + $0x98] sm:$0xff] %v1587_v29  ;;  %v1590_v33 = vpop.f32.mrb[36].mxu0  ;;  %3311 = vmatpush3.bf16.msra.mxu1 %v3308_v57  ;;  %v1634_v57 = vld [vmem:[%s4376_s16 + $0x48] sm:$0xff] }
 0x4fa   : > { %v4622_v19 = vadd.f32 %v1590_v33, %v4537_v55  ;;  %v1592_v34 = vpop.f32.mrb[37].mxu0  ;;  %v1710_v35 = vadd.f32 %v1694_v26, %v4578_v28  ;;  %3313 = vmatprep.subr.bf16.mxu1 %v3312_v24  ;;  %v1636_v26 = vld [vmem:[%s4376_s16 + $0x58] sm:$0xff] }
 0x4fb   : > { %v3523_v37 = vpop.eup %3522  ;;  %v1675_v39 = vmul.f32 1.442695, %v1650_v32  ;;  %v1593_v40 = vadd.f32 %v1592_v34, %v4541_v56 }
 0x4fc   : > { %2378 = vst [vmem:[%s4546_s29 + $0xa0] sm:$0xff] %v4622_v19  ;;  %3063 = vmatmul.mubr.f32.gmra.mrb[52].mxu1 %v1710_v35  ;;  %v1695_v43 = vmul.f32 %v3523_v37, %v1631_v45 }
 0x4fd   : > { %3528 = vpow2.f32 %v1675_v39  ;;  %v1651_v44 = vmul.f32 0.5, %v1593_v40  ;;  %2379 = vst [vmem:[%s4546_s29 + $0xa8] sm:$0xff] %v1593_v40  ;;  %v1596_v46 = vpop.f32.mrb[38].mxu0  ;;  %3315 = vmatpush3.bf16.msra.mxu1 %v3312_v24  ;;  %v1637_v39 = vld [vmem:[%s4376_s16 + $0x60] sm:$0xff] }
 0x4fe   : > { %v4631_v28 = vadd.f32 %v1596_v46, %v4537_v55  ;;  %v1598_v50 = vpop.f32.mrb[39].mxu0  ;;  %v1711_v53 = vadd.f32 %v1695_v43, %v4586_v38  ;;  %3317 = vmatprep.subr.bf16.mxu1 %v3316_v36  ;;  %v1639_v46 = vld [vmem:[%s4376_s16 + $0x70] sm:$0xff] }
 0x4ff   : > { %v3525_v59 = vpop.eup %3524  ;;  %v1677_v61 = vmul.f32 1.442695, %v1651_v44  ;;  %v1599_v62 = vadd.f32 %v1598_v50, %v4541_v56 }
 0x500   : > { %2380 = vst [vmem:[%s4546_s29 + $0xb0] sm:$0xff] %v4631_v28  ;;  %3065 = vmatprep.mubr.f32.mxu1 %v1711_v53  ;;  %v1696_v63 = vmul.f32 %v3525_v59, %v1632_v47 }
 0x501   : > { %3530 = vpow2.f32 %v1677_v61  ;;  %v1652_v0 = vmul.f32 0.5, %v1599_v62  ;;  %2381 = vst [vmem:[%s4546_s29 + $0xb8] sm:$0xff] %v1599_v62  ;;  %v1602_v1 = vpop.f32.mrb[40].mxu0  ;;  %3319 = vmatpush3.bf16.msra.mxu1 %v3316_v36 }
 0x502   : > { %v4640_v38 = vadd.f32 %v1602_v1, %v4537_v55  ;;  %v1604_v3 = vpop.f32.mrb[41].mxu0  ;;  %v1712_v5 = vadd.f32 %v1696_v63, %v4595_v60  ;;  %3321 = vmatprep.subr.bf16.mxu1 %v3320_v58  ;;  %v1951_v63 = vld [vmem:[#allocation14 + $0x70] sm:$0xff] }
 0x503   : > { %v3527_v48 = vpop.eup %3526  ;;  %v1679_v6 = vmul.f32 1.442695, %v1652_v0  ;;  %v1605_v7 = vadd.f32 %v1604_v3, %v4541_v56  ;;  %v1952_v0 = vld [vmem:[#allocation14 + $0x78] sm:$0xff]  ;;  %v2153_v3 = vld [vmem:[#allocation16] sm:$0xff] }
 0x504   : > { %2382 = vst [vmem:[%s4546_s29 + $0xc0] sm:$0xff] %v4640_v38  ;;  %3066 = vmatmul.mubr.f32.gmra.mrb[54].mxu1 %v1712_v5  ;;  %v1697_v8 = vmul.f32 %v3527_v48, %v1633_v2  ;;  %v3324_v1 = vpack.c.bf16 %v1952_v0, %v1951_v63  ;;  %v2154_v2 = vld [vmem:[#allocation16 + $0x8] sm:$0xff]  ;;  %v2155_v48 = vld [vmem:[#allocation16 + $0x10] sm:$0xff] }
 0x505   : > { %3532 = vpow2.f32 %v1679_v6  ;;  %v1653_v9 = vmul.f32 0.5, %v1605_v7  ;;  %2383 = vst [vmem:[%s4546_s29 + $0xc8] sm:$0xff] %v1605_v7  ;;  %v1608_v10 = vpop.f32.mrb[42].mxu0  ;;  %3323 = vmatpush3.bf16.msra.mxu1 %v3320_v58  ;;  %v1640_v58 = vld [vmem:[%s4376_s16 + $0x78] sm:$0xff]  ;;  %v2158_v6 = vld [vmem:[#allocation16 + $0x28] sm:$0xff]  ;;  %s2442_s16 = sshll.u32 %s4546_s29, 4  ;;  %s4737_s16 = int_to_ptr.vmem [resolvable:$true] %s2442_s16 }
 0x506   : > { %v1609_v60 = vadd.f32 %v1608_v10, %v4537_v55  ;;  %v1610_v12 = vpop.f32.mrb[43].mxu0  ;;  %v1713_v14 = vadd.f32 %v1697_v8, %v4604_v49  ;;  %3325 = vmatprep.subr.bf16.mxu1 %v3324_v1  ;;  %v2160_v7 = vld [vmem:[#allocation16 + $0x38] sm:$0xff]  ;;  %v3330_v8 = vpack.c.bf16 %v2155_v48, %v2153_v3  ;;  %v2157_v10 = vld [vmem:[#allocation16 + $0x20] sm:$0xff]  ;;  %s3798_s9 = scalar_lea.vmem %s4737_s16, 4096  ;;  %p3805_p4 = scmp.lt.s32.totalorder %s4737_s16, %s3803_s2 }
 0x507   : > { %v3529_v4 = vpop.eup %3528  ;;  %v1681_v15 = vmul.f32 1.442695, %v1653_v9  ;;  %v1611_v17 = vadd.f32 %v1610_v12, %v4541_v56  ;;  %v3332_v9 = vpack.c.bf16 %v2160_v7, %v2158_v6  ;;  %v2164_v12 = vld [vmem:[#allocation16 + $0x58] sm:$0xff]  ;;  %p3799_p6 = scmp.ne.s32.totalorder %s4737_s16, %s3798_s9  ;;  %p3806_p8 = scmp.lt.s32.totalorder %s3804_s4, %s3798_s9 }
 0x508   : > { %2384 = vst [vmem:[%s4546_s29 + $0xd0] sm:$0xff] %v1609_v60  ;;  %3068 = vmatprep.mubr.f32.mxu1 %v1713_v14  ;;  %v1698_v18 = vmul.f32 %v3529_v4, %v1634_v57  ;;  %v2159_v57 = vld [vmem:[#allocation16 + $0x30] sm:$0xff] }
 0x509   : > { %3534 = vpow2.f32 %v1681_v15  ;;  %v1654_v16 = vmul.f32 0.5, %v1611_v17  ;;  %2385 = vst [vmem:[%s4546_s29 + $0xd8] sm:$0xff] %v1611_v17  ;;  %v1614_v13 = vpop.f32.mrb[44].mxu0  ;;  %3327 = vmatpush3.bf16.msra.mxu1 %v3324_v1  ;;  %v3334_v14 = vpack.c.bf16 %v2159_v57, %v2157_v10  ;;  %v2161_v15 = vld [vmem:[#allocation16 + $0x40] sm:$0xff]  ;;  %v2163_v17 = vld [vmem:[#allocation16 + $0x50] sm:$0xff]  ;;  %p3800_p5 = pnand %p3799_p6, %p4987_p10  ;;  %p3807_p11 = por %p3806_p8, %p3805_p4 }
 0x50a   : > { %v1615_v22 = vadd.f32 %v1614_v13, %v4537_v55  ;;  %v1616_v23 = vpop.f32.mrb[45].mxu0  ;;  %v1714_v49 = vadd.f32 %v1698_v18, %v4613_v11  ;;  %v2166_v18 = vld [vmem:[#allocation16 + $0x68] sm:$0xff]  ;;  %v3338_v13 = vpack.c.bf16 %v2163_v17, %v2161_v15 }
 0x50b   : > { %v3531_v24 = vpop.eup %3530  ;;  %v1683_v25 = vmul.f32 1.442695, %v1654_v16  ;;  %v1617_v27 = vadd.f32 %v1616_v23, %v4541_v56  ;;  %v2168_v16 = vld [vmem:[#allocation16 + $0x78] sm:$0xff]  ;;  %v2167_v23 = vld [vmem:[#allocation16 + $0x70] sm:$0xff]  ;;  %p3801_p9 = pneg %p3800_p5 }
 0x50c   : > { %2386 = vst [vmem:[%s4546_s29 + $0xe0] sm:$0xff] %v1615_v22  ;;  %3069 = vmatmul.mubr.f32.gmra.mrb[56].mxu1 %v1714_v49  ;;  %v1699_v29 = vmul.f32 %v3531_v24, %v1635_v21  ;;  %v3340_v21 = vpack.c.bf16 %v2168_v16, %v2166_v18  ;;  %v2170_v49 = vld [vmem:[#allocation16 + $0x88] sm:$0xff]  ;;  %v2172_v24 = vld [vmem:[#allocation16 + $0x98] sm:$0xff] }
 0x50d   : > { %3536 = vpow2.f32 %v1683_v25  ;;  %v1655_v30 = vmul.f32 0.5, %v1617_v27  ;;  %2387 = vst [vmem:[%s4546_s29 + $0xe8] sm:$0xff] %v1617_v27  ;;  %v1620_v31 = vpop.f32.mrb[46].mxu0  ;;  %v3344_v27 = vpack.c.bf16 %v2172_v24, %v2170_v49  ;;  %p3808_p3 = pnand %p3807_p11, %p3801_p9 }
 0x50e   : > { %v1621_v32 = vadd.f32 %v1620_v31, %v4537_v55  ;;  %v1622_v33 = vpop.f32.mrb[47].mxu0  ;;  %v1715_v11 = vadd.f32 %v1699_v29, %v4622_v19  ;;  %v2169_v29 = vld [vmem:[#allocation16 + $0x80] sm:$0xff]  ;;  %v2174_v31 = vld [vmem:[#allocation16 + $0xa8] sm:$0xff] }
 0x50f   : > { %v3533_v45 = vpop.eup %3532  ;;  %v1685_v34 = vmul.f32 1.442695, %v1655_v30  ;;  %v1623_v35 = vadd.f32 %v1622_v33, %v4541_v56  ;;  %v2171_v30 = vld [vmem:[#allocation16 + $0x90] sm:$0xff] }
 0x510   : > { %2388 = vst [vmem:[%s4546_s29 + $0xf0] sm:$0xff] %v1621_v32  ;;  %3071 = vmatprep.mubr.f32.mxu1 %v1715_v11  ;;  %v1700_v36 = vmul.f32 %v3533_v45, %v1636_v26  ;;  %v2176_v26 = vld [vmem:[#allocation16 + $0xb8] sm:$0xff]  ;;  %v2173_v11 = vld [vmem:[#allocation16 + $0xa0] sm:$0xff]  ;;  %v2175_v45 = vld [vmem:[#allocation16 + $0xb0] sm:$0xff] }
 0x511   : > { %3538 = vpow2.f32 %v1685_v34  ;;  %v1656_v37 = vmul.f32 0.5, %v1623_v35  ;;  %2389 = vst [vmem:[%s4546_s29 + $0xf8] sm:$0xff] %v1623_v35  ;;  %v3348_v33 = vpack.c.bf16 %v2176_v26, %v2174_v31  ;;  %v2178_v34 = vld [vmem:[#allocation16 + $0xc8] sm:$0xff]  ;;  %v2180_v35 = vld [vmem:[#allocation16 + $0xd8] sm:$0xff] }
 0x512   : > { %v1716_v40 = vadd.f32 %v1700_v36, %v4631_v28  ;;  %v3350_v36 = vpack.c.bf16 %v2175_v45, %v2173_v11 }
 0x513   : > { %v3535_v55 = vpop.eup %3534  ;;  %v1687_v41 = vmul.f32 1.442695, %v1656_v37  ;;  %v3352_v37 = vpack.c.bf16 %v2180_v35, %v2178_v34 }
 0x514   : > { %3072 = vmatmul.mubr.f32.gmra.mrb[58].mxu1 %v1716_v40  ;;  %v1701_v19 = vmul.f32 %v3535_v55, %v1637_v39  ;;  %v2177_v39 = vld [vmem:[#allocation16 + $0xc0] sm:$0xff]  ;;  %v2179_v40 = vld [vmem:[#allocation16 + $0xd0] sm:$0xff]  ;;  %v2182_v55 = vld [vmem:[#allocation16 + $0xe8] sm:$0xff] }
 0x515   : > { %3540 = vpow2.f32 %v1687_v41  ;;  %v2184_v41 = vld [vmem:[#allocation16 + $0xf8] sm:$0xff] }
 0x516   : > { %v1717_v43 = vadd.f32 %v1701_v19, %v4640_v38  ;;  %v2156_v38 = vld [vmem:[#allocation16 + $0x18] sm:$0xff]  ;;  %v3354_v19 = vpack.c.bf16 %v2179_v40, %v2177_v39 }
 0x517   : > { %v3537_v56 = vpop.eup %3536  ;;  %v3328_v5 = vpack.c.bf16 %v2156_v38, %v2154_v2 }
 0x518   : > { %3074 = vmatprep.mubr.f32.mxu1 %v1717_v43  ;;  %v1702_v44 = vmul.f32 %v3537_v56, %v1638_v42  ;;  %v3356_v42 = vpack.c.bf16 %v2184_v41, %v2182_v55  ;;  %v2181_v43 = vld [vmem:[#allocation16 + $0xe0] sm:$0xff]  ;;  %v2183_v56 = vld [vmem:[#allocation16 + $0xf0] sm:$0xff] }
 0x519   : > { %3329 = vmatprep.subr.bf16.mxu0 %v3328_v5 }
 0x51a   : > { %v1718_v47 = vadd.f32 %v1702_v44, %v1609_v60  ;;  %v2162_v60 = vld [vmem:[#allocation16 + $0x48] sm:$0xff]  ;;  %3331 = vmatpush1.bf16.msra.mxu0 %v3330_v8  ;;  %v3358_v44 = vpack.c.bf16 %v2183_v56, %v2181_v43 }
 0x51b   : > { %v3539_v50 = vpop.eup %3538  ;;  %3333 = vmatprep.subr.bf16.mxu0 %v3332_v9  ;;  %v3336_v4 = vpack.c.bf16 %v2164_v12, %v2162_v60 }
 0x51c   : > { %3075 = vmatmul.mubr.f32.gmra.mrb[60].mxu1 %v1718_v47  ;;  %v1703_v53 = vmul.f32 %v3539_v50, %v1639_v46  ;;  %v4674_v46 = vld [vmem:[%s4984_s7] ss:$0 sm:$0xff] }
 0x51e   : > { %v1719_v59 = vadd.f32 %v1703_v53, %v1615_v22  ;;  %3335 = vmatpush1.bf16.msra.mxu0 %v3334_v14  ;;  %v2165_v22 = vld [vmem:[#allocation16 + $0x60] sm:$0xff] }
 0x51f   : > { %v3541_v28 = vpop.eup %3540  ;;  %3337 = vmatprep.subr.bf16.mxu0 %v3336_v4  ;;  %v3342_v25 = vpack.c.bf16 %v2167_v23, %v2165_v22 }
 0x520   : > { %3077 = vmatprep.mubr.f32.mxu1 %v1719_v59  ;;  %v1704_v61 = vmul.f32 %v3541_v28, %v1640_v58 }
 0x522   : > { %v1720_v62 = vadd.f32 %v1704_v61, %v1621_v32  ;;  %3339 = vmatpush1.bf16.msra.mxu0 %v3338_v13  ;;  %v3346_v32 = vpack.c.bf16 %v2171_v30, %v2169_v29 }
 0x523   : > { %3341 = vmatprep.subr.bf16.mxu0 %v3340_v21 }
 0x524   : > { %3078 = vmatmul.mubr.f32.gmra.mrb[62].mxu1 %v1720_v62 }
 0x526   : > { %3343 = vmatpush1.bf16.msra.mxu0 %v3342_v25 }
 0x527   : > { %3345 = vmatprep.subr.bf16.mxu0 %v3344_v27 }
 0x52a   : > { %3347 = vmatpush1.bf16.msra.mxu0 %v3346_v32 }
 0x52b   : > { %3349 = vmatprep.subr.bf16.mxu0 %v3348_v33 }
 0x52e   : > { %3351 = vmatpush1.bf16.msra.mxu0 %v3350_v36 }
 0x52f   : > { %3353 = vmatprep.subr.bf16.mxu0 %v3352_v37 }
 0x532   : > { %3355 = vmatpush1.bf16.msra.mxu0 %v3354_v19 }
 0x533   : > { %3357 = vmatprep.subr.bf16.mxu0 %v3356_v42 }
 0x536   : > { %3359 = vmatpush1.bf16.msra.mxu0 %v3358_v44 }
 0x5bf   : > { %v3058_v47 = vpop.f32.mrb[48].mxu1 }
 0x5c0   : > { %v1816_v50 = vadd.f32 %v3058_v47, %v4674_v46  ;;  %v1810_v53 = vpop.f32.mrb[49].mxu1 }
 0x5c1   : > { %v1811_v58 = vadd.f32 %v4674_v46, %v1810_v53 }
 0x5c2   : > { %v1906_v59 = vmul.f32 0.01, %v1816_v50  ;;  %vm1890_vm0 = vcmp.ge.f32.partialorder %v1816_v50, 0.0 }
 0x5c3   : > { %v1905_v28 = vmul.f32 0.01, %v1811_v58  ;;  %vm1889_vm1 = vcmp.ge.f32.partialorder %v1811_v58, 0.0 }
 0x5c4   : > { %v1922_v62 = vsel %vm1890_vm0, %v1816_v50, %v1906_v59 }
 0x5c5   : > { %v1921_v61 = vsel %vm1889_vm1, %v1811_v58, %v1905_v28  ;;  %v4695_v28 = vld [vmem:[%s4985_s30] ss:$0 sm:$0xff] }
 0x5c6   : > { %3112 = vmatprep.mubr.f32.mxu1 %v1921_v61 }
 0x5c7   : > { %v3061_v63 = vpop.f32.mrb[50].mxu1  ;;  %3113 = vmatmul.mubr.f32.vlgmr.msra.gmra.mrb[64].mxu1 %v1922_v62 }
 0x5c8   : > { %v1826_v0 = vadd.f32 %v3061_v63, %v4674_v46  ;;  %v1820_v1 = vpop.f32.mrb[51].mxu1 }
 0x5c9   : > { %v1821_v2 = vadd.f32 %v4674_v46, %v1820_v1 }
 0x5ca   : > { %v1908_v38 = vmul.f32 0.01, %v1826_v0  ;;  %vm1892_vm3 = vcmp.ge.f32.partialorder %v1826_v0, 0.0 }
 0x5cb   : > { %v1907_v3 = vmul.f32 0.01, %v1821_v2  ;;  %vm1891_vm2 = vcmp.ge.f32.partialorder %v1821_v2, 0.0 }
 0x5cc   : > { %v1924_v48 = vsel %vm1892_vm3, %v1826_v0, %v1908_v38 }
 0x5cd   : > { %v1923_v5 = vsel %vm1891_vm2, %v1821_v2, %v1907_v3 }
 0x5ce   : > { %3115 = vmatprep.mubr.f32.mxu1 %v1923_v5 }
 0x5cf   : > { %v3064_v6 = vpop.f32.mrb[52].mxu1  ;;  %3116 = vmatmul.mubr.f32.gmra.mrb[66].mxu1 %v1924_v48 }
 0x5d0   : > { %v1836_v7 = vadd.f32 %v3064_v6, %v4674_v46  ;;  %v1830_v8 = vpop.f32.mrb[53].mxu1 }
 0x5d1   : > { %v1831_v9 = vadd.f32 %v4674_v46, %v1830_v8 }
 0x5d2   : > { %v1910_v10 = vmul.f32 0.01, %v1836_v7  ;;  %vm1894_vm5 = vcmp.ge.f32.partialorder %v1836_v7, 0.0 }
 0x5d3   : > { %v1909_v57 = vmul.f32 0.01, %v1831_v9  ;;  %vm1893_vm4 = vcmp.ge.f32.partialorder %v1831_v9, 0.0 }
 0x5d4   : > { %v1926_v12 = vsel %vm1894_vm5, %v1836_v7, %v1910_v10 }
 0x5d5   : > { %v1925_v60 = vsel %vm1893_vm4, %v1831_v9, %v1909_v57 }
 0x5d6   : > { %3118 = vmatprep.mubr.f32.mxu1 %v1925_v60 }
 0x5d7   : > { %v3067_v14 = vpop.f32.mrb[54].mxu1  ;;  %3119 = vmatmul.mubr.f32.gmra.mrb[68].mxu1 %v1926_v12 }
 0x5d8   : > { %v1846_v4 = vadd.f32 %v3067_v14, %v4674_v46  ;;  %v1840_v15 = vpop.f32.mrb[55].mxu1 }
 0x5d9   : > { %v1841_v17 = vadd.f32 %v4674_v46, %v1840_v15 }
 0x5da   : > { %v1912_v18 = vmul.f32 0.01, %v1846_v4  ;;  %vm1896_vm7 = vcmp.ge.f32.partialorder %v1846_v4, 0.0 }
 0x5db   : > { %v1911_v16 = vmul.f32 0.01, %v1841_v17  ;;  %vm1895_vm6 = vcmp.ge.f32.partialorder %v1841_v17, 0.0 }
 0x5dc   : > { %v1928_v21 = vsel %vm1896_vm7, %v1846_v4, %v1912_v18 }
 0x5dd   : > { %v1927_v13 = vsel %vm1895_vm6, %v1841_v17, %v1911_v16 }
 0x5de   : > { %3121 = vmatprep.mubr.f32.mxu1 %v1927_v13 }
 0x5df   : > { %v3070_v22 = vpop.f32.mrb[56].mxu1  ;;  %3122 = vmatmul.mubr.f32.gmra.mrb[70].mxu1 %v1928_v21 }
 0x5e0   : > { %v1856_v23 = vadd.f32 %v3070_v22, %v4674_v46  ;;  %v1850_v49 = vpop.f32.mrb[57].mxu1 }
 0x5e1   : > { %v1851_v24 = vadd.f32 %v4674_v46, %v1850_v49 }
 0x5e2   : > { %v1914_v25 = vmul.f32 0.01, %v1856_v23  ;;  %vm1898_vm9 = vcmp.ge.f32.partialorder %v1856_v23, 0.0 }
 0x5e3   : > { %v1913_v27 = vmul.f32 0.01, %v1851_v24  ;;  %vm1897_vm8 = vcmp.ge.f32.partialorder %v1851_v24, 0.0 }
 0x5e4   : > { %v1930_v30 = vsel %vm1898_vm9, %v1856_v23, %v1914_v25 }
 0x5e5   : > { %v1929_v29 = vsel %vm1897_vm8, %v1851_v24, %v1913_v27 }
 0x5e6   : > { %3124 = vmatprep.mubr.f32.mxu1 %v1929_v29 }
 0x5e7   : > { %v3073_v31 = vpop.f32.mrb[58].mxu1  ;;  %3125 = vmatmul.mubr.f32.gmra.mrb[72].mxu1 %v1930_v30 }
 0x5e8   : > { %v1866_v26 = vadd.f32 %v3073_v31, %v4674_v46  ;;  %v1860_v32 = vpop.f32.mrb[59].mxu1 }
 0x5e9   : > { %v1861_v33 = vadd.f32 %v4674_v46, %v1860_v32 }
 0x5ea   : > { %v1916_v11 = vmul.f32 0.01, %v1866_v26  ;;  %vm1900_vm11 = vcmp.ge.f32.partialorder %v1866_v26, 0.0 }
 0x5eb   : > { %v1915_v45 = vmul.f32 0.01, %v1861_v33  ;;  %vm1899_vm10 = vcmp.ge.f32.partialorder %v1861_v33, 0.0 }
 0x5ec   : > { %v1932_v35 = vsel %vm1900_vm11, %v1866_v26, %v1916_v11 }
 0x5ed   : > { %v1931_v34 = vsel %vm1899_vm10, %v1861_v33, %v1915_v45 }
 0x5ee   : > { %3127 = vmatprep.mubr.f32.mxu1 %v1931_v34 }
 0x5ef   : > { %v3076_v36 = vpop.f32.mrb[60].mxu1  ;;  %3128 = vmatmul.mubr.f32.gmra.mrb[74].mxu1 %v1932_v35 }
 0x5f0   : > { %v1876_v37 = vadd.f32 %v3076_v36, %v4674_v46  ;;  %v1870_v39 = vpop.f32.mrb[61].mxu1 }
 0x5f1   : > { %v1871_v40 = vadd.f32 %v4674_v46, %v1870_v39 }
 0x5f2   : > { %v1918_v55 = vmul.f32 0.01, %v1876_v37  ;;  %vm1902_vm13 = vcmp.ge.f32.partialorder %v1876_v37, 0.0 }
 0x5f3   : > { %v1917_v41 = vmul.f32 0.01, %v1871_v40  ;;  %vm1901_vm12 = vcmp.ge.f32.partialorder %v1871_v40, 0.0 }
 0x5f4   : > { %v1934_v42 = vsel %vm1902_vm13, %v1876_v37, %v1918_v55 }
 0x5f5   : > { %v1933_v19 = vsel %vm1901_vm12, %v1871_v40, %v1917_v41 }
 0x5f6   : > { %3130 = vmatprep.mubr.f32.mxu1 %v1933_v19 }
 0x5f7   : > { %v3079_v43 = vpop.f32.mrb[62].mxu1  ;;  %3131 = vmatmul.mubr.f32.gmra.mrb[76].mxu1 %v1934_v42 }
 0x5f8   : > { %v1886_v56 = vadd.f32 %v3079_v43, %v4674_v46  ;;  %v1880_v44 = vpop.f32.mrb[63].mxu1 }
 0x5f9   : > { %v1881_v47 = vadd.f32 %v4674_v46, %v1880_v44 }
 0x5fa   : > { %v1920_v50 = vmul.f32 0.01, %v1886_v56  ;;  %vm1904_vm15 = vcmp.ge.f32.partialorder %v1886_v56, 0.0 }
 0x5fb   : > { %v1919_v53 = vmul.f32 0.01, %v1881_v47  ;;  %vm1903_vm14 = vcmp.ge.f32.partialorder %v1881_v47, 0.0 }
 0x5fc   : > { %v1936_v59 = vsel %vm1904_vm15, %v1886_v56, %v1920_v50 }
 0x5fd   : > { %v1935_v58 = vsel %vm1903_vm14, %v1881_v47, %v1919_v53 }
 0x5fe   : > { %3133 = vmatprep.mubr.f32.mxu1 %v1935_v58 }
 0x5ff   : > { %3134 = vmatmul.mubr.f32.gmra.mrb[78].mxu1 %v1936_v59 }
 0x69a   : > { %v3114_v61 = vpop.f32.mrb[64].mxu1 }
 0x69b   : > { %v2026_v62 = vpop.f32.mrb[65].mxu1  ;;  %v2032_v63 = vadd.f32 %v3114_v61, %v4695_v28 }
 0x69c   : > { %v2027_v0 = vadd.f32 %v4695_v28, %v2026_v62 }
 0x69d   : > { %v2122_v1 = vmul.f32 0.01, %v2032_v63  ;;  %vm2106_vm1 = vcmp.ge.f32.partialorder %v2032_v63, 0.0 }
 0x69e   : > { %vm2105_vm0 = vcmp.ge.f32.partialorder %v2027_v0, 0.0  ;;  %v2121_v46 = vmul.f32 0.01, %v2027_v0 }
 0x69f   : > { %v2138_v6 = vsel %vm2106_vm1, %v2032_v63, %v2122_v1 }
 0x6a0   : > { %v2137_v2 = vsel %vm2105_vm0, %v2027_v0, %v2121_v46 }
 0x6a1   : > { %2262 = vmatmul.mubr.f32.vlgmr.msra.gmra.mrb[48].mxu0 %v2137_v2 }
 0x6a2   : > { %v3117_v38 = vpop.f32.mrb[66].mxu1  ;;  %2267 = vmatprep.mubr.f32.mxu0 %v3931_v20 }
 0x6a3   : > { %v2036_v3 = vpop.f32.mrb[67].mxu1  ;;  %v2042_v5 = vadd.f32 %v3117_v38, %v4695_v28 }
 0x6a4   : > { %v2037_v48 = vadd.f32 %v4695_v28, %v2036_v3 }
 0x6a5   : > { %2268 = vmatmul.mubr.f32.gmra.mrb[50].mxu0 %v2138_v6  ;;  %v2124_v8 = vmul.f32 0.01, %v2042_v5  ;;  %vm2108_vm3 = vcmp.ge.f32.partialorder %v2042_v5, 0.0 }
 0x6a6   : > { %v2123_v7 = vmul.f32 0.01, %v2037_v48  ;;  %2273 = vmatprep.mubr.f32.mxu0 %v3931_v20  ;;  %vm2107_vm2 = vcmp.ge.f32.partialorder %v2037_v48, 0.0 }
 0x6a7   : > { %v2140_v14 = vsel %vm2108_vm3, %v2042_v5, %v2124_v8 }
 0x6a8   : > { %v2139_v9 = vsel %vm2107_vm2, %v2037_v48, %v2123_v7 }
 0x6a9   : > { %2274 = vmatmul.mubr.f32.gmra.mrb[52].mxu0 %v2139_v9 }
 0x6aa   : > { %v3120_v10 = vpop.f32.mrb[68].mxu1  ;;  %2279 = vmatprep.mubr.f32.mxu0 %v3931_v20 }
 0x6ab   : > { %v2046_v57 = vpop.f32.mrb[69].mxu1  ;;  %v2052_v60 = vadd.f32 %v3120_v10, %v4695_v28 }
 0x6ac   : > { %v2047_v12 = vadd.f32 %v4695_v28, %v2046_v57 }
 0x6ad   : > { %2280 = vmatmul.mubr.f32.gmra.mrb[54].mxu0 %v2140_v14  ;;  %v2126_v15 = vmul.f32 0.01, %v2052_v60  ;;  %vm2110_vm5 = vcmp.ge.f32.partialorder %v2052_v60, 0.0 }
 0x6ae   : > { %v2125_v4 = vmul.f32 0.01, %v2047_v12  ;;  %2285 = vmatprep.mubr.f32.mxu0 %v3931_v20  ;;  %vm2109_vm4 = vcmp.ge.f32.partialorder %v2047_v12, 0.0 }
 0x6af   : > { %v2142_v22 = vsel %vm2110_vm5, %v2052_v60, %v2126_v15 }
 0x6b0   : > { %v2141_v17 = vsel %vm2109_vm4, %v2047_v12, %v2125_v4 }
 0x6b1   : > { %2286 = vmatmul.mubr.f32.gmra.mrb[56].mxu0 %v2141_v17 }
 0x6b2   : > { %v3123_v18 = vpop.f32.mrb[70].mxu1  ;;  %2291 = vmatprep.mubr.f32.mxu0 %v3931_v20 }
 0x6b3   : > { %v2056_v16 = vpop.f32.mrb[71].mxu1  ;;  %v2062_v13 = vadd.f32 %v3123_v18, %v4695_v28 }
 0x6b4   : > { %v2057_v21 = vadd.f32 %v4695_v28, %v2056_v16 }
 0x6b5   : > { %2292 = vmatmul.mubr.f32.gmra.mrb[58].mxu0 %v2142_v22  ;;  %v2128_v49 = vmul.f32 0.01, %v2062_v13  ;;  %vm2112_vm7 = vcmp.ge.f32.partialorder %v2062_v13, 0.0 }
 0x6b6   : > { %v2127_v23 = vmul.f32 0.01, %v2057_v21  ;;  %2297 = vmatprep.mubr.f32.mxu0 %v3931_v20  ;;  %vm2111_vm6 = vcmp.ge.f32.partialorder %v2057_v21, 0.0 }
 0x6b7   : > { %v2144_v31 = vsel %vm2112_vm7, %v2062_v13, %v2128_v49 }
 0x6b8   : > { %v2143_v24 = vsel %vm2111_vm6, %v2057_v21, %v2127_v23 }
 0x6b9   : > { %2298 = vmatmul.mubr.f32.gmra.mrb[60].mxu0 %v2143_v24 }
 0x6ba   : > { %v3126_v25 = vpop.f32.mrb[72].mxu1  ;;  %2303 = vmatprep.mubr.f32.mxu0 %v3931_v20 }
 0x6bb   : > { %v2066_v27 = vpop.f32.mrb[73].mxu1  ;;  %v2072_v29 = vadd.f32 %v3126_v25, %v4695_v28 }
 0x6bc   : > { %v2067_v30 = vadd.f32 %v4695_v28, %v2066_v27 }
 0x6bd   : > { %2304 = vmatmul.mubr.f32.gmra.mrb[62].mxu0 %v2144_v31  ;;  %v2130_v32 = vmul.f32 0.01, %v2072_v29  ;;  %vm2114_vm9 = vcmp.ge.f32.partialorder %v2072_v29, 0.0 }
 0x6be   : > { %v2129_v26 = vmul.f32 0.01, %v2067_v30  ;;  %2309 = vmatprep.mubr.f32.mxu0 %v3931_v20  ;;  %vm2113_vm8 = vcmp.ge.f32.partialorder %v2067_v30, 0.0 }
 0x6bf   : > { %v2146_v36 = vsel %vm2114_vm9, %v2072_v29, %v2130_v32 }
 0x6c0   : > { %v2145_v33 = vsel %vm2113_vm8, %v2067_v30, %v2129_v26 }
 0x6c1   : > { %2310 = vmatmul.mubr.f32.gmra.mrb[64].mxu0 %v2145_v33 }
 0x6c2   : > { %v3129_v11 = vpop.f32.mrb[74].mxu1  ;;  %2315 = vmatprep.mubr.f32.mxu0 %v3931_v20 }
 0x6c3   : > { %v2076_v45 = vpop.f32.mrb[75].mxu1  ;;  %v2082_v34 = vadd.f32 %v3129_v11, %v4695_v28 }
 0x6c4   : > { %v2077_v35 = vadd.f32 %v4695_v28, %v2076_v45 }
 0x6c5   : > { %2316 = vmatmul.mubr.f32.gmra.mrb[66].mxu0 %v2146_v36  ;;  %v2132_v39 = vmul.f32 0.01, %v2082_v34  ;;  %vm2116_vm11 = vcmp.ge.f32.partialorder %v2082_v34, 0.0 }
 0x6c6   : > { %v2131_v37 = vmul.f32 0.01, %v2077_v35  ;;  %2321 = vmatprep.mubr.f32.mxu0 %v3931_v20  ;;  %vm2115_vm10 = vcmp.ge.f32.partialorder %v2077_v35, 0.0 }
 0x6c7   : > { %v2148_v43 = vsel %vm2116_vm11, %v2082_v34, %v2132_v39 }
 0x6c8   : > { %v2147_v40 = vsel %vm2115_vm10, %v2077_v35, %v2131_v37 }
 0x6c9   : > { %2322 = vmatmul.mubr.f32.gmra.mrb[68].mxu0 %v2147_v40 }
 0x6ca   : > { %v3132_v55 = vpop.f32.mrb[76].mxu1  ;;  %2327 = vmatprep.mubr.f32.mxu0 %v3931_v20 }
 0x6cb   : > { %v2086_v41 = vpop.f32.mrb[77].mxu1  ;;  %v2092_v19 = vadd.f32 %v3132_v55, %v4695_v28 }
 0x6cc   : > { %v2087_v42 = vadd.f32 %v4695_v28, %v2086_v41 }
 0x6cd   : > { %2328 = vmatmul.mubr.f32.gmra.mrb[70].mxu0 %v2148_v43  ;;  %v2134_v44 = vmul.f32 0.01, %v2092_v19  ;;  %vm2118_vm13 = vcmp.ge.f32.partialorder %v2092_v19, 0.0 }
 0x6ce   : > { %v2133_v56 = vmul.f32 0.01, %v2087_v42  ;;  %2333 = vmatprep.mubr.f32.mxu0 %v3931_v20  ;;  %vm2117_vm12 = vcmp.ge.f32.partialorder %v2087_v42, 0.0 }
 0x6cf   : > { %v2150_v61 = vsel %vm2118_vm13, %v2092_v19, %v2134_v44 }
 0x6d0   : > { %v2149_v47 = vsel %vm2117_vm12, %v2087_v42, %v2133_v56 }
 0x6d1   : > { %2334 = vmatmul.mubr.f32.gmra.mrb[72].mxu0 %v2149_v47 }
 0x6d2   : > { %v3135_v50 = vpop.f32.mrb[78].mxu1  ;;  %2339 = vmatprep.mubr.f32.mxu0 %v3931_v20 }
 0x6d3   : > { %v2096_v53 = vpop.f32.mrb[79].mxu1  ;;  %v2102_v58 = vadd.f32 %v3135_v50, %v4695_v28 }
 0x6d4   : > { %v2097_v59 = vadd.f32 %v4695_v28, %v2096_v53 }
 0x6d5   : > { %2340 = vmatmul.mubr.f32.gmra.mrb[74].mxu0 %v2150_v61  ;;  %v2136_v63 = vmul.f32 0.01, %v2102_v58  ;;  %vm2120_vm15 = vcmp.ge.f32.partialorder %v2102_v58, 0.0 }
 0x6d6   : > { %v2135_v62 = vmul.f32 0.01, %v2097_v59  ;;  %2345 = vmatprep.mubr.f32.mxu0 %v3931_v20  ;;  %vm2119_vm14 = vcmp.ge.f32.partialorder %v2097_v59, 0.0 }
 0x6d7   : > { %v2152_v46 = vsel %vm2120_vm15, %v2102_v58, %v2136_v63 }
 0x6d8   : > { %v2151_v0 = vsel %vm2119_vm14, %v2097_v59, %v2135_v62 }
 0x6d9   : > { %2346 = vmatmul.mubr.f32.gmra.mrb[76].mxu0 %v2151_v0 }
 0x6da   : > { %2351 = vmatprep.mubr.f32.mxu0 %v3931_v20 }
 0x6dd   : > { %2352 = vmatmul.mubr.f32.gmra.mrb[78].mxu0 %v2152_v46 }
 0x6de   : > { %3811 = shalt.err (!%p3808_p3)
}
 0x6df   : > { %s3812_s12 = scalar_lea.hbm %s4735_s28, 4096  ;;  %s3816_s22 = scalar_lea.hbm %s4986_s19, 8192 }
 0x6e0   : > { %p3813_p12 = scmp.ne.s32.totalorder %s4735_s28, %s3812_s12  ;;  %p3817_p0 = scmp.lt.u32.totalorder %s4735_s28, %s4986_s19 }
 0x6e1   : > { %p3818_p7 = scmp.lt.u32.totalorder %s3816_s22, %s3812_s12  ;;  %p3820_p6 = scmp.lt.u32.totalorder %s3812_s12, %s4735_s28 }
 0x6e2   : > { %p3814_p1 = pnand %p3813_p12, %p4987_p10 }
 0x6e3   : > { %p3819_p2 = por %p3818_p7, %p3817_p0 }
 0x6e4   : > { %p3815_p13 = pneg %p3814_p1 }
 0x6e5   : > { %p3821_p5 = por %p3820_p6, %p3819_p2 }
 0x6e7   : > { %p3822_p9 = pnand %p3821_p5, %p3815_p13 }
 0x6e9   : > { %3825 = shalt.err (!%p3822_p9)
}
 0x6ea   : > { %s3933_s14 = smov 256   ;;  %s3934_s30 = smov 16  }
 0x6eb   : > { %3408 = dma.vmem_to_hbm [thread:$0]  (%p4987_p10), %s4737_s16, 4096, %s4735_s28, %s2423_s8, %s3933_s14, %s3933_s14, %s3934_s30  }
 0x6ec   : > { %s4988_s9 = sld [smem:[#allocation43_spill]]  ;;  %s4780_s20 = scalar_lea.vmem [#allocation18], %s4364_s1 }
 0x6ed   : > { %s2459_s1 = sshll.u32 %s4780_s20, 4  ;;  %s4989_s8 = sld [smem:[#allocation45_spill]]  ;;  %s4850_s1 = int_to_ptr.vmem [resolvable:$true] %s2459_s1 }
 0x6ee   : > { %s2428_s4 = scalar_lea.sflag [#allocation19], %s4361_s26  ;;  %s3826_s12 = scalar_lea.vmem %s4850_s1, 4096 }
 0x6ef   : > { %p3827_p4 = scmp.ne.s32.totalorder %s4850_s1, %s3826_s12  ;;  %s3935_s29 = smov [#allocation18]  }
 0x6f0   : > { %s3830_s0 = sshll.u32 %s3935_s29, 4  ;;  %s3831_s0 = int_to_ptr.vmem [resolvable:$false] %s3830_s0 }
 0x6f1   : > { %p3828_p8 = pnand %p3827_p4, %p4987_p10  ;;  %s3832_s10 = scalar_lea.vmem %s3831_s0, 8192 }
 0x6f2   : > { %v2185_v20 = vld [vmem:[%s4988_s9] sm:$0x3]  ;;  %p3833_p3 = scmp.lt.s32.totalorder %s4850_s1, %s3831_s0  ;;  %p3834_p12 = scmp.lt.s32.totalorder %s3832_s10, %s3826_s12 }
 0x6f3   : > { %v4771_v28 = vrot.slane %v2185_v20, %v1456_v52  ;;  %v4775_v1 = vrot.slane %v2185_v20, %v1460_v54  ;;  %s4848_s2 = scalar_lea.hbm %s4989_s8, %s2701_s17  ;;  %p3829_p11 = pneg %p3828_p8 }
 0x6f4   : > { %p3835_p1 = por %p3834_p12, %p3833_p3 }
 0x6f6   : > { %p3836_p13 = pnand %p3835_p1, %p3829_p11 }
 0x774   : > { %v2263_v2 = vpop.f32.mrb[48].mxu0 }
 0x775   : > { %v2264_v38 = vadd.f32 %v2263_v2, %v4771_v28  ;;  %v2265_v3 = vpop.f32.mrb[49].mxu0 }
 0x776   : > { %v2266_v5 = vadd.f32 %v2265_v3, %v4775_v1 }
 0x777   : > { %2390 = vst [vmem:[%s4780_s20] sm:$0xff] %v2264_v38 }
 0x778   : > { %2391 = vst [vmem:[%s4780_s20 + $0x8] sm:$0xff] %v2266_v5  ;;  %v2269_v52 = vpop.f32.mrb[50].mxu0 }
 0x779   : > { %v2270_v51 = vadd.f32 %v2269_v52, %v4771_v28  ;;  %v2271_v54 = vpop.f32.mrb[51].mxu0 }
 0x77a   : > { %v2272_v48 = vadd.f32 %v2271_v54, %v4775_v1 }
 0x77b   : > { %2392 = vst [vmem:[%s4780_s20 + $0x10] sm:$0xff] %v2270_v51 }
 0x77c   : > { %2393 = vst [vmem:[%s4780_s20 + $0x18] sm:$0xff] %v2272_v48  ;;  %v2275_v6 = vpop.f32.mrb[52].mxu0 }
 0x77d   : > { %v2276_v7 = vadd.f32 %v2275_v6, %v4771_v28  ;;  %v2277_v8 = vpop.f32.mrb[53].mxu0 }
 0x77e   : > { %v2278_v9 = vadd.f32 %v2277_v8, %v4775_v1 }
 0x77f   : > { %2394 = vst [vmem:[%s4780_s20 + $0x20] sm:$0xff] %v2276_v7 }
 0x780   : > { %2395 = vst [vmem:[%s4780_s20 + $0x28] sm:$0xff] %v2278_v9  ;;  %v2281_v10 = vpop.f32.mrb[54].mxu0 }
 0x781   : > { %v2282_v57 = vadd.f32 %v2281_v10, %v4771_v28  ;;  %v2283_v60 = vpop.f32.mrb[55].mxu0 }
 0x782   : > { %v2284_v12 = vadd.f32 %v2283_v60, %v4775_v1 }
 0x783   : > { %2396 = vst [vmem:[%s4780_s20 + $0x30] sm:$0xff] %v2282_v57 }
 0x784   : > { %2397 = vst [vmem:[%s4780_s20 + $0x38] sm:$0xff] %v2284_v12  ;;  %v2287_v14 = vpop.f32.mrb[56].mxu0 }
 0x785   : > { %v2288_v4 = vadd.f32 %v2287_v14, %v4771_v28  ;;  %v2289_v15 = vpop.f32.mrb[57].mxu0 }
 0x786   : > { %v2290_v17 = vadd.f32 %v2289_v15, %v4775_v1 }
 0x787   : > { %2398 = vst [vmem:[%s4780_s20 + $0x40] sm:$0xff] %v2288_v4 }
 0x788   : > { %2399 = vst [vmem:[%s4780_s20 + $0x48] sm:$0xff] %v2290_v17  ;;  %v2293_v18 = vpop.f32.mrb[58].mxu0 }
 0x789   : > { %v2294_v16 = vadd.f32 %v2293_v18, %v4771_v28  ;;  %v2295_v13 = vpop.f32.mrb[59].mxu0 }
 0x78a   : > { %v2296_v21 = vadd.f32 %v2295_v13, %v4775_v1 }
 0x78b   : > { %2400 = vst [vmem:[%s4780_s20 + $0x50] sm:$0xff] %v2294_v16 }
 0x78c   : > { %2401 = vst [vmem:[%s4780_s20 + $0x58] sm:$0xff] %v2296_v21  ;;  %v2299_v22 = vpop.f32.mrb[60].mxu0 }
 0x78d   : > { %v2300_v23 = vadd.f32 %v2299_v22, %v4771_v28  ;;  %v2301_v49 = vpop.f32.mrb[61].mxu0 }
 0x78e   : > { %v2302_v24 = vadd.f32 %v2301_v49, %v4775_v1 }
 0x78f   : > { %2402 = vst [vmem:[%s4780_s20 + $0x60] sm:$0xff] %v2300_v23 }
 0x790   : > { %2403 = vst [vmem:[%s4780_s20 + $0x68] sm:$0xff] %v2302_v24  ;;  %v2305_v25 = vpop.f32.mrb[62].mxu0 }
 0x791   : > { %v2306_v27 = vadd.f32 %v2305_v25, %v4771_v28  ;;  %v2307_v29 = vpop.f32.mrb[63].mxu0 }
 0x792   : > { %v2308_v30 = vadd.f32 %v2307_v29, %v4775_v1 }
 0x793   : > { %2404 = vst [vmem:[%s4780_s20 + $0x70] sm:$0xff] %v2306_v27 }
 0x794   : > { %2405 = vst [vmem:[%s4780_s20 + $0x78] sm:$0xff] %v2308_v30  ;;  %v2311_v31 = vpop.f32.mrb[64].mxu0 }
 0x795   : > { %v2312_v26 = vadd.f32 %v2311_v31, %v4771_v28  ;;  %v2313_v32 = vpop.f32.mrb[65].mxu0 }
 0x796   : > { %v2314_v33 = vadd.f32 %v2313_v32, %v4775_v1 }
 0x797   : > { %2406 = vst [vmem:[%s4780_s20 + $0x80] sm:$0xff] %v2312_v26 }
 0x798   : > { %2407 = vst [vmem:[%s4780_s20 + $0x88] sm:$0xff] %v2314_v33  ;;  %v2317_v11 = vpop.f32.mrb[66].mxu0 }
 0x799   : > { %v2318_v45 = vadd.f32 %v2317_v11, %v4771_v28  ;;  %v2319_v34 = vpop.f32.mrb[67].mxu0 }
 0x79a   : > { %v2320_v35 = vadd.f32 %v2319_v34, %v4775_v1 }
 0x79b   : > { %2408 = vst [vmem:[%s4780_s20 + $0x90] sm:$0xff] %v2318_v45 }
 0x79c   : > { %2409 = vst [vmem:[%s4780_s20 + $0x98] sm:$0xff] %v2320_v35  ;;  %v2323_v36 = vpop.f32.mrb[68].mxu0 }
 0x79d   : > { %v2324_v37 = vadd.f32 %v2323_v36, %v4771_v28  ;;  %v2325_v39 = vpop.f32.mrb[69].mxu0 }
 0x79e   : > { %v2326_v40 = vadd.f32 %v2325_v39, %v4775_v1 }
 0x79f   : > { %2410 = vst [vmem:[%s4780_s20 + $0xa0] sm:$0xff] %v2324_v37 }
 0x7a0   : > { %2411 = vst [vmem:[%s4780_s20 + $0xa8] sm:$0xff] %v2326_v40  ;;  %v2329_v55 = vpop.f32.mrb[70].mxu0 }
 0x7a1   : > { %v2330_v41 = vadd.f32 %v2329_v55, %v4771_v28  ;;  %v2331_v19 = vpop.f32.mrb[71].mxu0 }
 0x7a2   : > { %v2332_v42 = vadd.f32 %v2331_v19, %v4775_v1 }
 0x7a3   : > { %2412 = vst [vmem:[%s4780_s20 + $0xb0] sm:$0xff] %v2330_v41 }
 0x7a4   : > { %2413 = vst [vmem:[%s4780_s20 + $0xb8] sm:$0xff] %v2332_v42  ;;  %v2335_v43 = vpop.f32.mrb[72].mxu0 }
 0x7a5   : > { %v2336_v56 = vadd.f32 %v2335_v43, %v4771_v28  ;;  %v2337_v44 = vpop.f32.mrb[73].mxu0 }
 0x7a6   : > { %v2338_v47 = vadd.f32 %v2337_v44, %v4775_v1 }
 0x7a7   : > { %2414 = vst [vmem:[%s4780_s20 + $0xc0] sm:$0xff] %v2336_v56 }
 0x7a8   : > { %2415 = vst [vmem:[%s4780_s20 + $0xc8] sm:$0xff] %v2338_v47  ;;  %v2341_v50 = vpop.f32.mrb[74].mxu0 }
 0x7a9   : > { %v2342_v53 = vadd.f32 %v2341_v50, %v4771_v28  ;;  %v2343_v58 = vpop.f32.mrb[75].mxu0 }
 0x7aa   : > { %v2344_v59 = vadd.f32 %v2343_v58, %v4775_v1 }
 0x7ab   : > { %2416 = vst [vmem:[%s4780_s20 + $0xd0] sm:$0xff] %v2342_v53 }
 0x7ac   : > { %2417 = vst [vmem:[%s4780_s20 + $0xd8] sm:$0xff] %v2344_v59  ;;  %v2347_v61 = vpop.f32.mrb[76].mxu0 }
 0x7ad   : > { %v2348_v62 = vadd.f32 %v2347_v61, %v4771_v28  ;;  %v2349_v63 = vpop.f32.mrb[77].mxu0 }
 0x7ae   : > { %v2350_v0 = vadd.f32 %v2349_v63, %v4775_v1 }
 0x7af   : > { %2418 = vst [vmem:[%s4780_s20 + $0xe0] sm:$0xff] %v2348_v62 }
 0x7b0   : > { %2419 = vst [vmem:[%s4780_s20 + $0xe8] sm:$0xff] %v2350_v0  ;;  %v2353_v46 = vpop.f32.mrb[78].mxu0 }
 0x7b1   : > { %v2354_v20 = vadd.f32 %v2353_v46, %v4771_v28  ;;  %v2355_v2 = vpop.f32.mrb[79].mxu0 }
 0x7b2   : > { %v2356_v38 = vadd.f32 %v2355_v2, %v4775_v1 }
 0x7b3   : > { %2420 = vst [vmem:[%s4780_s20 + $0xf0] sm:$0xff] %v2354_v20 }
 0x7b4   : > { %2421 = vst [vmem:[%s4780_s20 + $0xf8] sm:$0xff] %v2356_v38 }
 0x7b5   : > { %3839 = shalt.err (!%p3836_p13)
}
 0x7b6   : > { %s3840_s17 = scalar_lea.hbm %s4848_s2, 4096  ;;  %s3844_s6 = scalar_lea.hbm %s4989_s8, 8192 }
 0x7b7   : > { %p3841_p0 = scmp.ne.s32.totalorder %s4848_s2, %s3840_s17  ;;  %p3845_p6 = scmp.lt.u32.totalorder %s4848_s2, %s4989_s8 }
 0x7b8   : > { %p3846_p5 = scmp.lt.u32.totalorder %s3844_s6, %s3840_s17  ;;  %p3848_p4 = scmp.lt.u32.totalorder %s3840_s17, %s4848_s2 }
 0x7b9   : > { %p3842_p7 = pnand %p3841_p0, %p4987_p10 }
 0x7ba   : > { %p3847_p9 = por %p3846_p5, %p3845_p6 }
 0x7bb   : > { %p3843_p2 = pneg %p3842_p7 }
 0x7bc   : > { %p3849_p8 = por %p3848_p4, %p3847_p9 }
 0x7be   : > { %p3850_p11 = pnand %p3849_p8, %p3843_p2 }
 0x7c0   : > { %3853 = shalt.err (!%p3850_p11)
}
 0x7c1   : > { %3409 = dma.vmem_to_hbm [thread:$0]  (%p4987_p10), %s4850_s1, 4096, %s4848_s2, %s2428_s4, %s3933_s14, %s3933_s14, %s3934_s30  }
 0x7c2 PF: > { %s2474_s9 = sand.u32 1, %s3904_s24   ;;  %p4990_p3 = scmp.ne.s32.totalorder %s4967_s15, 0 }
 0x7c3   : > { %p4991_p12 = scmp.ge.s32.totalorder %s3916_s27, 2  ;;  %s2475_s20 = scalar_lea.sflag [#allocation4], %s2474_s9 }
 0x7c5   : > { %p3442_p1 = pnand %p4991_p12, %p4990_p3 }
 0x7c7   : > { %3895 = dma.done.wait (!%p3442_p1), %s2475_s20, 4096  }
 0x7c8   : > { %3897 = vsyncadd (!%p3442_p1), %s2475_s20, 4294963200  ;;  %s2484_s23 = scalar_lea.sflag [#allocation19], %s2474_s9 }
 0x7c9   : > { %3899 = dma.done.wait (!%p3442_p1), %s2484_s23, 4096  }
 0x7ca   : > { %3901 = vsyncadd (!%p3442_p1), %s2484_s23, 4294963200  ;;  %s4992_s26 = sld [smem:[#allocation28_spill]]  ;;  %s4993_s16 = sld [smem:[#allocation29_spill]] }
 0x7cb   : > { %p40_p10 = scmp.ge.s32.totalorder %s4241_s18, 4   ;;  %s4994_s24 = smov %s3908_s25 }
 0x7cc   : > { %s4997_s27 = smov %s4241_s18 }
 0x7cd   :  { %42 = sbr.rel (!%p40_p10) target bundleno = 29 (0x1d), region = 187 }
 0x7d0   : > { %s4995_s25 = smov %s4992_s26  ;;  %s4996_s26 = smov %s4993_s16 }
 0x7d4   :  { %2489 = vsyncpa [#allocation3], 1 }
 0x7d5   :  { %2491 = vsyncpa [#allocation3 + $0x1], 1 }
 0x7d6   :  { %2492 = vsyncpa [#allocation6], 1 }
 0x7d7   :  { %2494 = vsyncpa [#allocation6 + $0x1], 1 }
 0x7d8   :  { %2495 = vsyncpa [#allocation9], 1 }
 0x7d9   :  { %2496 = vsyncpa [#allocation12], 1 }
 0x7da   :  { %2497 = vsyncpa [#allocation15], 1 }
 0x7db   :  { %2498 = vsyncpa [#allocation4], 1 }
 0x7dc   :  { %2500 = vsyncpa [#allocation4 + $0x1], 1 }
 0x7dd   :  { %2501 = vsyncpa [#allocation19], 1 }
 0x7de   :  { %2503 = vsyncpa [#allocation19 + $0x1], 1 }

</bundles_post_ra>
